<compile_context>
chip_gen: v7x
topology: tpu7x:2x2x1
jax: 0.10.0
libtpu: 0.0.40
codegen_flags: <defaults>
</compile_context>

<pallas_src>
import functools

import jax
import jax.numpy as jnp
from jax.experimental import pallas as pl
from jax.experimental.pallas import tpu as pltpu


def _gelu(x, approx):
    if approx:
        # tanh approximation rides the EUP slot (near-free filler, esp. on v5e).
        return jax.nn.gelu(x, approximate=True)
    # PyTorch nn.GELU() default = exact erf-based GELU.
    return 0.5 * x * (1.0 + jax.lax.erf(x * jnp.float32(0.7071067811865476)))


# --------------------------- fused projector_k + grouping_k kernel ---------------------------
def _slotcon_fused_kernel(x_ref, w1_ref, b1_ref, w2_ref, b2_ref, w3_ref, b3_ref,
                          slotn_ref, slots_out_ref, dots_out_ref, *,
                          temp, eps, hw, approx_gelu):
    tb, hw_pad, cin = x_ref.shape
    k, d = slotn_ref.shape
    rows = tb * hw_pad

    # ---- projector_k: DINOHead2d (1x1 conv -> BN(eval, folded into W/b) -> GELU) x2 -> 1x1 conv
    x = x_ref[...].reshape(rows, cin)                                                  # bf16 rows
    h = jnp.dot(x, w1_ref[...], preferred_element_type=jnp.float32) + b1_ref[...]
    h = _gelu(h, approx_gelu).astype(jnp.bfloat16)
    h = jnp.dot(h, w2_ref[...], preferred_element_type=jnp.float32) + b2_ref[...]
    h = _gelu(h, approx_gelu).astype(jnp.bfloat16)
    feat = jnp.dot(h, w3_ref[...], preferred_element_type=jnp.float32) + b3_ref[...]   # (rows,d) f32

    # ---- grouping_k: SemanticGrouping ----
    # F.normalize(v, eps=1e-12) = v / max(||v||, eps) == v * rsqrt(max(||v||^2, eps^2))
    # (slot normalization is constant -> hoisted to the wrapper; slotn_ref is already unit-norm bf16)
    feat_n = feat * jax.lax.rsqrt(
        jnp.maximum(jnp.sum(feat * feat, axis=-1, keepdims=True), 1e-24))

    # dots[n, k] = <feat_n[n], slots_n[k]>  (== einsum 'bkd,bdhw->bkhw' in (position, slot) layout)
    dots = jax.lax.dot_general(feat_n.astype(jnp.bfloat16), slotn_ref[...],
                               (((1,), (1,)), ((), ())),
                               preferred_element_type=jnp.float32)                     # (rows, k)
    dots_out_ref[...] = dots.reshape(tb, hw_pad, k)                                    # K on lanes

    # softmax over slots + eps (per pixel)
    logits = dots * jnp.float32(1.0 / temp)
    m = jnp.max(logits, axis=-1, keepdims=True)
    e = jnp.exp(logits - m)
    attn = e * pl.reciprocal(jnp.sum(e, axis=-1, keepdims=True), approx=True) + jnp.float32(eps)

    attn3 = attn.reshape(tb, hw_pad, k)
    if hw_pad != hw:
        # mask padded spatial rows (small (hw_pad, 1) mask broadcast into the where)
        valid = jax.lax.broadcasted_iota(jnp.int32, (hw_pad, 1), 0) < hw
        attn3 = jnp.where(valid, attn3, jnp.float32(0.0))
    a_sum = jnp.sum(attn3, axis=1)[:, :, None]                                         # (tb, k, 1)

    # per-image pooling of the UN-normalized features, as ONE batched MXU op:
    #   slots[b, k, d] = sum_n attn[b, n, k] * feat[b, n, d]  / sum_n attn[b, n, k]
    feat3 = feat.astype(jnp.bfloat16).reshape(tb, hw_pad, d)
    pooled = jax.lax.dot_general(attn3.astype(jnp.bfloat16), feat3,
                                 (((1,), (1,)), ((0,), (0,))),
                                 preferred_element_type=jnp.float32)                   # (tb, k, d)
    slots_out_ref[...] = pooled * pl.reciprocal(a_sum, approx=True)


# ----------------------------------------- helpers -----------------------------------------
def _choose_batches_per_step(batch, hw_pad, rows_per_step, min_steps=1):
    """Largest divisor of `batch` whose row count fits the target MXU tile (never drops rows).

    min_steps keeps the grid length >= min_steps (when batch allows) so "parallel" grid steps
    can be sharded across v7x's two TensorCores.
    """
    tb = max(1, min(batch, rows_per_step // hw_pad))
    if min_steps > 1:
        tb = min(tb, max(1, batch // min_steps))
    while batch % tb:
        tb -= 1
    return tb


def _vmem_limit_bytes():
    """Per-generation VMEM budget with headroom for compiler scratch/spills."""
    try:
        cap = int(pltpu.get_tpu_info().vmem_capacity_bytes)
    except Exception:
        cap = 128 * 1024 * 1024
    # ~12.5% headroom; cap at ~100 MiB on 128 MiB parts (v5e/v6e), ~56 MiB on v7x.
    return min((cap * 7) // 8, 100 * 1024 * 1024)


def fold_projector_params(w1, cb1, gamma1, beta1, mean1, var1,
                          w2, cb2, gamma2, beta2, mean2, var2,
                          w3, cb3, bn_eps=1e-5, weight_dtype=jnp.bfloat16):
    """Fold eval-mode BatchNorm into the 1x1-conv weights (weights stored as (Cin, Cout))."""
    s1 = gamma1 / jnp.sqrt(var1 + bn_eps)
    s2 = gamma2 / jnp.sqrt(var2 + bn_eps)
    return dict(
        w1=(w1 * s1[None, :]).astype(weight_dtype),
        b1=((cb1 - mean1) * s1 + beta1)[None, :].astype(jnp.float32),
        w2=(w2 * s2[None, :]).astype(weight_dtype),
        b2=((cb2 - mean2) * s2 + beta2)[None, :].astype(jnp.float32),
        w3=w3.astype(weight_dtype),
        b3=cb3[None, :].astype(jnp.float32),
    )


# ----------------------------------------- wrapper -----------------------------------------
def slotcon_eval_forward(x_nchw, params, slot_embed, *, temp=0.07, eps=1e-6,
                         rows_per_step=2048, approx_gelu=False):
    B, C, H, W = x_nchw.shape
    hw = H * W
    hw_pad = ((hw + 7) // 8) * 8               # sublane-align the per-image spatial extent
    K, D = slot_embed.shape
    Hd = params["w1"].shape[1]

    # NCHW -> channel-last pixel rows (B, HW_pad, C), bf16 for the MXU / half the HBM traffic.
    x_rows = jnp.transpose(x_nchw, (0, 2, 3, 1)).reshape(B, hw, C)
    if hw_pad != hw:
        x_rows = jnp.pad(x_rows, ((0, 0), (0, hw_pad - hw), (0, 0)))
    x_rows = x_rows.astype(jnp.bfloat16)

    # Hoist the constant slot-embedding L2 normalization out of the kernel; bf16 for the MXU.
    se = slot_embed.astype(jnp.float32)
    slots_n = (se * jax.lax.rsqrt(
        jnp.maximum(jnp.sum(se * se, axis=-1, keepdims=True), 1e-24))).astype(jnp.bfloat16)

    tb = _choose_batches_per_step(B, hw_pad, rows_per_step, min_steps=2)
    grid = (B // tb,)

    kernel = functools.partial(_slotcon_fused_kernel, temp=temp, eps=eps, hw=hw,
                               approx_gelu=approx_gelu)

    rows_total = B * hw_pad
    cost = pl.CostEstimate(
        flops=int(2 * rows_total * (C * Hd + Hd * Hd + Hd * D + D * K)
                  + 2 * rows_total * K * D),
        transcendentals=int(rows_total * (2 * Hd + K)),          # 2x GELU + softmax exp
        bytes_accessed=int(rows_total * C * 2                    # x (bf16)
                           + (C * Hd + Hd * Hd + Hd * D + K * D) * 2   # bf16 weights + slots
                           + (2 * Hd + D) * 4                          # f32 biases
                           + B * K * D * 4 + B * hw_pad * K * 4),      # f32 outputs
    )

    args = (x_rows, params["w1"], params["b1"], params["w2"], params["b2"],
            params["w3"], params["b3"], slots_n)

    def build(single_buffer_weights):
        def const_spec(shape):
            # Constant-index blocks are never re-fetched: single-buffer them so they don't
            # pay 2x VMEM for pointless double-buffering.
            if single_buffer_weights:
                return pl.BlockSpec(shape, lambda i: (0, 0), pipeline_mode=pl.Buffered(1))
            return pl.BlockSpec(shape, lambda i: (0, 0))

        return pl.pallas_call(
            kernel,
            out_shape=(jax.ShapeDtypeStruct((B, K, D), jnp.float32),
                       jax.ShapeDtypeStruct((B, hw_pad, K), jnp.float32)),
            grid_spec=pltpu.PrefetchScalarGridSpec(
                num_scalar_prefetch=0,
                grid=grid,
                in_specs=[
                    pl.BlockSpec((tb, hw_pad, C), lambda i: (i, 0, 0)),   # pixel rows (bf16)
                    const_spec((C, Hd)),                                  # w1 (BN folded, bf16)
                    const_spec((1, Hd)),                                  # b1 (f32)
                    const_spec((Hd, Hd)),                                 # w2 (BN folded, bf16)
                    const_spec((1, Hd)),                                  # b2 (f32)
                    const_spec((Hd, D)),                                  # w3 (bf16)
                    const_spec((1, D)),                                   # b3 (f32)
                    const_spec((K, D)),                                   # normalized slots (bf16)
                ],
                out_specs=(pl.BlockSpec((tb, K, D), lambda i: (i, 0, 0)),
                           pl.BlockSpec((tb, hw_pad, K), lambda i: (i, 0, 0))),
            ),
            compiler_params=pltpu.CompilerParams(
                dimension_semantics=("parallel",),
                vmem_limit_bytes=_vmem_limit_bytes(),
            ),
            cost_estimate=cost,
        )

    try:
        out = build(single_buffer_weights=True)(*args)
        out = jax.block_until_ready(out)
    except Exception:
        # pipeline_mode=pl.Buffered(1) unsupported on this jax version -> default pipelining.
        out = build(single_buffer_weights=False)(*args)
    slots, dots = out

    # (B, HW_pad, K) -> crop padding -> PyTorch (B, K, H, W).  These are the raw cosine dots
    # (pre-temperature, pre-softmax), matching SemanticGrouping's second return value.
    probs = jnp.transpose(dots[:, :hw, :], (0, 2, 1)).reshape(B, K, H, W)
    return slots, probs


# ------------------------------ pure-JAX f32 reference (for check) ------------------------------
def slotcon_eval_reference(x_nchw, params_f32, slot_embed, *, temp=0.07, eps=1e-6):
    B, C, H, W = x_nchw.shape
    x = jnp.transpose(x_nchw, (0, 2, 3, 1)).reshape(B, H * W, C).astype(jnp.float32)
    h = jax.nn.gelu(x @ params_f32["w1"] + params_f32["b1"], approximate=False)
    h = jax.nn.gelu(h @ params_f32["w2"] + params_f32["b2"], approximate=False)
    feat = h @ params_f32["w3"] + params_f32["b3"]                                  # (B, HW, D)
    sn = slot_embed / jnp.maximum(jnp.linalg.norm(slot_embed, axis=-1, keepdims=True), 1e-12)
    fn = feat / jnp.maximum(jnp.linalg.norm(feat, axis=-1, keepdims=True), 1e-12)
    dots = jnp.einsum('bnd,kd->bnk', fn, sn)
    attn = jax.nn.softmax(dots / temp, axis=-1) + eps
    attn = attn / jnp.sum(attn, axis=1, keepdims=True)
    slots = jnp.einsum('bnk,bnd->bkd', attn, feat)
    probs = jnp.transpose(dots, (0, 2, 1)).reshape(B, -1, H, W)
    return slots, probs


if __name__ == "__main__":
    # Small shapes consistent with the module (real SlotCon: C_in=2048, hidden=4096, out=256,
    # K=256 prototypes, 7x7 feature map).  dim_out=K=128 keeps the slots/dots stores lane-dense
    # even at this toy size; H=W=7 exercises the non-multiple-of-8 spatial padding/masking path.
    B, C_in, H, W = 4, 128, 7, 7
    dim_hidden, dim_out, K = 256, 128, 128

    key = jax.random.PRNGKey(0)
    ks = jax.random.split(key, 5)

    # stand-in for encoder_k(x) output feature map
    x = jax.random.normal(ks[0], (B, C_in, H, W), jnp.float32)

    # DINOHead2d params: 1x1 convs (trunc_normal std=0.02, bias=0) + BatchNorm2d eval buffers.
    w1 = (jax.random.normal(ks[1], (C_in, dim_hidden)) * 0.02).astype(jnp.float32)
    w2 = (jax.random.normal(ks[2], (dim_hidden, dim_hidden)) * 0.02).astype(jnp.float32)
    w3 = (jax.random.normal(ks[3], (dim_hidden, dim_out)) * 0.02).astype(jnp.float32)
    zeros_h = jnp.zeros((dim_hidden,), jnp.float32)
    ones_h = jnp.ones((dim_hidden,), jnp.float32)
    fold_args = (w1, zeros_h, ones_h, zeros_h, zeros_h, ones_h,
                 w2, zeros_h, ones_h, zeros_h, zeros_h, ones_h,
                 w3, jnp.zeros((dim_out,), jnp.float32))
    params = fold_projector_params(*fold_args, weight_dtype=jnp.bfloat16)
    params_f32 = fold_projector_params(*fold_args, weight_dtype=jnp.float32)

    # SemanticGrouping slot embedding: nn.Embedding default init N(0, 1)
    slot_embed = jax.random.normal(ks[4], (K, dim_out), jnp.float32)

    slots, probs = slotcon_eval_forward(x, params, slot_embed)
    jax.block_until_ready((slots, probs))
    assert slots.shape == (B, K, dim_out) and probs.shape == (B, K, H, W)
    assert bool(jnp.all(jnp.isfinite(slots))) and bool(jnp.all(jnp.isfinite(probs)))

    # Tolerance check vs. f32 reference (bf16 matmuls + approx reciprocals -> loose tolerances).
    slots_ref, probs_ref = slotcon_eval_reference(x, params_f32, slot_embed)
    err_p = float(jnp.max(jnp.abs(probs - probs_ref)))
    err_s = float(jnp.max(jnp.abs(slots - slots_ref)))
    assert err_p < 5e-2 and err_s < 5e-3, (err_p, err_s)
    print("KERNEL_OK")
</pallas_src>

<mosaic_0001>
module attributes {stable_mosaic.version = 11 : i64} {
  func.func @_slotcon_fused_kernel(%arg0: i32, %arg1: memref<2x56x128xbf16, #tpu.memory_space<vmem>>, %arg2: memref<128x256xbf16, #tpu.memory_space<vmem>>, %arg3: memref<1x256xf32, #tpu.memory_space<vmem>>, %arg4: memref<256x256xbf16, #tpu.memory_space<vmem>>, %arg5: memref<1x256xf32, #tpu.memory_space<vmem>>, %arg6: memref<256x128xbf16, #tpu.memory_space<vmem>>, %arg7: memref<1x128xf32, #tpu.memory_space<vmem>>, %arg8: memref<128x128xbf16, #tpu.memory_space<vmem>>, %arg9: memref<2x128x128xf32, #tpu.memory_space<vmem>>, %arg10: memref<2x56x128xf32, #tpu.memory_space<vmem>>) attributes {dimension_semantics = [#tpu.dimension_semantics<parallel>], iteration_bounds = array<i64: 2>, scalar_prefetch = 0 : i64, scratch_operands = 0 : i64, tpu.core_type = #tpu.core_type<tc>, window_params = [{transform_indices = @transform_0, window_bounds = array<i64: 2, 56, 128>}, {pipeline_mode = #tpu.pipeline_mode<synchronous>, transform_indices = @transform_1, window_bounds = array<i64: 128, 256>}, {pipeline_mode = #tpu.pipeline_mode<synchronous>, transform_indices = @transform_2, window_bounds = array<i64: 1, 256>}, {pipeline_mode = #tpu.pipeline_mode<synchronous>, transform_indices = @transform_3, window_bounds = array<i64: 256, 256>}, {pipeline_mode = #tpu.pipeline_mode<synchronous>, transform_indices = @transform_4, window_bounds = array<i64: 1, 256>}, {pipeline_mode = #tpu.pipeline_mode<synchronous>, transform_indices = @transform_5, window_bounds = array<i64: 256, 128>}, {pipeline_mode = #tpu.pipeline_mode<synchronous>, transform_indices = @transform_6, window_bounds = array<i64: 1, 128>}, {pipeline_mode = #tpu.pipeline_mode<synchronous>, transform_indices = @transform_7, window_bounds = array<i64: 128, 128>}, {transform_indices = @transform_8, window_bounds = array<i64: 2, 128, 128>}, {transform_indices = @transform_9, window_bounds = array<i64: 2, 56, 128>}]} {
    %c0 = arith.constant 0 : index
    %c0_0 = arith.constant 0 : index
    %c0_1 = arith.constant 0 : index
    %0 = vector.load %arg1[%c0, %c0_0, %c0_1] : memref<2x56x128xbf16, #tpu.memory_space<vmem>>, vector<2x56x128xbf16>
    %1 = vector.shape_cast %0 : vector<2x56x128xbf16> to vector<112x128xbf16>
    %c0_2 = arith.constant 0 : index
    %c0_3 = arith.constant 0 : index
    %2 = vector.load %arg2[%c0_2, %c0_3] : memref<128x256xbf16, #tpu.memory_space<vmem>>, vector<128x256xbf16>
    %cst = arith.constant dense<0.000000e+00> : vector<112x256xf32>
    %3 = tpu.matmul %1, %2, %cst {dimension_numbers = #tpu.dot_dimension_numbers<[1], [0], [0], [1], [0, 0, 1, 1], [], []>} : vector<112x128xbf16>, vector<128x256xbf16>, vector<112x256xf32> -> vector<112x256xf32>
    %c0_4 = arith.constant 0 : index
    %c0_5 = arith.constant 0 : index
    %4 = vector.load %arg3[%c0_4, %c0_5] : memref<1x256xf32, #tpu.memory_space<vmem>>, vector<1x256xf32>
    %5 = vector.broadcast %4 : vector<1x256xf32> to vector<112x256xf32>
    %6 = arith.addf %3, %5 : vector<112x256xf32>
    %cst_6 = arith.constant 5.000000e-01 : f32
    %7 = vector.broadcast %cst_6 : f32 to vector<112x256xf32>
    %8 = arith.mulf %7, %6 : vector<112x256xf32>
    %cst_7 = arith.constant 0.707106769 : f32
    %9 = vector.broadcast %cst_7 : f32 to vector<112x256xf32>
    %10 = arith.mulf %6, %9 : vector<112x256xf32>
    %11 = math.erf %10 : vector<112x256xf32>
    %cst_8 = arith.constant 1.000000e+00 : f32
    %12 = vector.broadcast %cst_8 : f32 to vector<112x256xf32>
    %13 = arith.addf %12, %11 : vector<112x256xf32>
    %14 = arith.mulf %8, %13 : vector<112x256xf32>
    %15 = arith.truncf %14 : vector<112x256xf32> to vector<112x256xbf16>
    %c0_9 = arith.constant 0 : index
    %c0_10 = arith.constant 0 : index
    %16 = vector.load %arg4[%c0_9, %c0_10] : memref<256x256xbf16, #tpu.memory_space<vmem>>, vector<256x256xbf16>
    %cst_11 = arith.constant dense<0.000000e+00> : vector<112x256xf32>
    %17 = tpu.matmul %15, %16, %cst_11 {dimension_numbers = #tpu.dot_dimension_numbers<[1], [0], [0], [1], [0, 0, 1, 1], [], []>} : vector<112x256xbf16>, vector<256x256xbf16>, vector<112x256xf32> -> vector<112x256xf32>
    %c0_12 = arith.constant 0 : index
    %c0_13 = arith.constant 0 : index
    %18 = vector.load %arg5[%c0_12, %c0_13] : memref<1x256xf32, #tpu.memory_space<vmem>>, vector<1x256xf32>
    %19 = vector.broadcast %18 : vector<1x256xf32> to vector<112x256xf32>
    %20 = arith.addf %17, %19 : vector<112x256xf32>
    %cst_14 = arith.constant 5.000000e-01 : f32
    %21 = vector.broadcast %cst_14 : f32 to vector<112x256xf32>
    %22 = arith.mulf %21, %20 : vector<112x256xf32>
    %cst_15 = arith.constant 0.707106769 : f32
    %23 = vector.broadcast %cst_15 : f32 to vector<112x256xf32>
    %24 = arith.mulf %20, %23 : vector<112x256xf32>
    %25 = math.erf %24 : vector<112x256xf32>
    %cst_16 = arith.constant 1.000000e+00 : f32
    %26 = vector.broadcast %cst_16 : f32 to vector<112x256xf32>
    %27 = arith.addf %26, %25 : vector<112x256xf32>
    %28 = arith.mulf %22, %27 : vector<112x256xf32>
    %29 = arith.truncf %28 : vector<112x256xf32> to vector<112x256xbf16>
    %c0_17 = arith.constant 0 : index
    %c0_18 = arith.constant 0 : index
    %30 = vector.load %arg6[%c0_17, %c0_18] : memref<256x128xbf16, #tpu.memory_space<vmem>>, vector<256x128xbf16>
    %cst_19 = arith.constant dense<0.000000e+00> : vector<112x128xf32>
    %31 = tpu.matmul %29, %30, %cst_19 {dimension_numbers = #tpu.dot_dimension_numbers<[1], [0], [0], [1], [0, 0, 1, 1], [], []>} : vector<112x256xbf16>, vector<256x128xbf16>, vector<112x128xf32> -> vector<112x128xf32>
    %c0_20 = arith.constant 0 : index
    %c0_21 = arith.constant 0 : index
    %32 = vector.load %arg7[%c0_20, %c0_21] : memref<1x128xf32, #tpu.memory_space<vmem>>, vector<1x128xf32>
    %33 = vector.broadcast %32 : vector<1x128xf32> to vector<112x128xf32>
    %34 = arith.addf %31, %33 : vector<112x128xf32>
    %35 = arith.mulf %34, %34 : vector<112x128xf32>
    %cst_22 = arith.constant dense<0.000000e+00> : vector<112xf32>
    %36 = vector.multi_reduction <add>, %35, %cst_22 [1] : vector<112x128xf32> to vector<112xf32>
    %37 = vector.shape_cast %36 : vector<112xf32> to vector<112x1xf32>
    %cst_23 = arith.constant 1.000000e-24 : f32
    %38 = vector.broadcast %cst_23 : f32 to vector<112x1xf32>
    %39 = arith.maximumf %37, %38 : vector<112x1xf32>
    %40 = math.rsqrt %39 : vector<112x1xf32>
    %41 = vector.broadcast %40 : vector<112x1xf32> to vector<112x128xf32>
    %42 = arith.mulf %34, %41 : vector<112x128xf32>
    %43 = arith.truncf %42 : vector<112x128xf32> to vector<112x128xbf16>
    %c0_24 = arith.constant 0 : index
    %c0_25 = arith.constant 0 : index
    %44 = vector.load %arg8[%c0_24, %c0_25] : memref<128x128xbf16, #tpu.memory_space<vmem>>, vector<128x128xbf16>
    %cst_26 = arith.constant dense<0.000000e+00> : vector<112x128xf32>
    %45 = tpu.matmul %43, %44, %cst_26 {dimension_numbers = #tpu.dot_dimension_numbers<[1], [1], [0], [0], [0, 0, 1, 0], [], []>} : vector<112x128xbf16>, vector<128x128xbf16>, vector<112x128xf32> -> vector<112x128xf32>
    %46 = vector.shape_cast %45 : vector<112x128xf32> to vector<2x56x128xf32>
    %c0_27 = arith.constant 0 : index
    %c0_28 = arith.constant 0 : index
    %c0_29 = arith.constant 0 : index
    %47 = vector.load %arg10[%c0_27, %c0_28, %c0_29] : memref<2x56x128xf32, #tpu.memory_space<vmem>>, vector<2x56x128xf32>
    tpu.vector_store %arg10[%c0_27, %c0_28, %c0_29], %46 {strides = array<i32>} : memref<2x56x128xf32, #tpu.memory_space<vmem>>, vector<2x56x128xf32>,
    %cst_30 = arith.constant 14.2857141 : f32
    %48 = vector.broadcast %cst_30 : f32 to vector<112x128xf32>
    %49 = arith.mulf %45, %48 : vector<112x128xf32>
    %cst_31 = arith.constant dense<0xFF800000> : vector<112xf32>
    %50 = vector.multi_reduction <maximumf>, %49, %cst_31 [1] : vector<112x128xf32> to vector<112xf32>
    %51 = vector.shape_cast %50 : vector<112xf32> to vector<112x1xf32>
    %52 = vector.broadcast %51 : vector<112x1xf32> to vector<112x128xf32>
    %53 = arith.subf %49, %52 : vector<112x128xf32>
    %54 = math.exp %53 : vector<112x128xf32>
    %cst_32 = arith.constant dense<0.000000e+00> : vector<112xf32>
    %55 = vector.multi_reduction <add>, %54, %cst_32 [1] : vector<112x128xf32> to vector<112xf32>
    %56 = vector.shape_cast %55 : vector<112xf32> to vector<112x1xf32>
    %57 = tpu.reciprocal %56 {approx = true} : vector<112x1xf32> -> vector<112x1xf32>
    %58 = vector.broadcast %57 : vector<112x1xf32> to vector<112x128xf32>
    %59 = arith.mulf %54, %58 : vector<112x128xf32>
    %cst_33 = arith.constant 9.99999997E-7 : f32
    %60 = vector.broadcast %cst_33 : f32 to vector<112x128xf32>
    %61 = arith.addf %59, %60 : vector<112x128xf32>
    %62 = vector.shape_cast %61 : vector<112x128xf32> to vector<2x56x128xf32>
    %63 = tpu.iota {dimensions = array<i32: 0>} : vector<56x1xi32>
    %c49_i32 = arith.constant 49 : i32
    %64 = vector.broadcast %c49_i32 : i32 to vector<56x1xi32>
    %65 = arith.cmpi slt, %63, %64 : vector<56x1xi32>
    %cst_34 = arith.constant 0.000000e+00 : f32
    %66 = vector.shape_cast %65 : vector<56x1xi1> to vector<1x56x1xi1>
    %67 = vector.broadcast %66 : vector<1x56x1xi1> to vector<2x56x128xi1>
    %68 = vector.broadcast %cst_34 : f32 to vector<2x56x128xf32>
    %69 = arith.select %67, %62, %68 : vector<2x56x128xi1>, vector<2x56x128xf32>
    %cst_35 = arith.constant dense<0.000000e+00> : vector<2x128xf32>
    %70 = vector.multi_reduction <add>, %69, %cst_35 [1] : vector<2x56x128xf32> to vector<2x128xf32>
    %71 = vector.shape_cast %70 : vector<2x128xf32> to vector<2x128x1xf32>
    %72 = arith.truncf %34 : vector<112x128xf32> to vector<112x128xbf16>
    %73 = vector.shape_cast %72 : vector<112x128xbf16> to vector<2x56x128xbf16>
    %74 = arith.truncf %69 : vector<2x56x128xf32> to vector<2x56x128xbf16>
    %cst_36 = arith.constant dense<0.000000e+00> : vector<2x128x128xf32>
    %75 = tpu.matmul %74, %73, %cst_36 {dimension_numbers = #tpu.dot_dimension_numbers<[1], [1], [2], [2], [0, 0, 0, 2, 1, 2], [0], [0]>} : vector<2x56x128xbf16>, vector<2x56x128xbf16>, vector<2x128x128xf32> -> vector<2x128x128xf32>
    %76 = tpu.reciprocal %71 {approx = true} : vector<2x128x1xf32> -> vector<2x128x1xf32>
    %77 = vector.broadcast %76 : vector<2x128x1xf32> to vector<2x128x128xf32>
    %78 = arith.mulf %75, %77 : vector<2x128x128xf32>
    %c0_37 = arith.constant 0 : index
    %c0_38 = arith.constant 0 : index
    %c0_39 = arith.constant 0 : index
    %79 = vector.load %arg9[%c0_37, %c0_38, %c0_39] : memref<2x128x128xf32, #tpu.memory_space<vmem>>, vector<2x128x128xf32>
    tpu.vector_store %arg9[%c0_37, %c0_38, %c0_39], %78 {strides = array<i32>} : memref<2x128x128xf32, #tpu.memory_space<vmem>>, vector<2x128x128xf32>,
    return
  }
  func.func @transform_0(%arg0: i32) -> (i32, i32, i32) {
    %c0_i32 = arith.constant 0 : i32
    %c0_i32_0 = arith.constant 0 : i32
    %c0_i32_1 = arith.constant 0 : i32
    return %arg0, %c0_i32, %c0_i32_0 : i32, i32, i32
  }
  func.func @transform_1(%arg0: i32) -> (i32, i32) {
    %c0_i32 = arith.constant 0 : i32
    %c0_i32_0 = arith.constant 0 : i32
    %c0_i32_1 = arith.constant 0 : i32
    return %c0_i32, %c0_i32_0 : i32, i32
  }
  func.func @transform_2(%arg0: i32) -> (i32, i32) {
    %c0_i32 = arith.constant 0 : i32
    %c0_i32_0 = arith.constant 0 : i32
    %c0_i32_1 = arith.constant 0 : i32
    return %c0_i32, %c0_i32_0 : i32, i32
  }
  func.func @transform_3(%arg0: i32) -> (i32, i32) {
    %c0_i32 = arith.constant 0 : i32
    %c0_i32_0 = arith.constant 0 : i32
    %c0_i32_1 = arith.constant 0 : i32
    return %c0_i32, %c0_i32_0 : i32, i32
  }
  func.func @transform_4(%arg0: i32) -> (i32, i32) {
    %c0_i32 = arith.constant 0 : i32
    %c0_i32_0 = arith.constant 0 : i32
    %c0_i32_1 = arith.constant 0 : i32
    return %c0_i32, %c0_i32_0 : i32, i32
  }
  func.func @transform_5(%arg0: i32) -> (i32, i32) {
    %c0_i32 = arith.constant 0 : i32
    %c0_i32_0 = arith.constant 0 : i32
    %c0_i32_1 = arith.constant 0 : i32
    return %c0_i32, %c0_i32_0 : i32, i32
  }
  func.func @transform_6(%arg0: i32) -> (i32, i32) {
    %c0_i32 = arith.constant 0 : i32
    %c0_i32_0 = arith.constant 0 : i32
    %c0_i32_1 = arith.constant 0 : i32
    return %c0_i32, %c0_i32_0 : i32, i32
  }
  func.func @transform_7(%arg0: i32) -> (i32, i32) {
    %c0_i32 = arith.constant 0 : i32
    %c0_i32_0 = arith.constant 0 : i32
    %c0_i32_1 = arith.constant 0 : i32
    return %c0_i32, %c0_i32_0 : i32, i32
  }
  func.func @transform_8(%arg0: i32) -> (i32, i32, i32) {
    %c0_i32 = arith.constant 0 : i32
    %c0_i32_0 = arith.constant 0 : i32
    %c0_i32_1 = arith.constant 0 : i32
    return %arg0, %c0_i32, %c0_i32_0 : i32, i32, i32
  }
  func.func @transform_9(%arg0: i32) -> (i32, i32, i32) {
    %c0_i32 = arith.constant 0 : i32
    %c0_i32_0 = arith.constant 0 : i32
    %c0_i32_1 = arith.constant 0 : i32
    return %arg0, %c0_i32, %c0_i32_0 : i32, i32, i32
  }
}

module attributes {stable_mosaic.version = 11 : i64} {
  func.func @_slotcon_fused_kernel(%arg0: i32, %arg1: memref<2x56x128xbf16, #tpu.memory_space<vmem>>, %arg2: memref<128x256xbf16, #tpu.memory_space<vmem>>, %arg3: memref<1x256xf32, #tpu.memory_space<vmem>>, %arg4: memref<256x256xbf16, #tpu.memory_space<vmem>>, %arg5: memref<1x256xf32, #tpu.memory_space<vmem>>, %arg6: memref<256x128xbf16, #tpu.memory_space<vmem>>, %arg7: memref<1x128xf32, #tpu.memory_space<vmem>>, %arg8: memref<128x128xbf16, #tpu.memory_space<vmem>>, %arg9: memref<2x128x128xf32, #tpu.memory_space<vmem>>, %arg10: memref<2x56x128xf32, #tpu.memory_space<vmem>>) attributes {dimension_semantics = [#tpu.dimension_semantics<parallel>], iteration_bounds = array<i64: 2>, scalar_prefetch = 0 : i64, scratch_operands = 0 : i64, tpu.core_type = #tpu.core_type<tc>, window_params = [{transform_indices = @transform_0, window_bounds = array<i64: 2, 56, 128>}, {pipeline_mode = #tpu.pipeline_mode<synchronous>, transform_indices = @transform_1, window_bounds = array<i64: 128, 256>}, {pipeline_mode = #tpu.pipeline_mode<synchronous>, transform_indices = @transform_2, window_bounds = array<i64: 1, 256>}, {pipeline_mode = #tpu.pipeline_mode<synchronous>, transform_indices = @transform_3, window_bounds = array<i64: 256, 256>}, {pipeline_mode = #tpu.pipeline_mode<synchronous>, transform_indices = @transform_4, window_bounds = array<i64: 1, 256>}, {pipeline_mode = #tpu.pipeline_mode<synchronous>, transform_indices = @transform_5, window_bounds = array<i64: 256, 128>}, {pipeline_mode = #tpu.pipeline_mode<synchronous>, transform_indices = @transform_6, window_bounds = array<i64: 1, 128>}, {pipeline_mode = #tpu.pipeline_mode<synchronous>, transform_indices = @transform_7, window_bounds = array<i64: 128, 128>}, {transform_indices = @transform_8, window_bounds = array<i64: 2, 128, 128>}, {transform_indices = @transform_9, window_bounds = array<i64: 2, 56, 128>}]} {
    %c0 = arith.constant 0 : index
    %c0_0 = arith.constant 0 : index
    %c0_1 = arith.constant 0 : index
    %0 = vector.load %arg1[%c0, %c0_0, %c0_1] : memref<2x56x128xbf16, #tpu.memory_space<vmem>>, vector<2x56x128xbf16>
    %1 = vector.shape_cast %0 : vector<2x56x128xbf16> to vector<112x128xbf16>
    %c0_2 = arith.constant 0 : index
    %c0_3 = arith.constant 0 : index
    %2 = vector.load %arg2[%c0_2, %c0_3] : memref<128x256xbf16, #tpu.memory_space<vmem>>, vector<128x256xbf16>
    %cst = arith.constant dense<0.000000e+00> : vector<112x256xf32>
    %3 = tpu.matmul %1, %2, %cst {dimension_numbers = #tpu.dot_dimension_numbers<[1], [0], [0], [1], [0, 0, 1, 1], [], []>} : vector<112x128xbf16>, vector<128x256xbf16>, vector<112x256xf32> -> vector<112x256xf32>
    %c0_4 = arith.constant 0 : index
    %c0_5 = arith.constant 0 : index
    %4 = vector.load %arg3[%c0_4, %c0_5] : memref<1x256xf32, #tpu.memory_space<vmem>>, vector<1x256xf32>
    %5 = vector.broadcast %4 : vector<1x256xf32> to vector<112x256xf32>
    %6 = arith.addf %3, %5 : vector<112x256xf32>
    %cst_6 = arith.constant 5.000000e-01 : f32
    %7 = vector.broadcast %cst_6 : f32 to vector<112x256xf32>
    %8 = arith.mulf %7, %6 : vector<112x256xf32>
    %cst_7 = arith.constant 0.707106769 : f32
    %9 = vector.broadcast %cst_7 : f32 to vector<112x256xf32>
    %10 = arith.mulf %6, %9 : vector<112x256xf32>
    %11 = math.erf %10 : vector<112x256xf32>
    %cst_8 = arith.constant 1.000000e+00 : f32
    %12 = vector.broadcast %cst_8 : f32 to vector<112x256xf32>
    %13 = arith.addf %12, %11 : vector<112x256xf32>
    %14 = arith.mulf %8, %13 : vector<112x256xf32>
    %15 = arith.truncf %14 : vector<112x256xf32> to vector<112x256xbf16>
    %c0_9 = arith.constant 0 : index
    %c0_10 = arith.constant 0 : index
    %16 = vector.load %arg4[%c0_9, %c0_10] : memref<256x256xbf16, #tpu.memory_space<vmem>>, vector<256x256xbf16>
    %cst_11 = arith.constant dense<0.000000e+00> : vector<112x256xf32>
    %17 = tpu.matmul %15, %16, %cst_11 {dimension_numbers = #tpu.dot_dimension_numbers<[1], [0], [0], [1], [0, 0, 1, 1], [], []>} : vector<112x256xbf16>, vector<256x256xbf16>, vector<112x256xf32> -> vector<112x256xf32>
    %c0_12 = arith.constant 0 : index
    %c0_13 = arith.constant 0 : index
    %18 = vector.load %arg5[%c0_12, %c0_13] : memref<1x256xf32, #tpu.memory_space<vmem>>, vector<1x256xf32>
    %19 = vector.broadcast %18 : vector<1x256xf32> to vector<112x256xf32>
    %20 = arith.addf %17, %19 : vector<112x256xf32>
    %cst_14 = arith.constant 5.000000e-01 : f32
    %21 = vector.broadcast %cst_14 : f32 to vector<112x256xf32>
    %22 = arith.mulf %21, %20 : vector<112x256xf32>
    %cst_15 = arith.constant 0.707106769 : f32
    %23 = vector.broadcast %cst_15 : f32 to vector<112x256xf32>
    %24 = arith.mulf %20, %23 : vector<112x256xf32>
    %25 = math.erf %24 : vector<112x256xf32>
    %cst_16 = arith.constant 1.000000e+00 : f32
    %26 = vector.broadcast %cst_16 : f32 to vector<112x256xf32>
    %27 = arith.addf %26, %25 : vector<112x256xf32>
    %28 = arith.mulf %22, %27 : vector<112x256xf32>
    %29 = arith.truncf %28 : vector<112x256xf32> to vector<112x256xbf16>
    %c0_17 = arith.constant 0 : index
    %c0_18 = arith.constant 0 : index
    %30 = vector.load %arg6[%c0_17, %c0_18] : memref<256x128xbf16, #tpu.memory_space<vmem>>, vector<256x128xbf16>
    %cst_19 = arith.constant dense<0.000000e+00> : vector<112x128xf32>
    %31 = tpu.matmul %29, %30, %cst_19 {dimension_numbers = #tpu.dot_dimension_numbers<[1], [0], [0], [1], [0, 0, 1, 1], [], []>} : vector<112x256xbf16>, vector<256x128xbf16>, vector<112x128xf32> -> vector<112x128xf32>
    %c0_20 = arith.constant 0 : index
    %c0_21 = arith.constant 0 : index
    %32 = vector.load %arg7[%c0_20, %c0_21] : memref<1x128xf32, #tpu.memory_space<vmem>>, vector<1x128xf32>
    %33 = vector.broadcast %32 : vector<1x128xf32> to vector<112x128xf32>
    %34 = arith.addf %31, %33 : vector<112x128xf32>
    %35 = arith.mulf %34, %34 : vector<112x128xf32>
    %cst_22 = arith.constant dense<0.000000e+00> : vector<112xf32>
    %36 = vector.multi_reduction <add>, %35, %cst_22 [1] : vector<112x128xf32> to vector<112xf32>
    %37 = vector.shape_cast %36 : vector<112xf32> to vector<112x1xf32>
    %cst_23 = arith.constant 1.000000e-24 : f32
    %38 = vector.broadcast %cst_23 : f32 to vector<112x1xf32>
    %39 = arith.maximumf %37, %38 : vector<112x1xf32>
    %40 = math.rsqrt %39 : vector<112x1xf32>
    %41 = vector.broadcast %40 : vector<112x1xf32> to vector<112x128xf32>
    %42 = arith.mulf %34, %41 : vector<112x128xf32>
    %43 = arith.truncf %42 : vector<112x128xf32> to vector<112x128xbf16>
    %c0_24 = arith.constant 0 : index
    %c0_25 = arith.constant 0 : index
    %44 = vector.load %arg8[%c0_24, %c0_25] : memref<128x128xbf16, #tpu.memory_space<vmem>>, vector<128x128xbf16>
    %cst_26 = arith.constant dense<0.000000e+00> : vector<112x128xf32>
    %45 = tpu.matmul %43, %44, %cst_26 {dimension_numbers = #tpu.dot_dimension_numbers<[1], [1], [0], [0], [0, 0, 1, 0], [], []>} : vector<112x128xbf16>, vector<128x128xbf16>, vector<112x128xf32> -> vector<112x128xf32>
    %46 = vector.shape_cast %45 : vector<112x128xf32> to vector<2x56x128xf32>
    %c0_27 = arith.constant 0 : index
    %c0_28 = arith.constant 0 : index
    %c0_29 = arith.constant 0 : index
    %47 = vector.load %arg10[%c0_27, %c0_28, %c0_29] : memref<2x56x128xf32, #tpu.memory_space<vmem>>, vector<2x56x128xf32>
    tpu.vector_store %arg10[%c0_27, %c0_28, %c0_29], %46 {strides = array<i32>} : memref<2x56x128xf32, #tpu.memory_space<vmem>>, vector<2x56x128xf32>,
    %cst_30 = arith.constant 14.2857141 : f32
    %48 = vector.broadcast %cst_30 : f32 to vector<112x128xf32>
    %49 = arith.mulf %45, %48 : vector<112x128xf32>
    %cst_31 = arith.constant dense<0xFF800000> : vector<112xf32>
    %50 = vector.multi_reduction <maximumf>, %49, %cst_31 [1] : vector<112x128xf32> to vector<112xf32>
    %51 = vector.shape_cast %50 : vector<112xf32> to vector<112x1xf32>
    %52 = vector.broadcast %51 : vector<112x1xf32> to vector<112x128xf32>
    %53 = arith.subf %49, %52 : vector<112x128xf32>
    %54 = math.exp %53 : vector<112x128xf32>
    %cst_32 = arith.constant dense<0.000000e+00> : vector<112xf32>
    %55 = vector.multi_reduction <add>, %54, %cst_32 [1] : vector<112x128xf32> to vector<112xf32>
    %56 = vector.shape_cast %55 : vector<112xf32> to vector<112x1xf32>
    %57 = tpu.reciprocal %56 {approx = true} : vector<112x1xf32> -> vector<112x1xf32>
    %58 = vector.broadcast %57 : vector<112x1xf32> to vector<112x128xf32>
    %59 = arith.mulf %54, %58 : vector<112x128xf32>
    %cst_33 = arith.constant 9.99999997E-7 : f32
    %60 = vector.broadcast %cst_33 : f32 to vector<112x128xf32>
    %61 = arith.addf %59, %60 : vector<112x128xf32>
    %62 = vector.shape_cast %61 : vector<112x128xf32> to vector<2x56x128xf32>
    %63 = tpu.iota {dimensions = array<i32: 0>} : vector<56x1xi32>
    %c49_i32 = arith.constant 49 : i32
    %64 = vector.broadcast %c49_i32 : i32 to vector<56x1xi32>
    %65 = arith.cmpi slt, %63, %64 : vector<56x1xi32>
    %cst_34 = arith.constant 0.000000e+00 : f32
    %66 = vector.shape_cast %65 : vector<56x1xi1> to vector<1x56x1xi1>
    %67 = vector.broadcast %66 : vector<1x56x1xi1> to vector<2x56x128xi1>
    %68 = vector.broadcast %cst_34 : f32 to vector<2x56x128xf32>
    %69 = arith.select %67, %62, %68 : vector<2x56x128xi1>, vector<2x56x128xf32>
    %cst_35 = arith.constant dense<0.000000e+00> : vector<2x128xf32>
    %70 = vector.multi_reduction <add>, %69, %cst_35 [1] : vector<2x56x128xf32> to vector<2x128xf32>
    %71 = vector.shape_cast %70 : vector<2x128xf32> to vector<2x128x1xf32>
    %72 = arith.truncf %34 : vector<112x128xf32> to vector<112x128xbf16>
    %73 = vector.shape_cast %72 : vector<112x128xbf16> to vector<2x56x128xbf16>
    %74 = arith.truncf %69 : vector<2x56x128xf32> to vector<2x56x128xbf16>
    %cst_36 = arith.constant dense<0.000000e+00> : vector<2x128x128xf32>
    %75 = tpu.matmul %74, %73, %cst_36 {dimension_numbers = #tpu.dot_dimension_numbers<[1], [1], [2], [2], [0, 0, 0, 2, 1, 2], [0], [0]>} : vector<2x56x128xbf16>, vector<2x56x128xbf16>, vector<2x128x128xf32> -> vector<2x128x128xf32>
    %76 = tpu.reciprocal %71 {approx = true} : vector<2x128x1xf32> -> vector<2x128x1xf32>
    %77 = vector.broadcast %76 : vector<2x128x1xf32> to vector<2x128x128xf32>
    %78 = arith.mulf %75, %77 : vector<2x128x128xf32>
    %c0_37 = arith.constant 0 : index
    %c0_38 = arith.constant 0 : index
    %c0_39 = arith.constant 0 : index
    %79 = vector.load %arg9[%c0_37, %c0_38, %c0_39] : memref<2x128x128xf32, #tpu.memory_space<vmem>>, vector<2x128x128xf32>
    tpu.vector_store %arg9[%c0_37, %c0_38, %c0_39], %78 {strides = array<i32>} : memref<2x128x128xf32, #tpu.memory_space<vmem>>, vector<2x128x128xf32>,
    return
  }
  func.func @transform_0(%arg0: i32) -> (i32, i32, i32) {
    %c0_i32 = arith.constant 0 : i32
    %c0_i32_0 = arith.constant 0 : i32
    %c0_i32_1 = arith.constant 0 : i32
    return %arg0, %c0_i32, %c0_i32_0 : i32, i32, i32
  }
  func.func @transform_1(%arg0: i32) -> (i32, i32) {
    %c0_i32 = arith.constant 0 : i32
    %c0_i32_0 = arith.constant 0 : i32
    %c0_i32_1 = arith.constant 0 : i32
    return %c0_i32, %c0_i32_0 : i32, i32
  }
  func.func @transform_2(%arg0: i32) -> (i32, i32) {
    %c0_i32 = arith.constant 0 : i32
    %c0_i32_0 = arith.constant 0 : i32
    %c0_i32_1 = arith.constant 0 : i32
    return %c0_i32, %c0_i32_0 : i32, i32
  }
  func.func @transform_3(%arg0: i32) -> (i32, i32) {
    %c0_i32 = arith.constant 0 : i32
    %c0_i32_0 = arith.constant 0 : i32
    %c0_i32_1 = arith.constant 0 : i32
    return %c0_i32, %c0_i32_0 : i32, i32
  }
  func.func @transform_4(%arg0: i32) -> (i32, i32) {
    %c0_i32 = arith.constant 0 : i32
    %c0_i32_0 = arith.constant 0 : i32
    %c0_i32_1 = arith.constant 0 : i32
    return %c0_i32, %c0_i32_0 : i32, i32
  }
  func.func @transform_5(%arg0: i32) -> (i32, i32) {
    %c0_i32 = arith.constant 0 : i32
    %c0_i32_0 = arith.constant 0 : i32
    %c0_i32_1 = arith.constant 0 : i32
    return %c0_i32, %c0_i32_0 : i32, i32
  }
  func.func @transform_6(%arg0: i32) -> (i32, i32) {
    %c0_i32 = arith.constant 0 : i32
    %c0_i32_0 = arith.constant 0 : i32
    %c0_i32_1 = arith.constant 0 : i32
    return %c0_i32, %c0_i32_0 : i32, i32
  }
  func.func @transform_7(%arg0: i32) -> (i32, i32) {
    %c0_i32 = arith.constant 0 : i32
    %c0_i32_0 = arith.constant 0 : i32
    %c0_i32_1 = arith.constant 0 : i32
    return %c0_i32, %c0_i32_0 : i32, i32
  }
  func.func @transform_8(%arg0: i32) -> (i32, i32, i32) {
    %c0_i32 = arith.constant 0 : i32
    %c0_i32_0 = arith.constant 0 : i32
    %c0_i32_1 = arith.constant 0 : i32
    return %arg0, %c0_i32, %c0_i32_0 : i32, i32, i32
  }
  func.func @transform_9(%arg0: i32) -> (i32, i32, i32) {
    %c0_i32 = arith.constant 0 : i32
    %c0_i32_0 = arith.constant 0 : i32
    %c0_i32_1 = arith.constant 0 : i32
    return %arg0, %c0_i32, %c0_i32_0 : i32, i32, i32
  }
}

</mosaic_0001>

<bundles_post_ra>
// kernel: tpu_custom_call.1
= control target key start
LH: loop header
LB: loop body
LE: loop exit
PB: predicated region body
PF: predicated region fallthrough
CT: control target
= control target key end

     0   :  { %s4971_s0 = inlined_call_operand.hbm [shape: bf16[4,56,128], index: 0, kind: input, shape index: {}]   ;;  %s4972_s1 = inlined_call_operand.hbm [shape: bf16[128,256], index: 1, kind: input, shape index: {}]   ;;  %s4973_s2 = inlined_call_operand.hbm [shape: f32[1,256], index: 2, kind: input, shape index: {}]   ;;  %s4974_s3 = inlined_call_operand.hbm [shape: bf16[256,256], index: 3, kind: input, shape index: {}]   ;;  %s4975_s4 = inlined_call_operand.hbm [shape: f32[1,256], index: 4, kind: input, shape index: {}]   ;;  %s4976_s5 = inlined_call_operand.hbm [shape: bf16[256,128], index: 5, kind: input, shape index: {}]   ;;  %s4977_s6 = inlined_call_operand.hbm [shape: f32[1,128], index: 6, kind: input, shape index: {}]   ;;  %s4978_s7 = inlined_call_operand.hbm [shape: bf16[128,128], index: 7, kind: input, shape index: {}]   ;;  %s4979_s8 = inlined_call_operand.hbm [shape: f32[4,128,128], index: 8, kind: output, shape index: {0}]   ;;  %s4980_s9 = inlined_call_operand.hbm [shape: f32[4,56,128], index: 9, kind: output, shape index: {1}]  }
   0x1   :  { %4987 = sst [smem:[#allocation26_spill]] %s4972_s1 }
   0x2   :  { %4988 = sst [smem:[#allocation27_spill]] %s4974_s3 }
   0x3   :  { %4989 = sst [smem:[#allocation28_spill]] %s4979_s8 }
   0x4   :  { %15 = vsyncpa [#allocation3], 0 }
   0x5   :  { %17 = vsyncpa [#allocation3 + $0x1], 0 }
   0x6   :  { %18 = vsyncpa [#allocation6], 0 }
   0x7   :  { %19 = vsyncpa [#allocation9], 0 }
   0x8   :  { %20 = vsyncpa [#allocation12], 0 }
   0x9   :  { %21 = vsyncpa [#allocation15], 0 }
   0xa   :  { %22 = vsyncpa [#allocation4], 0 }
   0xb   :  { %24 = vsyncpa [#allocation4 + $0x1], 0 }
   0xc   :  { %25 = vsyncpa [#allocation18], 0 }
   0xd   :  { %27 = vsyncpa [#allocation18 + $0x1], 0  ;;  %s4054_s30 = smov 0   ;;  %s4056_s10 = smov 0  }
   0xe   :  { %s4058_s11 = smov 0   ;;  %s4060_s12 = smov 0  }
   0xf LB: > { %s3985_s13 = smov [#allocation5]   ;;  %s4075_s15 = sadd.s32 4294967295, %s3983_s12   ;;  %s3983_s12 = sphi %s4060_s12, %s5018_s12   ;;  %s3979_s11 = sphi %s4058_s11, %s5017_s11   ;;  %s3975_s10 = sphi %s4056_s10, %s5016_s10   ;;  %s3971_s30 = sphi %s4054_s30, %s5015_s30  }
  0x10   : > { %s275_s14 = sshll.u32 %s3985_s13, 4  ;;  %p2812_p0 = scmp.ge.s32.totalorder %s3983_s12, 1  ;;  %s4080_s14 = int_to_ptr.vmem [resolvable:$true] %s275_s14 }
  0x11   : > { %p4982_p1 = scmp.eq.s32.totalorder %s4075_s15, 0  ;;  %p263_p2 = scmp.lt.s32.totalorder %s3983_s12, 3 }
  0x12   : > { %s3986_s17 = smov [#allocation8]   ;;  %s3987_s20 = smov [#allocation11]  }
  0x13   : > { %p4082_p3 = pnand %p2812_p0, %p263_p2  ;;  %s299_s18 = sshll.u32 %s3986_s17, 4  ;;  %s4095_s18 = int_to_ptr.vmem [resolvable:$true] %s299_s18 }
  0x14   : > { %s323_s21 = sshll.u32 %s3987_s20, 4  ;;  %s4992_s1 = sld [smem:[#allocation26_spill]]  ;;  %s4097_s21 = int_to_ptr.vmem [resolvable:$true] %s323_s21 }
  0x15   : > { %s4990_s16 = scalar_select %p4082_p3, 1, 0 }
  0x16   : > { %p3183_p5 = pneg %p4082_p3 }
  0x18   : > { %p4091_p6 = pnand %p3183_p5, %p4982_p1 }
  0x1a   : > { %s3643_s24 = scalar_lea.hbm %s4992_s1, 2048  ;;  %p4107_p8 = pneg %p4091_p6 }
  0x1b   : > { %p3644_p7 = scmp.ne.s32.totalorder %s4992_s1, %s3643_s24  ;;  %p3650_p11 = scmp.lt.u32.totalorder %s3643_s24, %s4992_s1 }
  0x1d   : > { %p3646_p9 = pnand %p4107_p8, %p3644_p7 }
  0x1f   : > { %p3647_p10 = pneg %p3646_p9 }
  0x21   : > { %p3652_p12 = pnand %p3650_p11, %p3647_p10 }
  0x23   : > { %3655 = shalt.err (!%p3652_p12)
}
  0x24   : > { %s3656_s13 = scalar_lea.vmem %s4080_s14, 2048  ;;  %p3664_p5 = scmp.lt.s32.totalorder %s4080_s14, %s4080_s14 }
  0x25   : > { %p3657_p13 = scmp.ne.s32.totalorder %s4080_s14, %s3656_s13  ;;  %p3665_p4 = scmp.lt.s32.totalorder %s3656_s13, %s3656_s13 }
  0x27   : > { %p3659_p0 = pnand %p3657_p13, %p4107_p8  ;;  %p3666_p7 = por %p3665_p4, %p3664_p5 }
  0x29   : > { %p3660_p2 = pneg %p3659_p0 }
  0x2b   : > { %p3667_p9 = pnand %p3666_p7, %p3660_p2 }
  0x2d   : > { %3670 = shalt.err (!%p3667_p9)
}
  0x2e   : > { %s3988_s17 = smov 128   ;;  %s3989_s20 = smov 8  }
  0x2f   : > { %3186 = dma.hbm_to_vmem [thread:$0]  (!%p4091_p6), %s4992_s1, 2048, %s4080_s14, [#allocation6], %s3988_s17, %s3988_s17, %s3989_s20  }
  0x30   : > { %s4994_s3 = sld [smem:[#allocation27_spill]] }
  0x36   : > { %s3671_s26 = scalar_lea.hbm %s4994_s3, 4096 }
  0x37   : > { %p3672_p4 = scmp.ne.s32.totalorder %s4994_s3, %s3671_s26  ;;  %p3678_p12 = scmp.lt.u32.totalorder %s3671_s26, %s4994_s3 }
  0x39   : > { %p3674_p10 = pnand %p3672_p4, %p4107_p8 }
  0x3b   : > { %p3675_p11 = pneg %p3674_p10 }
  0x3d   : > { %p3680_p13 = pnand %p3678_p12, %p3675_p11 }
  0x3f   : > { %3683 = shalt.err (!%p3680_p13)
}
  0x40   : > { %s3684_s14 = scalar_lea.vmem %s4095_s18, 4096  ;;  %p3692_p7 = scmp.lt.s32.totalorder %s4095_s18, %s4095_s18 }
  0x41   : > { %p3685_p0 = scmp.ne.s32.totalorder %s4095_s18, %s3684_s14  ;;  %p3693_p9 = scmp.lt.s32.totalorder %s3684_s14, %s3684_s14 }
  0x43   : > { %p3687_p2 = pnand %p3685_p0, %p4107_p8  ;;  %p3694_p4 = por %p3693_p9, %p3692_p7 }
  0x45   : > { %p3688_p5 = pneg %p3687_p2 }
  0x47   : > { %p3695_p10 = pnand %p3694_p4, %p3688_p5 }
  0x49   : > { %3698 = shalt.err (!%p3695_p10)
}
  0x4a   : > { %3192 = dma.hbm_to_vmem [thread:$0]  (!%p4091_p6), %s4994_s3, 4096, %s4095_s18, [#allocation9], %s3988_s17, %s3988_s17, %s3989_s20  }
  0x4b   : > { %s3699_s25 = scalar_lea.hbm %s4976_s5, 2048 }
  0x4c   : > { %p3700_p11 = scmp.ne.s32.totalorder %s4976_s5, %s3699_s25  ;;  %p3706_p0 = scmp.lt.u32.totalorder %s3699_s25, %s4976_s5 }
  0x4e   : > { %p3702_p12 = pnand %p3700_p11, %p4107_p8 }
  0x50   : > { %p3703_p13 = pneg %p3702_p12 }
  0x52   : > { %p3708_p2 = pnand %p3706_p0, %p3703_p13 }
  0x54   : > { %3711 = shalt.err (!%p3708_p2)
}
  0x55   : > { %s3712_s18 = scalar_lea.vmem %s4097_s21, 2048  ;;  %p3720_p4 = scmp.lt.s32.totalorder %s4097_s21, %s4097_s21 }
  0x56   : > { %p3713_p5 = scmp.ne.s32.totalorder %s4097_s21, %s3712_s18  ;;  %p3721_p10 = scmp.lt.s32.totalorder %s3712_s18, %s3712_s18 }
  0x58   : > { %p3715_p7 = pnand %p3713_p5, %p4107_p8  ;;  %p3722_p11 = por %p3721_p10, %p3720_p4 }
  0x5a   : > { %p3716_p9 = pneg %p3715_p7 }
  0x5c   : > { %p3723_p12 = pnand %p3722_p11, %p3716_p9 }
  0x5e   : > { %3726 = shalt.err (!%p3723_p12)
}
  0x5f   : > { %s4984_s17 = smov 64   ;;  %s4985_s20 = smov 4  }
  0x60   : > { %3198 = dma.hbm_to_vmem [thread:$0]  (!%p4091_p6), %s4976_s5, 2048, %s4097_s21, [#allocation12], %s4984_s17, %s4984_s17, %s4985_s20  }
  0x61   : > { %s3992_s22 = smov [#allocation7]   ;;  %s3993_s24 = smov [#allocation10]  }
  0x62   : > { %s289_s23 = sshll.u32 %s3992_s22, 4  ;;  %s313_s25 = sshll.u32 %s3993_s24, 4  ;;  %s290_s23 = int_to_ptr.vmem [resolvable:$true] %s289_s23  ;;  %s314_s25 = int_to_ptr.vmem [resolvable:$true] %s313_s25 }
  0x63   : > { %s3727_s29 = scalar_lea.hbm %s4973_s2, 32 }
  0x64   : > { %p3728_p13 = scmp.ne.s32.totalorder %s4973_s2, %s3727_s29  ;;  %p3734_p5 = scmp.lt.u32.totalorder %s3727_s29, %s4973_s2 }
  0x66   : > { %p3730_p0 = pnand %p3728_p13, %p4107_p8 }
  0x68   : > { %p3731_p2 = pneg %p3730_p0 }
  0x6a   : > { %p3736_p7 = pnand %p3734_p5, %p3731_p2 }
  0x6c   : > { %3739 = shalt.err (!%p3736_p7)
}
  0x6d   : > { %s3740_s21 = scalar_lea.vmem %s290_s23, 32  ;;  %p3748_p11 = scmp.lt.s32.totalorder %s290_s23, %s290_s23 }
  0x6e   : > { %p3741_p9 = scmp.ne.s32.totalorder %s290_s23, %s3740_s21  ;;  %p3749_p12 = scmp.lt.s32.totalorder %s3740_s21, %s3740_s21 }
  0x70   : > { %p3743_p4 = pnand %p3741_p9, %p4107_p8  ;;  %p3750_p1 = por %p3749_p12, %p3748_p11 }
  0x72   : > { %p3744_p10 = pneg %p3743_p4 }
  0x74   : > { %p3751_p3 = pnand %p3750_p1, %p3744_p10 }
  0x76   : > { %3754 = shalt.err (!%p3751_p3)
}
  0x77   : > { %3189 = dma.hbm_to_vmem [thread:$0]  (!%p4091_p6), %s4973_s2, 32, %s290_s23, [#allocation6]  }
  0x78   : > { %s3755_s22 = scalar_lea.hbm %s4975_s4, 32 }
  0x79   : > { %p3756_p13 = scmp.ne.s32.totalorder %s4975_s4, %s3755_s22  ;;  %p3762_p3 = scmp.lt.u32.totalorder %s3755_s22, %s4975_s4 }
  0x7b   : > { %p3758_p0 = pnand %p3756_p13, %p4107_p8 }
  0x7d   : > { %p3759_p1 = pneg %p3758_p0 }
  0x7f   : > { %p3764_p2 = pnand %p3762_p3, %p3759_p1 }
  0x81   : > { %3767 = shalt.err (!%p3764_p2)
}
  0x82   : > { %s3768_s13 = scalar_lea.vmem %s314_s25, 32  ;;  %p3776_p4 = scmp.lt.s32.totalorder %s314_s25, %s314_s25 }
  0x83   : > { %p3769_p5 = scmp.ne.s32.totalorder %s314_s25, %s3768_s13  ;;  %p3777_p10 = scmp.lt.s32.totalorder %s3768_s13, %s3768_s13 }
  0x85   : > { %p3771_p7 = pnand %p3769_p5, %p4107_p8  ;;  %p3778_p11 = por %p3777_p10, %p3776_p4 }
  0x87   : > { %p3772_p9 = pneg %p3771_p7 }
  0x89   : > { %p3779_p12 = pnand %p3778_p11, %p3772_p9 }
  0x8b   : > { %3782 = shalt.err (!%p3779_p12)
}
  0x8c   : > { %3195 = dma.hbm_to_vmem [thread:$0]  (!%p4091_p6), %s4975_s4, 32, %s314_s25, [#allocation9]  }
  0x8d   : > { %s3994_s21 = smov [#allocation13]   ;;  %s3995_s8 = smov [#allocation14]  }
  0x8e   : > { %s337_s14 = sshll.u32 %s3994_s21, 4  ;;  %s347_s1 = sshll.u32 %s3995_s8, 4  ;;  %s338_s14 = int_to_ptr.vmem [resolvable:$true] %s337_s14  ;;  %s348_s1 = int_to_ptr.vmem [resolvable:$true] %s347_s1 }
  0x8f   : > { %s3783_s24 = scalar_lea.hbm %s4977_s6, 16 }
  0x90   : > { %p3784_p13 = scmp.ne.s32.totalorder %s4977_s6, %s3783_s24  ;;  %p3790_p3 = scmp.lt.u32.totalorder %s3783_s24, %s4977_s6 }
  0x92   : > { %p3786_p0 = pnand %p3784_p13, %p4107_p8 }
  0x94   : > { %p3787_p1 = pneg %p3786_p0 }
  0x96   : > { %p3792_p2 = pnand %p3790_p3, %p3787_p1 }
  0x98   : > { %3795 = shalt.err (!%p3792_p2)
}
  0x99   : > { %s3796_s25 = scalar_lea.vmem %s338_s14, 16  ;;  %s3803_s23 = scalar_lea.vmem %s338_s14, 32 }
  0x9a   : > { %p3797_p5 = scmp.ne.s32.totalorder %s338_s14, %s3796_s25  ;;  %p3804_p4 = scmp.lt.s32.totalorder %s338_s14, %s338_s14 }
  0x9b   : > { %p3805_p10 = scmp.lt.s32.totalorder %s3803_s23, %s3796_s25 }
  0x9c   : > { %p3799_p7 = pnand %p3797_p5, %p4107_p8 }
  0x9d   : > { %p3806_p11 = por %p3805_p10, %p3804_p4 }
  0x9e   : > { %p3800_p9 = pneg %p3799_p7 }
  0xa0   : > { %p3807_p12 = pnand %p3806_p11, %p3800_p9 }
  0xa2   : > { %3810 = shalt.err (!%p3807_p12)
}
  0xa3   : > { %3201 = dma.hbm_to_vmem [thread:$0]  (!%p4091_p6), %s4977_s6, 16, %s338_s14, [#allocation12]  }
  0xa4   : > { %s3811_s22 = scalar_lea.hbm %s4978_s7, 1024 }
  0xa5   : > { %p3812_p13 = scmp.ne.s32.totalorder %s4978_s7, %s3811_s22  ;;  %p3818_p3 = scmp.lt.u32.totalorder %s3811_s22, %s4978_s7 }
  0xa7   : > { %p3814_p0 = pnand %p3812_p13, %p4107_p8 }
  0xa9   : > { %p3815_p1 = pneg %p3814_p0 }
  0xab   : > { %p3820_p2 = pnand %p3818_p3, %p3815_p1 }
  0xad   : > { %3823 = shalt.err (!%p3820_p2)
}
  0xae   : > { %s3824_s13 = scalar_lea.vmem %s348_s1, 1024  ;;  %p3832_p4 = scmp.lt.s32.totalorder %s348_s1, %s348_s1 }
  0xaf   : > { %p3825_p5 = scmp.ne.s32.totalorder %s348_s1, %s3824_s13  ;;  %p3833_p10 = scmp.lt.s32.totalorder %s3824_s13, %s3824_s13 }
  0xb1   : > { %p3827_p7 = pnand %p3825_p5, %p4107_p8  ;;  %p3834_p11 = por %p3833_p10, %p3832_p4 }
  0xb3   : > { %p3828_p9 = pneg %p3827_p7 }
  0xb5   : > { %p3835_p12 = pnand %p3834_p11, %p3828_p9 }
  0xb7   : > { %3838 = shalt.err (!%p3835_p12)
}
  0xb8   : > { %3204 = dma.hbm_to_vmem [thread:$0]  (!%p4091_p6), %s4978_s7, 1024, %s348_s1, [#allocation15], %s4984_s17, %s4984_s17, %s4985_s20  }
  0xb9   : > { %s2811_s19 = sadd.s32 4294967294, %s3983_s12   ;;  %s4254_s27 = sadd.s32 1, %s3983_s12  }
  0xba   : > { %s40_s23 = sadd.s32 1, %s3979_s11  ;;  %s37_s18 = ssub.s32 %s3983_s12, %s4254_s27 }
  0xbb   : > { %p47_p8 = scmp.ne.s32.totalorder %s3979_s11, %s3975_s10  ;;  %p38_p13 = scmp.eq.s32.totalorder %s37_s18, 0 }
  0xbc   : > { %p48_p0 = scmp.eq.s32.totalorder %s3983_s12, 0  ;;  %p53_p1 = scmp.ne.s32.totalorder %s3975_s10, %s3971_s30 }
  0xbd   : > { %p224_p3 = scmp.eq.s32.totalorder %s4075_s15, 1  ;;  %p4995_p5 = scmp.eq.s32.totalorder %s4075_s15, 0 }
  0xbe   : > { %s4266_s21 = scalar_select %p38_p13, %s3979_s11, %s40_s23  }
  0xbf   : > { %p49_p2 = por %p48_p0, %p47_p8  ;;  %p4270_p7 = por %p4995_p5, %p53_p1 }
  0xc0   : > { %p4274_p6 = por %p224_p3, %p47_p8  ;;  %p230_p9 = scmp.eq.s32.totalorder %s2811_s19, 1 }
  0xc1   : > { %p3223_p4 = scmp.lt.s32.totalorder %s3983_s12, 2  ;;  %s361_s3 = sand.u32 1, %s3979_s11  }
  0xc2   : > { %s4997_s1 = scalar_select %p4274_p6, 1, 0 }
  0xc3   : > { %p4280_p10 = por %p230_p9, %p53_p1  ;;  %s3144_s24 = smul.u32 56, %s361_s3 }
  0xc4   : > { %p4284_p11 = pnand %p3223_p4, %p49_p2  ;;  %s3145_s28 = smul.u32 896, %s3983_s12 }
  0xc5   : > { %s4998_s22 = scalar_select %p4280_p10, 1, 0 }
  0xc6   : > { %s4292_s14 = scalar_lea.hbm %s4971_s0, %s3145_s28  ;;  %s365_s25 = scalar_lea.vmem [#allocation2], %s3144_s24 }
  0xc7   : > { %s373_s19 = sshll.u32 %s365_s25, 4  ;;  %s4296_s23 = scalar_lea.sflag [#allocation3], %s361_s3  ;;  %s4294_s19 = int_to_ptr.vmem [resolvable:$true] %s373_s19 }
  0xc8   : > { %s3839_s18 = scalar_lea.hbm %s4292_s14, 896  ;;  %p3841_p8 = pneg %p4284_p11 }
  0xc9   : > { %p3840_p12 = scmp.ne.s32.totalorder %s4292_s14, %s3839_s18  ;;  %s3844_s13 = scalar_lea.hbm %s4971_s0, 1792 }
  0xca   : > { %p3845_p1 = scmp.lt.u32.totalorder %s4292_s14, %s4971_s0  ;;  %p3846_p3 = scmp.lt.u32.totalorder %s3844_s13, %s3839_s18 }
  0xcb   : > { %p3842_p13 = pnand %p3841_p8, %p3840_p12  ;;  %p3848_p5 = scmp.lt.u32.totalorder %s3839_s18, %s4292_s14 }
  0xcc   : > { %p3847_p2 = por %p3846_p3, %p3845_p1 }
  0xcd   : > { %p3843_p0 = pneg %p3842_p13 }
  0xce   : > { %p3849_p9 = por %p3848_p5, %p3847_p2 }
  0xd0   : > { %p3850_p4 = pnand %p3849_p9, %p3843_p0 }
  0xd2   : > { %3853 = shalt.err (!%p3850_p4)
}
  0xd3   : > { %s3854_s3 = scalar_lea.vmem %s4294_s19, 896  ;;  %s3996_s24 = smov [#allocation2]  }
  0xd4   : > { %p3855_p12 = scmp.ne.s32.totalorder %s4294_s19, %s3854_s3  ;;  %s3859_s25 = sshll.u32 %s3996_s24, 4  ;;  %s3860_s25 = int_to_ptr.vmem [resolvable:$false] %s3859_s25 }
  0xd5   : > { %s3861_s17 = scalar_lea.vmem %s3860_s25, 1792  ;;  %p3862_p6 = scmp.lt.s32.totalorder %s4294_s19, %s3860_s25 }
  0xd6   : > { %p3857_p13 = pnand %p3855_p12, %p3841_p8  ;;  %p3863_p1 = scmp.lt.s32.totalorder %s3861_s17, %s3854_s3 }
  0xd8   : > { %p3858_p10 = pneg %p3857_p13  ;;  %p3864_p3 = por %p3863_p1, %p3862_p6 }
  0xda   : > { %p3865_p2 = pnand %p3864_p3, %p3858_p10 }
  0xdc   : > { %3868 = shalt.err (!%p3865_p2)
}
  0xdd   : > { %s5000_s20 = smov 4   ;;  %s5001_s18 = smov 64  }
  0xde   : > { %3208 = dma.hbm_to_vmem [thread:$0]  (!%p4284_p11), %s4292_s14, 896, %s4294_s19, %s4296_s23, %s5001_s18, %s5001_s18, %s5000_s20  }
  0xdf   : > { %p5002_p8 = scmp.ne.s32.totalorder %s4990_s16, 0 }
  0xe0   : > { %s4330_s28 = sand.u32 (!%p5002_p8), 1, %s3975_s10  }
  0xe1   : > { %385 = sbr.rel (%p5002_p8) target bundleno = 2067 (0x813), region = 52  ;;  %s388_s13 = scalar_lea.sflag (!%p5002_p8), [#allocation3], %s4330_s28 }
  0xe2   : > { %s3146_s29 = smul.u32 (!%p5002_p8), 56, %s4330_s28 }
  0xe4   : > { %s4334_s3 = scalar_lea.vmem (!%p5002_p8), [#allocation2], %s3146_s29 }
  0xe8   : > { %3942 = dma.done.wait (%p4270_p7), %s388_s13, 896  }
  0xe9   : > { %3944 = vsyncadd (%p4270_p7), %s388_s13, 4294966400  ;;  %p5003_p6 = scmp.eq.s32.totalorder %s4075_s15, 0 }
  0xeb   : > { %3946 = dma.done.wait (%p5003_p6), [#allocation6], 2080   ;;  %p5004_p10 = pmov %p5003_p6 }
  0xec   : > { %p5005_p11 = pmov %p5003_p6 }
  0xed   : > { %3948 = vsyncadd (%p5004_p10), [#allocation6], 4294965216 }
  0xee   : > { %3950 = dma.done.wait (%p5005_p11), [#allocation9], 4128   ;;  %p5006_p0 = pmov %p5003_p6 }
  0xf0   : > { %3952 = vsyncadd (%p5006_p0), [#allocation9], 4294963168  ;;  %p5007_p5 = pmov %p5006_p0 }
  0xf1   : > { %p5008_p9 = pmov %p5006_p0 }
  0xf2   : > { %3954 = dma.done.wait (%p5007_p5), [#allocation12], 2064  }
  0xf3   : > { %3956 = vsyncadd (%p5008_p9), [#allocation12], 4294965232  ;;  %p5009_p7 = pmov %p5006_p0 }
  0xf4   : > { %p5010_p4 = pmov %p5006_p0 }
  0xf5   : > { %3958 = dma.done.wait (%p5009_p7), [#allocation15], 1024  }
  0xf6   : > { %3960 = vsyncadd (%p5010_p4), [#allocation15], 4294966272  ;;  %v3997_v0 = vmov 0   ;;  %v3280_v1 = vld [vmem:[#allocation5 + $0x4] ss:$8 sps:$4 sm:$0xff]   ;;  %v3305_v30 = vld [vmem:[%s4334_s3 + $0x8] sm:$0xff]  }
  0xf7   : > { %659 = vmatprep.mubr.bf16.mxu0 %v3997_v0  ;;  %v3282_v2 = vld [vmem:[#allocation5] ss:$8 sps:$4 sm:$0xff]   ;;  %627 = vmatprep.subr.bf16.mxu0 %v3280_v1  ;;  %v3283_v3 = vld [vmem:[#allocation5 + $0x14] ss:$8 sps:$4 sm:$0xff]   ;;  %v3285_v4 = vld [vmem:[#allocation5 + $0x10] ss:$8 sps:$4 sm:$0xff]  }
  0xf8   : > { %628 = vmatpush1.bf16.msra.mxu0 %v3282_v2  ;;  %v3286_v5 = vld [vmem:[#allocation5 + $0x24] ss:$8 sps:$4 sm:$0xff]   ;;  %v3288_v6 = vld [vmem:[#allocation5 + $0x20] ss:$8 sps:$4 sm:$0xff]   ;;  %v3289_v7 = vld [vmem:[#allocation5 + $0x34] ss:$8 sps:$4 sm:$0xff]   ;;  %v495_v2 = vlaneseq }
  0xf9   : > { %629 = vmatprep.subr.bf16.mxu0 %v3283_v3  ;;  %v3291_v8 = vld [vmem:[#allocation5 + $0x30] ss:$8 sps:$4 sm:$0xff]   ;;  %v3292_v9 = vld [vmem:[#allocation5 + $0x44] ss:$8 sps:$4 sm:$0xff]   ;;  %v3294_v10 = vld [vmem:[#allocation5 + $0x40] ss:$8 sps:$4 sm:$0xff]  }
  0xfa   : > { %v3295_v11 = vld [vmem:[#allocation5 + $0x54] ss:$8 sps:$4 sm:$0xff]   ;;  %v3297_v12 = vld [vmem:[#allocation5 + $0x50] ss:$8 sps:$4 sm:$0xff]   ;;  %v3313_v14 = vld [vmem:[#allocation8] ss:$8 sps:$4 sm:$0xff]  }
  0xfb   : > { %v3311_v13 = vld [vmem:[#allocation8 + $0x4] ss:$8 sps:$4 sm:$0xff]   ;;  %v3314_v15 = vld [vmem:[#allocation8 + $0x14] ss:$8 sps:$4 sm:$0xff]   ;;  %v3316_v17 = vld [vmem:[#allocation8 + $0x10] ss:$8 sps:$4 sm:$0xff]  }
  0xfc   : > { %630 = vmatpush1.bf16.msra.mxu0 %v3285_v4  ;;  %v3298_v16 = vld [vmem:[#allocation5 + $0x64] ss:$8 sps:$4 sm:$0xff]   ;;  %1088 = vmatprep.subr.bf16.mxu1 %v3311_v13  ;;  %v3300_v19 = vld [vmem:[#allocation5 + $0x60] ss:$8 sps:$4 sm:$0xff]   ;;  %v3301_v20 = vld [vmem:[#allocation5 + $0x74] ss:$8 sps:$4 sm:$0xff]  }
  0xfd   : > { %631 = vmatprep.subr.bf16.mxu0 %v3286_v5  ;;  %1089 = vmatpush1.bf16.msra.mxu1 %v3313_v14  ;;  %v3317_v18 = vld [vmem:[#allocation8 + $0x24] ss:$8 sps:$4 sm:$0xff]   ;;  %v3319_v21 = vld [vmem:[#allocation8 + $0x20] ss:$8 sps:$4 sm:$0xff]   ;;  %v3320_v22 = vld [vmem:[#allocation8 + $0x34] ss:$8 sps:$4 sm:$0xff]  }
  0xfe   : > { %1090 = vmatprep.subr.bf16.mxu1 %v3314_v15  ;;  %v3303_v23 = vld [vmem:[#allocation5 + $0x70] ss:$8 sps:$4 sm:$0xff]   ;;  %v3325_v27 = vld [vmem:[#allocation8 + $0x40] ss:$8 sps:$4 sm:$0xff]   ;;  %v4370_v3 = vshrl.u32 %v495_v2, 7  ;;  %vm2258_vm0 = vcmask 1043456  }
  0xff   : > { %v3322_v24 = vld [vmem:[#allocation8 + $0x30] ss:$8 sps:$4 sm:$0xff]   ;;  %v3323_v26 = vld [vmem:[#allocation8 + $0x44] ss:$8 sps:$4 sm:$0xff]   ;;  %v3326_v28 = vld [vmem:[#allocation8 + $0x54] ss:$8 sps:$4 sm:$0xff]  }
 0x100   : > { %632 = vmatpush1.bf16.msra.mxu0 %v3288_v6  ;;  %v3304_v25 = vld [vmem:[%s4334_s3] sm:$0xff]   ;;  %v3306_v35 = vld [vmem:[%s4334_s3 + $0x10] sm:$0xff]   ;;  %v3307_v40 = vld [vmem:[%s4334_s3 + $0x18] sm:$0xff]   ;;  %v497_v4 = vsub.s32 0, %v4370_v3  ;;  %v501_v6 = vsub.s32 1, %v4370_v3  ;;  %vm3999_vm1 = vmmov 0  }
 0x101   : > { %633 = vmatprep.subr.bf16.mxu0 %v3289_v7  ;;  %1091 = vmatpush1.bf16.msra.mxu1 %v3316_v17  ;;  %v3328_v29 = vld [vmem:[#allocation8 + $0x50] ss:$8 sps:$4 sm:$0xff]   ;;  %v3329_v31 = vld [vmem:[#allocation8 + $0x64] ss:$8 sps:$4 sm:$0xff]   ;;  %v3331_v32 = vld [vmem:[#allocation8 + $0x60] ss:$8 sps:$4 sm:$0xff]  }
 0x102   : > { %1092 = vmatprep.subr.bf16.mxu1 %v3317_v18  ;;  %v3332_v33 = vld [vmem:[#allocation8 + $0x74] ss:$8 sps:$4 sm:$0xff]   ;;  %v3334_v34 = vld [vmem:[#allocation8 + $0x70] ss:$8 sps:$4 sm:$0xff]   ;;  %v3335_v36 = vld [vmem:[#allocation8 + $0x84] ss:$8 sps:$4 sm:$0xff]  }
 0x103   : > { %v3337_v37 = vld [vmem:[#allocation8 + $0x80] ss:$8 sps:$4 sm:$0xff]   ;;  %v3338_v38 = vld [vmem:[#allocation8 + $0x94] ss:$8 sps:$4 sm:$0xff]   ;;  %v3340_v39 = vld [vmem:[#allocation8 + $0x90] ss:$8 sps:$4 sm:$0xff]  }
 0x104   : > { %634 = vmatpush1.bf16.msra.mxu0 %v3291_v8  ;;  %v3308_v41 = vld [vmem:[%s4334_s3 + $0x20] sm:$0xff]   ;;  %v3309_v42 = vld [vmem:[%s4334_s3 + $0x28] sm:$0xff]   ;;  %v3310_v43 = vld [vmem:[%s4334_s3 + $0x30] sm:$0xff]   ;;  %s3147_s16 = smul.u32 112, %s4330_s28  ;;  %vm2233_vm3 = vcmask 457728   ;;  %s2608_s25 = scalar_lea.sflag [#allocation18], %s4330_s28 }
 0x105   : > { %635 = vmatprep.subr.bf16.mxu0 %v3292_v9  ;;  %1093 = vmatpush1.bf16.msra.mxu1 %v3319_v21  ;;  %v3341_v44 = vld [vmem:[#allocation8 + $0xa4] ss:$8 sps:$4 sm:$0xff]   ;;  %v3343_v45 = vld [vmem:[#allocation8 + $0xa0] ss:$8 sps:$4 sm:$0xff]   ;;  %v3344_v46 = vld [vmem:[#allocation8 + $0xb4] ss:$8 sps:$4 sm:$0xff]  }
 0x106   : > { %1094 = vmatprep.subr.bf16.mxu1 %v3320_v22  ;;  %v3346_v47 = vld [vmem:[#allocation8 + $0xb0] ss:$8 sps:$4 sm:$0xff]   ;;  %v3347_v48 = vld [vmem:[#allocation8 + $0xc4] ss:$8 sps:$4 sm:$0xff]   ;;  %v3349_v49 = vld [vmem:[#allocation8 + $0xc0] ss:$8 sps:$4 sm:$0xff]  }
 0x107   : > { %v3350_v50 = vld [vmem:[#allocation8 + $0xd4] ss:$8 sps:$4 sm:$0xff]   ;;  %v3352_v51 = vld [vmem:[#allocation8 + $0xd0] ss:$8 sps:$4 sm:$0xff]   ;;  %v3353_v52 = vld [vmem:[#allocation8 + $0xe4] ss:$8 sps:$4 sm:$0xff]  }
 0x108   : > { %636 = vmatpush1.bf16.msra.mxu0 %v3294_v10  ;;  %v3355_v53 = vld [vmem:[#allocation8 + $0xe0] ss:$8 sps:$4 sm:$0xff]   ;;  %v3356_v54 = vld [vmem:[#allocation8 + $0xf4] ss:$8 sps:$4 sm:$0xff]   ;;  %v3358_v55 = vld [vmem:[#allocation8 + $0xf0] ss:$8 sps:$4 sm:$0xff]  }
 0x109   : > { %637 = vmatprep.subr.bf16.mxu0 %v3295_v11  ;;  %1095 = vmatpush1.bf16.msra.mxu1 %v3322_v24  ;;  %v3359_v56 = vld [vmem:[#allocation11 + $0x40] sm:$0xff]   ;;  %v3361_v58 = vld [vmem:[#allocation11 + $0x48] sm:$0xff]   ;;  %v3363_v60 = vld [vmem:[#allocation11 + $0x50] sm:$0xff]   ;;  %s4683_s8 = scalar_lea.vmem [#allocation17], %s3147_s16  ;;  %s3148_s26 = smul.u32 1792, %s4075_s15 }
 0x10a   : > { %1096 = vmatprep.subr.bf16.mxu1 %v3323_v26  ;;  %v3360_v57 = vld [vmem:[#allocation11] sm:$0xff]   ;;  %v3362_v59 = vld [vmem:[#allocation11 + $0x8] sm:$0xff]   ;;  %v3364_v61 = vld [vmem:[#allocation11 + $0x10] sm:$0xff]   ;;  %s2639_s24 = sshll.u32 %s4683_s8, 4  ;;  %p5011_p13 = scmp.ne.s32.totalorder %s4997_s1, 0  ;;  %s4847_s24 = int_to_ptr.vmem [resolvable:$true] %s2639_s24 }
 0x10b   : > { %v3365_v62 = vld [vmem:[#allocation11 + $0x58] sm:$0xff]   ;;  %v3368_v1 = vld [vmem:[#allocation11 + $0x20] sm:$0xff]   ;;  %s4844_s23 = scalar_lea.hbm %s4980_s9, %s3148_s26  ;;  %s3869_s17 = scalar_lea.vmem %s4847_s24, 1792 }
 0x10c   : > { %638 = vmatpush1.bf16.msra.mxu0 %v3297_v12  ;;  %v3366_v63 = vld [vmem:[#allocation11 + $0x18] sm:$0xff]   ;;  %p3870_p12 = scmp.ne.s32.totalorder %s4847_s24, %s3869_s17  ;;  %s4000_s20 = smov [#allocation17]  }
 0x10d   : > { %639 = vmatprep.subr.bf16.mxu0 %v3298_v16  ;;  %1097 = vmatpush1.bf16.msra.mxu1 %v3325_v27  ;;  %v493_v5 = vld [vmem:[#allocation7] sm:$0x3]  ;;  %s3873_s18 = sshll.u32 %s4000_s20, 4  ;;  %s3874_s18 = int_to_ptr.vmem [resolvable:$false] %s3873_s18 }
 0x10e   : > { %1098 = vmatprep.subr.bf16.mxu1 %v3326_v28  ;;  %v4376_v7 = vrot.slane %v493_v5, %v497_v4  ;;  %v4380_v8 = vrot.slane %v493_v5, %v501_v6  ;;  %p3871_p1 = pnand %p3870_p12, %p5011_p13  ;;  %s3875_s29 = scalar_lea.vmem %s3874_s18, 3584 }
 0x10f   : > { %p3876_p2 = scmp.lt.s32.totalorder %s4847_s24, %s3874_s18  ;;  %p3877_p8 = scmp.lt.s32.totalorder %s3875_s29, %s3869_s17 }
 0x110   : > { %640 = vmatpush1.bf16.msra.mxu0 %v3300_v19  ;;  %p3872_p3 = pneg %p3871_p1 }
 0x111   : > { %641 = vmatprep.subr.bf16.mxu0 %v3301_v20  ;;  %1099 = vmatpush1.bf16.msra.mxu1 %v3328_v29  ;;  %p3878_p6 = por %p3877_p8, %p3876_p2 }
 0x112   : > { %1100 = vmatprep.subr.bf16.mxu1 %v3329_v31 }
 0x113   : > { %p3879_p10 = pnand %p3878_p6, %p3872_p3 }
 0x114   : > { %642 = vmatpush1.bf16.msra.mxu0 %v3303_v23 }
 0x115   : > { %1101 = vmatpush1.bf16.msra.mxu1 %v3331_v32  ;;  %2944 = vmatprep.subr.bf16.mxu0 %v3359_v56 }
 0x116   : > { %1102 = vmatprep.subr.bf16.mxu1 %v3332_v33 }
 0x117   : > { %660 = vmatmul.mubr.bf16.vlgmr.msra.gmra.mrb[0].mxu0 %v3304_v25 }
 0x118   : > { %669 = vmatprep.mubr.bf16.mxu0 %v3997_v0  ;;  %2945 = vmatpush3.bf16.msra.mxu0 %v3360_v57 }
 0x119   : > { %1103 = vmatpush1.bf16.msra.mxu1 %v3334_v34  ;;  %2946 = vmatprep.subr.bf16.mxu0 %v3361_v58 }
 0x11a   : > { %1104 = vmatprep.subr.bf16.mxu1 %v3335_v36 }
 0x11c   : > { %2947 = vmatpush3.bf16.msra.mxu0 %v3362_v59 }
 0x11d   : > { %1105 = vmatpush1.bf16.msra.mxu1 %v3337_v37  ;;  %2948 = vmatprep.subr.bf16.mxu0 %v3363_v60 }
 0x11e   : > { %1106 = vmatprep.subr.bf16.mxu1 %v3338_v38 }
 0x11f   : > { %670 = vmatmul.mubr.bf16.gmra.mrb[4].mxu0 %v3305_v30 }
 0x120   : > { %679 = vmatprep.mubr.bf16.mxu0 %v3997_v0  ;;  %2949 = vmatpush3.bf16.msra.mxu0 %v3364_v61 }
 0x121   : > { %1107 = vmatpush1.bf16.msra.mxu1 %v3340_v39  ;;  %2950 = vmatprep.subr.bf16.mxu0 %v3365_v62 }
 0x122   : > { %1108 = vmatprep.subr.bf16.mxu1 %v3341_v44 }
 0x124   : > { %2951 = vmatpush3.bf16.msra.mxu0 %v3366_v63 }
 0x125   : > { %1109 = vmatpush1.bf16.msra.mxu1 %v3343_v45 }
 0x126   : > { %1110 = vmatprep.subr.bf16.mxu1 %v3344_v46 }
 0x127   : > { %680 = vmatmul.mubr.bf16.gmra.mrb[8].mxu0 %v3306_v35 }
 0x128   : > { %689 = vmatprep.mubr.bf16.mxu0 %v3997_v0 }
 0x129   : > { %1111 = vmatpush1.bf16.msra.mxu1 %v3346_v47 }
 0x12a   : > { %1112 = vmatprep.subr.bf16.mxu1 %v3347_v48 }
 0x12d   : > { %1113 = vmatpush1.bf16.msra.mxu1 %v3349_v49 }
 0x12e   : > { %1114 = vmatprep.subr.bf16.mxu1 %v3350_v50 }
 0x12f   : > { %690 = vmatmul.mubr.bf16.gmra.mrb[12].mxu0 %v3307_v40 }
 0x130   : > { %699 = vmatprep.mubr.bf16.mxu0 %v3997_v0 }
 0x131   : > { %1115 = vmatpush1.bf16.msra.mxu1 %v3352_v51 }
 0x132   : > { %1116 = vmatprep.subr.bf16.mxu1 %v3353_v52 }
 0x135   : > { %1117 = vmatpush1.bf16.msra.mxu1 %v3355_v53 }
 0x136   : > { %1118 = vmatprep.subr.bf16.mxu1 %v3356_v54 }
 0x137   : > { %700 = vmatmul.mubr.bf16.gmra.mrb[16].mxu0 %v3308_v41 }
 0x138   : > { %709 = vmatprep.mubr.bf16.mxu0 %v3997_v0 }
 0x139   : > { %1119 = vmatpush1.bf16.msra.mxu1 %v3358_v55 }
 0x13f   : > { %710 = vmatmul.mubr.bf16.gmra.mrb[20].mxu0 %v3309_v42 }
 0x140   : > { %719 = vmatprep.mubr.bf16.mxu0 %v3997_v0  ;;  %v3367_v0 = vld [vmem:[#allocation11 + $0x60] sm:$0xff]  }
 0x141   : > { %2952 = vmatprep.subr.bf16.mxu0 %v3367_v0 }
 0x142   : > { %2953 = vmatpush3.bf16.msra.mxu0 %v3368_v1 }
 0x147   : > { %720 = vmatmul.mubr.bf16.gmra.mrb[24].mxu0 %v3310_v43 }
 0x1ea   : > { %v661_v9 = vpop.f32.mrb[0].mxu0 }
 0x1eb   : > { %v662_v10 = vadd.f32 %v661_v9, %v4376_v7  ;;  %v663_v11 = vpop.f32.mrb[1].mxu0 }
 0x1ec   : > { %v664_v12 = vadd.f32 %v663_v11, %v4380_v8  ;;  %v665_v13 = vpop.f32.mrb[2].mxu0 }
 0x1ed   : > { %v758_v14 = vmul.f32 0.70710677, %v662_v10  ;;  %v666_v15 = vadd.f32 %v665_v13, %v4376_v7  ;;  %v667_v16 = vpop.f32.mrb[3].mxu0  ;;  %v730_v37 = vmul.f32 0.5, %v662_v10 }
 0x1ee   : > { %v759_v17 = vmul.f32 0.70710677, %v664_v12  ;;  %v668_v18 = vadd.f32 %v667_v16, %v4380_v8  ;;  %v731_v47 = vmul.f32 0.5, %v664_v12 }
 0x1ef   : > { %3383 = verf.f32 %v758_v14  ;;  %v760_v19 = vmul.f32 0.70710677, %v666_v15  ;;  %v732_v42 = vmul.f32 0.5, %v666_v15 }
 0x1f0   : > { %3385 = verf.f32 %v759_v17  ;;  %v761_v20 = vmul.f32 0.70710677, %v668_v18  ;;  %v733_v53 = vmul.f32 0.5, %v668_v18 }
 0x1f1   : > { %3387 = verf.f32 %v760_v19 }
 0x1f2   : > { %3389 = verf.f32 %v761_v20  ;;  %v671_v21 = vpop.f32.mrb[4].mxu0 }
 0x1f3   : > { %v672_v22 = vadd.f32 %v671_v21, %v4376_v7  ;;  %v673_v23 = vpop.f32.mrb[5].mxu0 }
 0x1f4   : > { %v674_v24 = vadd.f32 %v673_v23, %v4380_v8  ;;  %v675_v25 = vpop.f32.mrb[6].mxu0 }
 0x1f5   : > { %v762_v26 = vmul.f32 0.70710677, %v672_v22  ;;  %v676_v27 = vadd.f32 %v675_v25, %v4376_v7  ;;  %v677_v28 = vpop.f32.mrb[7].mxu0  ;;  %v734_v13 = vmul.f32 0.5, %v672_v22 }
 0x1f6   : > { %v763_v29 = vmul.f32 0.70710677, %v674_v24  ;;  %v678_v30 = vadd.f32 %v677_v28, %v4380_v8  ;;  %v735_v18 = vmul.f32 0.5, %v674_v24 }
 0x1f7   : > { %3391 = verf.f32 %v762_v26  ;;  %v764_v31 = vmul.f32 0.70710677, %v676_v27  ;;  %v736_v14 = vmul.f32 0.5, %v676_v27 }
 0x1f8   : > { %3393 = verf.f32 %v763_v29  ;;  %v765_v32 = vmul.f32 0.70710677, %v678_v30  ;;  %v737_v19 = vmul.f32 0.5, %v678_v30 }
 0x1f9   : > { %v3384_v33 = vpop.eup %3383  ;;  %3395 = verf.f32 %v764_v31 }
 0x1fa   : > { %v3386_v34 = vpop.eup %3385  ;;  %3397 = verf.f32 %v765_v32  ;;  %v681_v35 = vpop.f32.mrb[8].mxu0  ;;  %v814_v38 = vadd.f32 1.0, %v3384_v33 }
 0x1fb   : > { %v3388_v36 = vpop.eup %3387  ;;  %v4391_v39 = vadd.f32 %v681_v35, %v4376_v7  ;;  %v683_v40 = vpop.f32.mrb[9].mxu0  ;;  %v815_v46 = vadd.f32 1.0, %v3386_v34 }
 0x1fc   : > { %v3390_v41 = vpop.eup %3389  ;;  %v816_v43 = vadd.f32 1.0, %v3388_v36  ;;  %v4394_v44 = vadd.f32 %v683_v40, %v4380_v8  ;;  %v685_v45 = vpop.f32.mrb[10].mxu0  ;;  %v842_v56 = vmul.f32 %v814_v38, %v730_v37 }
 0x1fd   : > { %v766_v48 = vmul.f32 0.70710677, %v4391_v39  ;;  %v4398_v49 = vadd.f32 %v685_v45, %v4376_v7  ;;  %v687_v50 = vpop.f32.mrb[11].mxu0  ;;  %v817_v51 = vadd.f32 1.0, %v3390_v41  ;;  %v843_v59 = vmul.f32 %v815_v46, %v731_v47 }
 0x1fe   : > { %v844_v52 = vmul.f32 %v816_v43, %v732_v42  ;;  %v767_v54 = vmul.f32 0.70710677, %v4394_v44  ;;  %v4402_v55 = vadd.f32 %v687_v50, %v4380_v8  ;;  %v738_v45 = vmul.f32 0.5, %v4391_v39 }
 0x1ff   : > { %3399 = verf.f32 %v766_v48  ;;  %v768_v57 = vmul.f32 0.70710677, %v4398_v49  ;;  %v845_v60 = vmul.f32 %v817_v51, %v733_v53  ;;  %v740_v46 = vmul.f32 0.5, %v4398_v49 }
 0x200   : > { %3401 = verf.f32 %v767_v54  ;;  %v769_v58 = vmul.f32 0.70710677, %v4402_v55  ;;  %v870_v62 = vpack.c.bf16 %v844_v52, %v842_v56  ;;  %v739_v51 = vmul.f32 0.5, %v4394_v44 }
 0x201   : > { %v3392_v61 = vpop.eup %3391  ;;  %3403 = verf.f32 %v768_v57  ;;  %v871_v2 = vpack.c.bf16 %v845_v60, %v843_v59  ;;  %v741_v52 = vmul.f32 0.5, %v4402_v55 }
 0x202   : > { %v3394_v63 = vpop.eup %3393  ;;  %v818_v0 = vadd.f32 1.0, %v3392_v61  ;;  %3405 = verf.f32 %v769_v58  ;;  %v691_v1 = vpop.f32.mrb[12].mxu0 }
 0x203   : > { %v3396_v5 = vpop.eup %3395  ;;  %v819_v9 = vadd.f32 1.0, %v3394_v63  ;;  %v4407_v10 = vadd.f32 %v691_v1, %v4376_v7  ;;  %v693_v11 = vpop.f32.mrb[13].mxu0  ;;  %1120 = vmatprep.mubr.bf16.mxu1 %v871_v2 }
 0x204   : > { %v3398_v12 = vpop.eup %3397  ;;  %v820_v15 = vadd.f32 1.0, %v3396_v5  ;;  %v4410_v16 = vadd.f32 %v693_v11, %v4380_v8  ;;  %v695_v17 = vpop.f32.mrb[14].mxu0  ;;  %1121 = vmatmul.mubr.bf16.vlgmr.msra.gmra.mrb[0].mxu1 %v870_v62  ;;  %v846_v25 = vmul.f32 %v818_v0, %v734_v13 }
 0x205   : > { %v821_v20 = vadd.f32 1.0, %v3398_v12  ;;  %v770_v21 = vmul.f32 0.70710677, %v4407_v10  ;;  %v697_v23 = vpop.f32.mrb[15].mxu0  ;;  %v696_v22 = vadd.f32 %v695_v17, %v4376_v7  ;;  %v847_v27 = vmul.f32 %v819_v9, %v735_v18 }
 0x206   : > { %v848_v26 = vmul.f32 %v820_v15, %v736_v14  ;;  %v771_v28 = vmul.f32 0.70710677, %v4410_v16  ;;  %v698_v31 = vadd.f32 %v697_v23, %v4380_v8  ;;  %v742_v13 = vmul.f32 0.5, %v4407_v10 }
 0x207   : > { %v849_v29 = vmul.f32 %v821_v20, %v737_v19  ;;  %3407 = verf.f32 %v770_v21  ;;  %v772_v32 = vmul.f32 0.70710677, %v696_v22  ;;  %v743_v19 = vmul.f32 0.5, %v4410_v16 }
 0x208   : > { %3409 = verf.f32 %v771_v28  ;;  %v872_v24 = vpack.c.bf16 %v848_v26, %v846_v25  ;;  %v773_v33 = vmul.f32 0.70710677, %v698_v31  ;;  %v744_v20 = vmul.f32 0.5, %v696_v22 }
 0x209   : > { %v3400_v30 = vpop.eup %3399  ;;  %v873_v34 = vpack.c.bf16 %v849_v29, %v847_v27  ;;  %3411 = verf.f32 %v772_v32  ;;  %v745_v26 = vmul.f32 0.5, %v698_v31 }
 0x20a   : > { %v3402_v35 = vpop.eup %3401  ;;  %v822_v36 = vadd.f32 1.0, %v3400_v30  ;;  %v701_v37 = vpop.f32.mrb[16].mxu0  ;;  %3413 = verf.f32 %v773_v33 }
 0x20b   : > { %v3404_v38 = vpop.eup %3403  ;;  %v823_v40 = vadd.f32 1.0, %v3402_v35  ;;  %v4417_v41 = vadd.f32 %v701_v37, %v4376_v7  ;;  %v703_v42 = vpop.f32.mrb[17].mxu0  ;;  %1130 = vmatprep.mubr.bf16.mxu1 %v873_v34 }
 0x20c   : > { %v3406_v43 = vpop.eup %3405  ;;  %v824_v47 = vadd.f32 1.0, %v3404_v38  ;;  %v4422_v48 = vadd.f32 %v703_v42, %v4380_v8  ;;  %v705_v50 = vpop.f32.mrb[18].mxu0  ;;  %1131 = vmatmul.mubr.bf16.gmra.mrb[4].mxu1 %v872_v24  ;;  %v850_v57 = vmul.f32 %v822_v36, %v738_v45 }
 0x20d   : > { %v825_v53 = vadd.f32 1.0, %v3406_v43  ;;  %v774_v54 = vmul.f32 0.70710677, %v4417_v41  ;;  %v707_v56 = vpop.f32.mrb[19].mxu0  ;;  %v706_v49 = vadd.f32 %v705_v50, %v4376_v7  ;;  %v851_v59 = vmul.f32 %v823_v40, %v739_v51 }
 0x20e   : > { %v852_v58 = vmul.f32 %v824_v47, %v740_v46  ;;  %v775_v39 = vmul.f32 0.70710677, %v4422_v48  ;;  %v708_v61 = vadd.f32 %v707_v56, %v4380_v8  ;;  %v746_v45 = vmul.f32 0.5, %v4417_v41 }
 0x20f   : > { %v853_v60 = vmul.f32 %v825_v53, %v741_v52  ;;  %3415 = verf.f32 %v774_v54  ;;  %v776_v44 = vmul.f32 0.70710677, %v706_v49  ;;  %v747_v52 = vmul.f32 0.5, %v4422_v48 }
 0x210   : > { %3417 = verf.f32 %v775_v39  ;;  %v874_v62 = vpack.c.bf16 %v852_v58, %v850_v57  ;;  %v777_v63 = vmul.f32 0.70710677, %v708_v61  ;;  %v748_v53 = vmul.f32 0.5, %v706_v49 }
 0x211   : > { %v3408_v55 = vpop.eup %3407  ;;  %v875_v0 = vpack.c.bf16 %v853_v60, %v851_v59  ;;  %3419 = verf.f32 %v776_v44  ;;  %v749_v58 = vmul.f32 0.5, %v708_v61 }
 0x212   : > { %v3410_v1 = vpop.eup %3409  ;;  %v711_v2 = vpop.f32.mrb[20].mxu0  ;;  %v826_v5 = vadd.f32 1.0, %v3408_v55  ;;  %3421 = verf.f32 %v777_v63 }
 0x213   : > { %v4431_v9 = vadd.f32 %v711_v2, %v4376_v7  ;;  %v713_v11 = vpop.f32.mrb[21].mxu0  ;;  %1140 = vmatprep.mubr.bf16.mxu1 %v875_v0  ;;  %v3412_v12 = vpop.eup %3411  ;;  %v827_v14 = vadd.f32 1.0, %v3410_v1 }
 0x214   : > { %v4435_v15 = vadd.f32 %v713_v11, %v4380_v8  ;;  %v715_v17 = vpop.f32.mrb[22].mxu0  ;;  %v3414_v18 = vpop.eup %3413  ;;  %v828_v21 = vadd.f32 1.0, %v3412_v12  ;;  %1141 = vmatmul.mubr.bf16.gmra.mrb[8].mxu1 %v874_v62  ;;  %v854_v29 = vmul.f32 %v826_v5, %v742_v13 }
 0x215   : > { %v778_v23 = vmul.f32 0.70710677, %v4431_v9  ;;  %v717_v25 = vpop.f32.mrb[23].mxu0  ;;  %v829_v28 = vadd.f32 1.0, %v3414_v18  ;;  %v716_v10 = vadd.f32 %v715_v17, %v4376_v7  ;;  %v855_v30 = vmul.f32 %v827_v14, %v743_v19 }
 0x216   : > { %v779_v27 = vmul.f32 0.70710677, %v4435_v15  ;;  %v856_v32 = vmul.f32 %v828_v21, %v744_v20  ;;  %v718_v24 = vadd.f32 %v717_v25, %v4380_v8  ;;  %v750_v13 = vmul.f32 0.5, %v4431_v9 }
 0x217   : > { %3423 = verf.f32 %v778_v23  ;;  %v857_v33 = vmul.f32 %v829_v28, %v745_v26  ;;  %v780_v16 = vmul.f32 0.70710677, %v716_v10  ;;  %v752_v14 = vmul.f32 0.5, %v716_v10 }
 0x218   : > { %3425 = verf.f32 %v779_v27  ;;  %v781_v34 = vmul.f32 0.70710677, %v718_v24  ;;  %v876_v35 = vpack.c.bf16 %v856_v32, %v854_v29  ;;  %v751_v17 = vmul.f32 0.5, %v4435_v15 }
 0x219   : > { %v3416_v22 = vpop.eup %3415  ;;  %3427 = verf.f32 %v780_v16  ;;  %v877_v37 = vpack.c.bf16 %v857_v33, %v855_v30  ;;  %v753_v18 = vmul.f32 0.5, %v718_v24 }
 0x21a   : > { %v3418_v36 = vpop.eup %3417  ;;  %v721_v31 = vpop.f32.mrb[24].mxu0  ;;  %v830_v38 = vadd.f32 1.0, %v3416_v22  ;;  %3429 = verf.f32 %v781_v34 }
 0x21b   : > { %v722_v40 = vadd.f32 %v721_v31, %v4376_v7  ;;  %v723_v42 = vpop.f32.mrb[25].mxu0  ;;  %v3420_v43 = vpop.eup %3419  ;;  %v831_v46 = vadd.f32 1.0, %v3418_v36  ;;  %1150 = vmatprep.mubr.bf16.mxu1 %v877_v37 }
 0x21c   : > { %v724_v47 = vadd.f32 %v723_v42, %v4380_v8  ;;  %v725_v50 = vpop.f32.mrb[26].mxu0  ;;  %v3422_v51 = vpop.eup %3421  ;;  %v832_v54 = vadd.f32 1.0, %v3420_v43  ;;  %1151 = vmatmul.mubr.bf16.gmra.mrb[12].mxu1 %v876_v35  ;;  %v858_v44 = vmul.f32 %v830_v38, %v746_v45  ;;  %v3369_v43 = vld [vmem:[#allocation11 + $0x68] sm:$0xff]  }
 0x21d   : > { %v782_v56 = vmul.f32 0.70710677, %v722_v40  ;;  %v727_v57 = vpop.f32.mrb[27].mxu0  ;;  %v833_v39 = vadd.f32 1.0, %v3422_v51  ;;  %v726_v60 = vadd.f32 %v725_v50, %v4376_v7  ;;  %v859_v55 = vmul.f32 %v831_v46, %v747_v52  ;;  %v3370_v45 = vld [vmem:[#allocation11 + $0x28] sm:$0xff]   ;;  %2954 = vmatprep.subr.bf16.mxu0 %v3369_v43  ;;  %v3371_v46 = vld [vmem:[#allocation11 + $0x70] sm:$0xff]  }
 0x21e   : > { %v783_v59 = vmul.f32 0.70710677, %v724_v47  ;;  %v860_v41 = vmul.f32 %v832_v54, %v748_v53  ;;  %v728_v62 = vadd.f32 %v727_v57, %v4380_v8  ;;  %v754_v10 = vmul.f32 0.5, %v722_v40  ;;  %2955 = vmatpush3.bf16.msra.mxu0 %v3370_v45  ;;  %v3372_v40 = vld [vmem:[#allocation11 + $0x30] sm:$0xff]   ;;  %v3373_v50 = vld [vmem:[#allocation11 + $0x78] sm:$0xff]   ;;  %v3375_v51 = vld [vmem:[#allocation14] sm:$0xff]  }
 0x21f   : > { %3431 = verf.f32 %v782_v56  ;;  %v861_v63 = vmul.f32 %v833_v39, %v749_v58  ;;  %v784_v0 = vmul.f32 0.70710677, %v726_v60  ;;  %v756_v16 = vmul.f32 0.5, %v726_v60  ;;  %2956 = vmatprep.subr.bf16.mxu0 %v3371_v46  ;;  %v3376_v53 = vld [vmem:[#allocation14 + $0x8] sm:$0xff]   ;;  %v3377_v54 = vld [vmem:[#allocation14 + $0x10] sm:$0xff]   ;;  %v3378_v56 = vld [vmem:[#allocation14 + $0x18] sm:$0xff]  }
 0x220   : > { %3433 = verf.f32 %v783_v59  ;;  %v785_v49 = vmul.f32 0.70710677, %v728_v62  ;;  %v878_v1 = vpack.c.bf16 %v860_v41, %v858_v44  ;;  %v755_v15 = vmul.f32 0.5, %v724_v47  ;;  %v3374_v47 = vld [vmem:[#allocation11 + $0x38] sm:$0xff]   ;;  %v3379_v57 = vld [vmem:[#allocation14 + $0x20] sm:$0xff]   ;;  %v3380_v58 = vld [vmem:[#allocation14 + $0x28] sm:$0xff]  }
 0x221   : > { %v3424_v48 = vpop.eup %3423  ;;  %3435 = verf.f32 %v784_v0  ;;  %v879_v5 = vpack.c.bf16 %v861_v63, %v859_v55  ;;  %v757_v24 = vmul.f32 0.5, %v728_v62  ;;  %v3998_v52 = vmov 0.0   ;;  %v916_v39 = vld [vmem:[#allocation10] sm:$0x3] }
 0x222   : > { %v3426_v2 = vpop.eup %3425  ;;  %v834_v61 = vadd.f32 1.0, %v3424_v48  ;;  %3437 = verf.f32 %v785_v49  ;;  %2957 = vmatpush3.bf16.msra.mxu0 %v3372_v40  ;;  %3041 = vmatprep.subr.bf16.mxu1 %v3998_v52  ;;  %v4459_v59 = vrot.slane %v916_v39, %v497_v4  ;;  %v4463_v60 = vrot.slane %v916_v39, %v501_v6 }
 0x223   : > { %v3428_v11 = vpop.eup %3427  ;;  %v835_v12 = vadd.f32 1.0, %v3426_v2  ;;  %1160 = vmatprep.mubr.bf16.mxu1 %v879_v5  ;;  %2958 = vmatprep.subr.bf16.mxu0 %v3373_v50 }
 0x224   : > { %v3430_v7 = vpop.eup %3429  ;;  %v836_v8 = vadd.f32 1.0, %v3428_v11  ;;  %1161 = vmatmul.mubr.bf16.gmra.mrb[16].mxu1 %v878_v1  ;;  %v862_v20 = vmul.f32 %v834_v61, %v750_v13 }
 0x225   : > { %v837_v19 = vadd.f32 1.0, %v3430_v7  ;;  %v863_v23 = vmul.f32 %v835_v12, %v751_v17  ;;  %3042 = vmatpush3.bf16.xpose.msra.mxu1 %v3375_v51 }
 0x226   : > { %v864_v21 = vmul.f32 %v836_v8, %v752_v14  ;;  %2959 = vmatpush3.bf16.msra.mxu0 %v3374_v47  ;;  %3043 = vmatprep.subr.bf16.mxu1 %v3998_v52 }
 0x227   : > { %v865_v25 = vmul.f32 %v837_v19, %v753_v18 }
 0x228   : > { %v880_v28 = vpack.c.bf16 %v864_v21, %v862_v20 }
 0x229   : > { %v3432_v26 = vpop.eup %3431  ;;  %v881_v29 = vpack.c.bf16 %v865_v25, %v863_v23 }
 0x22a   : > { %v3434_v27 = vpop.eup %3433  ;;  %v838_v32 = vadd.f32 1.0, %v3432_v26 }
 0x22b   : > { %v3436_v30 = vpop.eup %3435  ;;  %v839_v33 = vadd.f32 1.0, %v3434_v27  ;;  %1170 = vmatprep.mubr.bf16.mxu1 %v881_v29 }
 0x22c   : > { %v3438_v9 = vpop.eup %3437  ;;  %v840_v22 = vadd.f32 1.0, %v3436_v30  ;;  %1171 = vmatmul.mubr.bf16.gmra.mrb[20].mxu1 %v880_v28  ;;  %v866_v35 = vmul.f32 %v838_v32, %v754_v10 }
 0x22d   : > { %v841_v34 = vadd.f32 1.0, %v3438_v9  ;;  %v867_v31 = vmul.f32 %v839_v33, %v755_v15  ;;  %3044 = vmatpush3.bf16.xpose.msra.mxu1 %v3376_v53 }
 0x22e   : > { %v868_v36 = vmul.f32 %v840_v22, %v756_v16  ;;  %3045 = vmatprep.subr.bf16.mxu1 %v3998_v52 }
 0x22f   : > { %v869_v37 = vmul.f32 %v841_v34, %v757_v24 }
 0x230   : > { %v882_v38 = vpack.c.bf16 %v868_v36, %v866_v35 }
 0x231   : > { %v883_v42 = vpack.c.bf16 %v869_v37, %v867_v31 }
 0x233   : > { %1180 = vmatprep.mubr.bf16.mxu1 %v883_v42 }
 0x234   : > { %1181 = vmatmul.mubr.bf16.gmra.mrb[24].mxu1 %v882_v38 }
 0x235   : > { %3046 = vmatpush3.bf16.xpose.msra.mxu1 %v3377_v54  ;;  %3057 = vmatprep.mubr.msk.bf16.mxu1 %vm3999_vm1, %v3998_v52 }
 0x236   : > { %3047 = vmatprep.subr.bf16.mxu1 %v3998_v52 }
 0x23d   : > { %3048 = vmatpush3.bf16.xpose.msra.mxu1 %v3378_v56 }
 0x23e   : > { %3049 = vmatprep.subr.bf16.mxu1 %v3998_v52 }
 0x245   : > { %3050 = vmatpush3.bf16.xpose.msra.mxu1 %v3379_v57 }
 0x246   : > { %3051 = vmatprep.subr.bf16.mxu1 %v3998_v52 }
 0x24d   : > { %3052 = vmatpush3.bf16.xpose.msra.mxu1 %v3380_v58 }
 0x24e   : > { %3053 = vmatprep.subr.bf16.mxu1 %v3998_v52 }
 0x2d7   : > { %v1122_v44 = vpop.f32.mrb[0].mxu1 }
 0x2d8   : > { %v1123_v41 = vadd.f32 %v1122_v44, %v4459_v59  ;;  %v1124_v62 = vpop.f32.mrb[1].mxu1 }
 0x2d9   : > { %v1125_v55 = vadd.f32 %v1124_v62, %v4463_v60  ;;  %v1126_v63 = vpop.f32.mrb[2].mxu1 }
 0x2da   : > { %v1219_v0 = vmul.f32 0.70710677, %v1123_v41  ;;  %v1127_v48 = vadd.f32 %v1126_v63, %v4459_v59  ;;  %v1128_v49 = vpop.f32.mrb[3].mxu1  ;;  %v1191_v33 = vmul.f32 0.5, %v1123_v41 }
 0x2db   : > { %v1220_v1 = vmul.f32 0.70710677, %v1125_v55  ;;  %v1129_v2 = vadd.f32 %v1128_v49, %v4463_v60  ;;  %v1192_v15 = vmul.f32 0.5, %v1125_v55 }
 0x2dc   : > { %3439 = verf.f32 %v1219_v0  ;;  %v1221_v4 = vmul.f32 0.70710677, %v1127_v48  ;;  %v1193_v9 = vmul.f32 0.5, %v1127_v48 }
 0x2dd   : > { %3441 = verf.f32 %v1220_v1  ;;  %v1222_v5 = vmul.f32 0.70710677, %v1129_v2  ;;  %v1194_v24 = vmul.f32 0.5, %v1129_v2 }
 0x2de   : > { %3443 = verf.f32 %v1221_v4 }
 0x2df   : > { %3445 = verf.f32 %v1222_v5  ;;  %v1132_v6 = vpop.f32.mrb[4].mxu1 }
 0x2e0   : > { %v1133_v61 = vadd.f32 %v1132_v6, %v4459_v59  ;;  %v1134_v11 = vpop.f32.mrb[5].mxu1 }
 0x2e1   : > { %v1135_v12 = vadd.f32 %v1134_v11, %v4463_v60  ;;  %v1136_v7 = vpop.f32.mrb[6].mxu1 }
 0x2e2   : > { %v1223_v13 = vmul.f32 0.70710677, %v1133_v61  ;;  %v1137_v14 = vadd.f32 %v1136_v7, %v4459_v59  ;;  %v1138_v8 = vpop.f32.mrb[7].mxu1  ;;  %v1195_v55 = vmul.f32 0.5, %v1133_v61 }
 0x2e3   : > { %v1224_v17 = vmul.f32 0.70710677, %v1135_v12  ;;  %v1139_v18 = vadd.f32 %v1138_v8, %v4463_v60  ;;  %v1196_v1 = vmul.f32 0.5, %v1135_v12 }
 0x2e4   : > { %3447 = verf.f32 %v1223_v13  ;;  %v1225_v19 = vmul.f32 0.70710677, %v1137_v14  ;;  %v1197_v63 = vmul.f32 0.5, %v1137_v14 }
 0x2e5   : > { %3449 = verf.f32 %v1224_v17  ;;  %v1226_v20 = vmul.f32 0.70710677, %v1139_v18  ;;  %v1198_v2 = vmul.f32 0.5, %v1139_v18 }
 0x2e6   : > { %v3440_v21 = vpop.eup %3439  ;;  %3451 = verf.f32 %v1225_v19 }
 0x2e7   : > { %v3442_v23 = vpop.eup %3441  ;;  %v1275_v25 = vadd.f32 1.0, %v3440_v21  ;;  %3453 = verf.f32 %v1226_v20  ;;  %v1142_v26 = vpop.f32.mrb[8].mxu1 }
 0x2e8   : > { %v3444_v28 = vpop.eup %3443  ;;  %v1276_v27 = vadd.f32 1.0, %v3442_v23  ;;  %v4474_v29 = vadd.f32 %v1142_v26, %v4459_v59  ;;  %v1144_v32 = vpop.f32.mrb[9].mxu1 }
 0x2e9   : > { %v3446_v30 = vpop.eup %3445  ;;  %v1277_v10 = vadd.f32 1.0, %v3444_v28  ;;  %v4477_v16 = vadd.f32 %v1144_v32, %v4463_v60  ;;  %v1146_v22 = vpop.f32.mrb[10].mxu1  ;;  %v1303_v31 = vmul.f32 %v1275_v25, %v1191_v33 }
 0x2ea   : > { %v1278_v34 = vadd.f32 1.0, %v3446_v30  ;;  %v1227_v35 = vmul.f32 0.70710677, %v4474_v29  ;;  %v1148_v36 = vpop.f32.mrb[11].mxu1  ;;  %v1147_v42 = vadd.f32 %v1146_v22, %v4459_v59  ;;  %v1304_v43 = vmul.f32 %v1276_v27, %v1192_v15 }
 0x2eb   : > { %v1305_v37 = vmul.f32 %v1277_v10, %v1193_v9  ;;  %v1228_v38 = vmul.f32 0.70710677, %v4477_v16  ;;  %v1149_v46 = vadd.f32 %v1148_v36, %v4463_v60  ;;  %v1199_v30 = vmul.f32 0.5, %v4474_v29 }
 0x2ec   : > { %v1306_v45 = vmul.f32 %v1278_v34, %v1194_v24  ;;  %3455 = verf.f32 %v1227_v35  ;;  %v1229_v50 = vmul.f32 0.70710677, %v1147_v42  ;;  %v1200_v15 = vmul.f32 0.5, %v4477_v16 }
 0x2ed   : > { %v1331_v40 = vpack.c.bf16 %v1305_v37, %v1303_v31  ;;  %3457 = verf.f32 %v1228_v38  ;;  %v1230_v51 = vmul.f32 0.70710677, %v1149_v46  ;;  %v1201_v24 = vmul.f32 0.5, %v1147_v42 }
 0x2ee   : > { %v3448_v47 = vpop.eup %3447  ;;  %v1332_v53 = vpack.c.bf16 %v1306_v45, %v1304_v43  ;;  %3459 = verf.f32 %v1229_v50  ;;  %v1202_v31 = vmul.f32 0.5, %v1149_v46 }
 0x2ef   : > { %v3450_v54 = vpop.eup %3449  ;;  %v1279_v56 = vadd.f32 1.0, %v3448_v47  ;;  %v1152_v57 = vpop.f32.mrb[12].mxu1  ;;  %3461 = verf.f32 %v1230_v51 }
 0x2f0   : > { %v3452_v58 = vpop.eup %3451  ;;  %v1280_v39 = vadd.f32 1.0, %v3450_v54  ;;  %v4484_v44 = vadd.f32 %v1152_v57, %v4459_v59  ;;  %v1154_v41 = vpop.f32.mrb[13].mxu1  ;;  %1512 = vmatprep.mubr.bf16.mxu0 %v1332_v53 }
 0x2f1   : > { %v3454_v62 = vpop.eup %3453  ;;  %v1281_v0 = vadd.f32 1.0, %v3452_v58  ;;  %v4487_v48 = vadd.f32 %v1154_v41, %v4463_v60  ;;  %v1156_v49 = vpop.f32.mrb[14].mxu1  ;;  %1513 = vmatmul.mubr.bf16.vlgmr.msra.gmra.mrb[28].mxu0 %v1331_v40  ;;  %v1307_v11 = vmul.f32 %v1279_v56, %v1195_v55 }
 0x2f2   : > { %v1282_v4 = vadd.f32 1.0, %v3454_v62  ;;  %v1231_v5 = vmul.f32 0.70710677, %v4484_v44  ;;  %v1158_v6 = vpop.f32.mrb[15].mxu1  ;;  %v1157_v8 = vadd.f32 %v1156_v49, %v4459_v59  ;;  %v1308_v61 = vmul.f32 %v1280_v39, %v1196_v1 }
 0x2f3   : > { %v1309_v7 = vmul.f32 %v1281_v0, %v1197_v63  ;;  %v1232_v13 = vmul.f32 0.70710677, %v4487_v48  ;;  %v1159_v17 = vadd.f32 %v1158_v6, %v4463_v60  ;;  %v1203_v62 = vmul.f32 0.5, %v4484_v44 }
 0x2f4   : > { %v1310_v14 = vmul.f32 %v1282_v4, %v1198_v2  ;;  %3463 = verf.f32 %v1231_v5  ;;  %v1233_v19 = vmul.f32 0.70710677, %v1157_v8  ;;  %v1204_v1 = vmul.f32 0.5, %v4487_v48 }
 0x2f5   : > { %3465 = verf.f32 %v1232_v13  ;;  %v1333_v20 = vpack.c.bf16 %v1309_v7, %v1307_v11  ;;  %v1234_v18 = vmul.f32 0.70710677, %v1159_v17  ;;  %v1205_v2 = vmul.f32 0.5, %v1157_v8 }
 0x2f6   : > { %v3456_v12 = vpop.eup %3455  ;;  %v1334_v21 = vpack.c.bf16 %v1310_v14, %v1308_v61  ;;  %3467 = verf.f32 %v1233_v19  ;;  %v1206_v11 = vmul.f32 0.5, %v1159_v17 }
 0x2f7   : > { %v3458_v23 = vpop.eup %3457  ;;  %v1162_v25 = vpop.f32.mrb[16].mxu1  ;;  %v1283_v26 = vadd.f32 1.0, %v3456_v12  ;;  %3469 = verf.f32 %v1234_v18 }
 0x2f8   : > { %v4494_v28 = vadd.f32 %v1162_v25, %v4459_v59  ;;  %v1164_v27 = vpop.f32.mrb[17].mxu1  ;;  %1520 = vmatprep.mubr.bf16.mxu0 %v1334_v21  ;;  %v3460_v32 = vpop.eup %3459  ;;  %v1284_v33 = vadd.f32 1.0, %v3458_v23 }
 0x2f9   : > { %v4498_v9 = vadd.f32 %v1164_v27, %v4463_v60  ;;  %v1166_v10 = vpop.f32.mrb[18].mxu1  ;;  %1521 = vmatmul.mubr.bf16.gmra.mrb[32].mxu0 %v1333_v20  ;;  %v3462_v22 = vpop.eup %3461  ;;  %v1285_v34 = vadd.f32 1.0, %v3460_v32  ;;  %v1311_v43 = vmul.f32 %v1283_v26, %v1199_v30 }
 0x2fa   : > { %v1235_v35 = vmul.f32 0.70710677, %v4494_v28  ;;  %v1168_v36 = vpop.f32.mrb[19].mxu1  ;;  %v1286_v37 = vadd.f32 1.0, %v3462_v22  ;;  %v4504_v29 = vadd.f32 %v1166_v10, %v4459_v59  ;;  %v1312_v50 = vmul.f32 %v1284_v33, %v1200_v15 }
 0x2fb   : > { %v1236_v38 = vmul.f32 0.70710677, %v4498_v9  ;;  %v1313_v45 = vmul.f32 %v1285_v34, %v1201_v24  ;;  %v4507_v40 = vadd.f32 %v1168_v36, %v4463_v60  ;;  %v1207_v33 = vmul.f32 0.5, %v4494_v28 }
 0x2fc   : > { %3471 = verf.f32 %v1235_v35  ;;  %v1314_v16 = vmul.f32 %v1286_v37, %v1202_v31  ;;  %v1237_v42 = vmul.f32 0.70710677, %v4504_v29  ;;  %v1208_v34 = vmul.f32 0.5, %v4498_v9 }
 0x2fd   : > { %3473 = verf.f32 %v1236_v38  ;;  %v1238_v46 = vmul.f32 0.70710677, %v4507_v40  ;;  %v1335_v51 = vpack.c.bf16 %v1313_v45, %v1311_v43  ;;  %v1209_v35 = vmul.f32 0.5, %v4504_v29 }
 0x2fe   : > { %v3464_v47 = vpop.eup %3463  ;;  %3475 = verf.f32 %v1237_v42  ;;  %v1336_v56 = vpack.c.bf16 %v1314_v16, %v1312_v50  ;;  %v1210_v38 = vmul.f32 0.5, %v4507_v40 }
 0x2ff   : > { %v3466_v53 = vpop.eup %3465  ;;  %v1172_v54 = vpop.f32.mrb[20].mxu1  ;;  %v1287_v57 = vadd.f32 1.0, %v3464_v47  ;;  %3477 = verf.f32 %v1238_v46 }
 0x300   : > { %v4512_v58 = vadd.f32 %v1172_v54, %v4459_v59  ;;  %v1174_v39 = vpop.f32.mrb[21].mxu1  ;;  %v3468_v41 = vpop.eup %3467  ;;  %v1288_v55 = vadd.f32 1.0, %v3466_v53  ;;  %1528 = vmatprep.mubr.bf16.mxu0 %v1336_v56 }
 0x301   : > { %v4516_v63 = vadd.f32 %v1174_v39, %v4463_v60  ;;  %v1176_v0 = vpop.f32.mrb[22].mxu1  ;;  %v3470_v49 = vpop.eup %3469  ;;  %v1289_v4 = vadd.f32 1.0, %v3468_v41  ;;  %1529 = vmatmul.mubr.bf16.gmra.mrb[36].mxu0 %v1335_v51  ;;  %v1315_v61 = vmul.f32 %v1287_v57, %v1203_v62 }
 0x302   : > { %v1239_v5 = vmul.f32 0.70710677, %v4512_v58  ;;  %v1178_v6 = vpop.f32.mrb[23].mxu1  ;;  %v1290_v7 = vadd.f32 1.0, %v3470_v49  ;;  %v1177_v44 = vadd.f32 %v1176_v0, %v4459_v59  ;;  %v1316_v20 = vmul.f32 %v1288_v55, %v1204_v1 }
 0x303   : > { %v1240_v13 = vmul.f32 0.70710677, %v4516_v63  ;;  %v1317_v14 = vmul.f32 %v1289_v4, %v1205_v2  ;;  %v1179_v19 = vadd.f32 %v1178_v6, %v4463_v60  ;;  %v1211_v41 = vmul.f32 0.5, %v4512_v58 }
 0x304   : > { %3479 = verf.f32 %v1239_v5  ;;  %v1318_v12 = vmul.f32 %v1290_v7, %v1206_v11  ;;  %v1241_v48 = vmul.f32 0.70710677, %v1177_v44  ;;  %v1213_v62 = vmul.f32 0.5, %v1177_v44 }
 0x305   : > { %3481 = verf.f32 %v1240_v13  ;;  %v1242_v18 = vmul.f32 0.70710677, %v1179_v19  ;;  %v1337_v21 = vpack.c.bf16 %v1317_v14, %v1315_v61  ;;  %v1212_v55 = vmul.f32 0.5, %v4516_v63 }
 0x306   : > { %v3472_v8 = vpop.eup %3471  ;;  %3483 = verf.f32 %v1241_v48  ;;  %v1338_v25 = vpack.c.bf16 %v1318_v12, %v1316_v20  ;;  %v1214_v0 = vmul.f32 0.5, %v1179_v19 }
 0x307   : > { %v3474_v23 = vpop.eup %3473  ;;  %v1182_v17 = vpop.f32.mrb[24].mxu1  ;;  %v1291_v26 = vadd.f32 1.0, %v3472_v8  ;;  %3485 = verf.f32 %v1242_v18 }
 0x308   : > { %v1183_v27 = vadd.f32 %v1182_v17, %v4459_v59  ;;  %v1184_v32 = vpop.f32.mrb[25].mxu1  ;;  %v3476_v30 = vpop.eup %3475  ;;  %v1292_v10 = vadd.f32 1.0, %v3474_v23  ;;  %1536 = vmatprep.mubr.bf16.mxu0 %v1338_v25 }
 0x309   : > { %v1185_v22 = vadd.f32 %v1184_v32, %v4463_v60  ;;  %v1186_v15 = vpop.f32.mrb[26].mxu1  ;;  %v3478_v24 = vpop.eup %3477  ;;  %v1293_v36 = vadd.f32 1.0, %v3476_v30  ;;  %1537 = vmatmul.mubr.bf16.gmra.mrb[40].mxu0 %v1337_v21  ;;  %v1319_v50 = vmul.f32 %v1291_v26, %v1207_v33  ;;  %v3381_v32 = vld [vmem:[#allocation14 + $0x30] sm:$0xff]   ;;  %v3382_v30 = vld [vmem:[#allocation14 + $0x38] sm:$0xff]  }
 0x30a   : > { %v1243_v31 = vmul.f32 0.70710677, %v1183_v27  ;;  %v1188_v37 = vpop.f32.mrb[27].mxu1  ;;  %v1294_v43 = vadd.f32 1.0, %v3478_v24  ;;  %v1187_v28 = vadd.f32 %v1186_v15, %v4459_v59  ;;  %v1320_v47 = vmul.f32 %v1292_v10, %v1208_v34  ;;  %3054 = vmatpush3.bf16.xpose.msra.mxu1 %v3381_v32  ;;  %v4534_v33 = vld [vmem:[#allocation13] ss:$0 sm:$0xff] }
 0x30b   : > { %v1244_v45 = vmul.f32 0.70710677, %v1185_v22  ;;  %v1321_v16 = vmul.f32 %v1293_v36, %v1209_v35  ;;  %v1189_v42 = vadd.f32 %v1188_v37, %v4463_v60  ;;  %v1215_v44 = vmul.f32 0.5, %v1183_v27  ;;  %3055 = vmatprep.subr.bf16.mxu1 %v3998_v52 }
 0x30c   : > { %3487 = verf.f32 %v1243_v31  ;;  %v1322_v46 = vmul.f32 %v1294_v43, %v1210_v38  ;;  %v1245_v9 = vmul.f32 0.70710677, %v1187_v28  ;;  %v1217_v12 = vmul.f32 0.5, %v1187_v28 }
 0x30d   : > { %3489 = verf.f32 %v1244_v45  ;;  %v1246_v51 = vmul.f32 0.70710677, %v1189_v42  ;;  %v1339_v53 = vpack.c.bf16 %v1321_v16, %v1319_v50  ;;  %v1216_v63 = vmul.f32 0.5, %v1185_v22 }
 0x30e   : > { %v3480_v29 = vpop.eup %3479  ;;  %3491 = verf.f32 %v1245_v9  ;;  %v1340_v56 = vpack.c.bf16 %v1322_v46, %v1320_v47  ;;  %v1218_v19 = vmul.f32 0.5, %v1189_v42 }
 0x30f   : > { %v3482_v54 = vpop.eup %3481  ;;  %v1295_v40 = vadd.f32 1.0, %v3480_v29  ;;  %3493 = verf.f32 %v1246_v51 }
 0x310   : > { %v3484_v57 = vpop.eup %3483  ;;  %v1296_v39 = vadd.f32 1.0, %v3482_v54  ;;  %1544 = vmatprep.mubr.bf16.mxu0 %v1340_v56 }
 0x311   : > { %v3486_v59 = vpop.eup %3485  ;;  %v1297_v60 = vadd.f32 1.0, %v3484_v57  ;;  %1545 = vmatmul.mubr.bf16.gmra.mrb[44].mxu0 %v1339_v53  ;;  %v1323_v1 = vmul.f32 %v1295_v40, %v1211_v41 }
 0x312   : > { %v1298_v49 = vadd.f32 1.0, %v3486_v59  ;;  %v1324_v4 = vmul.f32 %v1296_v39, %v1212_v55  ;;  %3056 = vmatpush3.bf16.xpose.msra.mxu1 %v3382_v30 }
 0x313   : > { %v1325_v2 = vmul.f32 %v1297_v60, %v1213_v62 }
 0x314   : > { %v1326_v5 = vmul.f32 %v1298_v49, %v1214_v0 }
 0x315   : > { %v1341_v11 = vpack.c.bf16 %v1325_v2, %v1323_v1 }
 0x316   : > { %v3488_v6 = vpop.eup %3487  ;;  %v1342_v13 = vpack.c.bf16 %v1326_v5, %v1324_v4 }
 0x317   : > { %v3490_v7 = vpop.eup %3489  ;;  %v1299_v61 = vadd.f32 1.0, %v3488_v6 }
 0x318   : > { %v3492_v14 = vpop.eup %3491  ;;  %v1300_v20 = vadd.f32 1.0, %v3490_v7  ;;  %1552 = vmatprep.mubr.bf16.mxu0 %v1342_v13 }
 0x319   : > { %v3494_v58 = vpop.eup %3493  ;;  %v1301_v48 = vadd.f32 1.0, %v3492_v14  ;;  %1553 = vmatmul.mubr.bf16.gmra.mrb[48].mxu0 %v1341_v11  ;;  %v1327_v18 = vmul.f32 %v1299_v61, %v1215_v44 }
 0x31a   : > { %v1302_v8 = vadd.f32 1.0, %v3494_v58  ;;  %v1328_v23 = vmul.f32 %v1300_v20, %v1216_v63 }
 0x31b   : > { %v1329_v21 = vmul.f32 %v1301_v48, %v1217_v12 }
 0x31c   : > { %v1330_v17 = vmul.f32 %v1302_v8, %v1218_v19 }
 0x31d   : > { %v1343_v25 = vpack.c.bf16 %v1329_v21, %v1327_v18 }
 0x31e   : > { %v1344_v26 = vpack.c.bf16 %v1330_v17, %v1328_v23 }
 0x320   : > { %1560 = vmatprep.mubr.bf16.mxu0 %v1344_v26 }
 0x321   : > { %1561 = vmatmul.mubr.bf16.gmra.mrb[52].mxu0 %v1343_v25 }
 0x3c4   : > { %v2960_v27 = vpop.f32.mrb[28].mxu0 }
 0x3c5   : > { %v2961_v10 = vpop.f32.mrb[29].mxu0 }
 0x3c6   : > { %v2962_v22 = vadd.f32 %v2961_v10, %v2960_v27  ;;  %v2963_v15 = vpop.f32.mrb[30].mxu0 }
 0x3c7   : > { %v2964_v24 = vpop.f32.mrb[31].mxu0 }
 0x3c8   : > { %v4537_v34 = vadd.f32 %v2962_v22, %v4534_v33  ;;  %v2965_v35 = vadd.f32 %v2964_v24, %v2963_v15 }
 0x3ca   : > { %v4540_v36 = vadd.f32 %v2965_v35, %v4534_v33  ;;  %v1569_v31 = vmul.f32 %v4537_v34, %v4537_v34 }
 0x3cc   : > { %v4546_v37 = vpack.c.bf16 %v4540_v36, %v4537_v34  ;;  %v2966_v38 = vpop.f32.mrb[32].mxu0  ;;  %1583 = vadd.xlane.f32.xlu0 %v1569_v31  ;;  %v1570_v50 = vmul.f32 %v4540_v36, %v4540_v36 }
 0x3cd   : > { %v2967_v43 = vpop.f32.mrb[33].mxu0 }
 0x3ce   : > { %v2968_v45 = vadd.f32 %v2967_v43, %v2966_v38  ;;  %v2969_v28 = vpop.f32.mrb[34].mxu0  ;;  %3085 = vmatprep.subr.bf16.mxu0 %v4546_v37  ;;  %3133 = vmatprep.subr.bf16.mxu1 %v4546_v37 }
 0x3cf   : > { %v2970_v16 = vpop.f32.mrb[35].mxu0  ;;  %3086 = vmatpush3.bf16.msra.mxu0 %v4546_v37 }
 0x3d0   : > { %v4554_v42 = vadd.f32 %v2968_v45, %v4534_v33  ;;  %v2971_v47 = vadd.f32 %v2970_v16, %v2969_v28  ;;  %1585 = vadd.xlane.f32.xlu0 %v1570_v50 }
 0x3d2   : > { %v4557_v46 = vadd.f32 %v2971_v47, %v4534_v33  ;;  %v1571_v9 = vmul.f32 %v4554_v42, %v4554_v42 }
 0x3d4   : > { %v4563_v29 = vpack.c.bf16 %v4557_v46, %v4554_v42  ;;  %1587 = vadd.xlane.f32.xlu1 %v1571_v9  ;;  %v2972_v51 = vpop.f32.mrb[36].mxu0  ;;  %v1572_v54 = vmul.f32 %v4557_v46, %v4557_v46 }
 0x3d5   : > { %v2973_v53 = vpop.f32.mrb[37].mxu0 }
 0x3d6   : > { %3087 = vmatprep.subr.bf16.mxu0 %v4563_v29  ;;  %v2974_v56 = vadd.f32 %v2973_v53, %v2972_v51  ;;  %v2975_v40 = vpop.f32.mrb[38].mxu0 }
 0x3d7   : > { %3088 = vmatpush3.bf16.msra.mxu0 %v4563_v29  ;;  %v2976_v57 = vpop.f32.mrb[39].mxu0 }
 0x3d8   : > { %1589 = vadd.xlane.f32.xlu1 %v1572_v54  ;;  %v4570_v39 = vadd.f32 %v2974_v56, %v4534_v33  ;;  %v2977_v59 = vadd.f32 %v2976_v57, %v2975_v40 }
 0x3da   : > { %v4573_v41 = vadd.f32 %v2977_v59, %v4534_v33  ;;  %v1573_v62 = vmul.f32 %v4570_v39, %v4570_v39 }
 0x3dc   : > { %v4579_v60 = vpack.c.bf16 %v4573_v41, %v4570_v39  ;;  %v2978_v55 = vpop.f32.mrb[40].mxu0  ;;  %1591 = vadd.xlane.f32.xlu0 %v1573_v62  ;;  %v1574_v0 = vmul.f32 %v4573_v41, %v4573_v41 }
 0x3dd   : > { %v2979_v49 = vpop.f32.mrb[41].mxu0 }
 0x3de   : > { %v2980_v1 = vadd.f32 %v2979_v49, %v2978_v55  ;;  %v2981_v2 = vpop.f32.mrb[42].mxu0  ;;  %1593 = vadd.xlane.f32.xlu1 %v1574_v0  ;;  %3089 = vmatprep.subr.bf16.mxu0 %v4579_v60 }
 0x3df   : > { %v2982_v4 = vpop.f32.mrb[43].mxu0  ;;  %3090 = vmatpush3.bf16.msra.mxu0 %v4579_v60 }
 0x3e0   : > { %v4586_v5 = vadd.f32 %v2980_v1, %v4534_v33  ;;  %v2983_v6 = vadd.f32 %v2982_v4, %v2981_v2 }
 0x3e2   : > { %v4589_v11 = vadd.f32 %v2983_v6, %v4534_v33  ;;  %v4593_v7 = vpack.c.bf16 %v4586_v5, %v4586_v5  ;;  %v1575_v13 = vmul.f32 %v4586_v5, %v4586_v5 }
 0x3e4   : > { %v2984_v61 = vpop.f32.mrb[44].mxu0  ;;  %3141 = vmatprep.subr.msk.bf16.mxu0 %vm2258_vm0, %v4593_v7  ;;  %1595 = vadd.xlane.f32.xlu0 %v1575_v13  ;;  %v4601_v14 = vsel %vm2258_vm0, %v4593_v7, 0  ;;  %v1576_v20 = vmul.f32 %v4589_v11, %v4589_v11  ;;  %v2177_v21 = vpack.c.bf16 %v4589_v11, %v4586_v5 }
 0x3e5   : > { %v2985_v58 = vpop.f32.mrb[45].mxu0  ;;  %3092 = vmatpush3.bf16.msra.mxu0 %v4601_v14 }
 0x3e6   : > { %v2986_v44 = vadd.f32 %v2985_v58, %v2984_v61  ;;  %v2987_v12 = vpop.f32.mrb[46].mxu0  ;;  %1597 = vadd.xlane.f32.xlu1 %v1576_v20  ;;  %v2195_v27 = vunpack.c.h.b16 %v2177_v21 }
 0x3e7   : > { %v2988_v48 = vpop.f32.mrb[47].mxu0 }
 0x3e8   : > { %v4607_v63 = vadd.f32 %v2986_v44, %v4534_v33  ;;  %v2989_v19 = vadd.f32 %v2988_v48, %v2987_v12 }
 0x3ea   : > { %v4610_v8 = vadd.f32 %v2989_v19, %v4534_v33  ;;  %v1577_v18 = vmul.f32 %v4607_v63, %v4607_v63 }
 0x3ec   : > { %v4618_v23 = vpack.c.bf16 %v4610_v8, %v4607_v63  ;;  %v2990_v17 = vpop.f32.mrb[48].mxu0  ;;  %1599 = vadd.xlane.f32.xlu0 %v1577_v18  ;;  %v1578_v25 = vmul.f32 %v4610_v8, %v4610_v8 }
 0x3ed   : > { %v2991_v26 = vpop.f32.mrb[49].mxu0 }
 0x3ee   : > { %v2992_v32 = vadd.f32 %v2991_v26, %v2990_v17  ;;  %v2993_v30 = vpop.f32.mrb[50].mxu0  ;;  %1601 = vadd.xlane.f32.xlu1 %v1578_v25  ;;  %v2196_v10 = vunpack.c.l.b16 %v4618_v23 }
 0x3ef   : > { %v2994_v22 = vpop.f32.mrb[51].mxu0 }
 0x3f0   : > { %v4626_v15 = vadd.f32 %v2992_v32, %v4534_v33  ;;  %v2995_v24 = vadd.f32 %v2994_v22, %v2993_v30  ;;  %v4628_v35 = vpack.c.b16 %v2196_v10, %v2195_v27 }
 0x3f2   : > { %v4631_v31 = vadd.f32 %v2995_v24, %v4534_v33  ;;  %3109 = vmatprep.subr.bf16.mxu0 %v4628_v35  ;;  %v1579_v38 = vmul.f32 %v4626_v15, %v4626_v15 }
 0x3f4   : > { %v2996_v43 = vpop.f32.mrb[52].mxu0  ;;  %1603 = vadd.xlane.f32.xlu0 %v1579_v38  ;;  %v1580_v45 = vmul.f32 %v4631_v31, %v4631_v31 }
 0x3f5   : > { %v2997_v28 = vpop.f32.mrb[53].mxu0 }
 0x3f6   : > { %v2998_v50 = vadd.f32 %v2997_v28, %v2996_v43  ;;  %v2999_v16 = vpop.f32.mrb[54].mxu0  ;;  %1605 = vadd.xlane.f32.xlu1 %v1580_v45 }
 0x3f7   : > { %v3000_v47 = vpop.f32.mrb[55].mxu0 }
 0x3f8   : > { %v4639_v9 = vadd.f32 %v2998_v50, %v4534_v33  ;;  %v3001_v51 = vadd.f32 %v3000_v47, %v2999_v16 }
 0x3fa   : > { %v4642_v53 = vadd.f32 %v3001_v51, %v4534_v33  ;;  %v1581_v54 = vmul.f32 %v4639_v9, %v4639_v9 }
 0x3fc   : > { %1607 = vadd.xlane.f32.xlu0 %v1581_v54  ;;  %v1582_v56 = vmul.f32 %v4642_v53, %v4642_v53 }
 0x3fe   : > { %1609 = vadd.xlane.f32.xlu1 %v1582_v56 }
 0x459   : > { %v1584_v40 = vpop.xlane.xlu0 %1583 }
 0x45a   : > { %v1611_v57 = vmax.f32 %v1584_v40, 1e-24 }
 0x45c   : > { %3495 = vrsqrt.f32 %v1611_v57 }
 0x45d   : > { %v1586_v59 = vpop.xlane.xlu0 %1585 }
 0x45e   : > { %v1612_v62 = vmax.f32 %v1586_v59, 1e-24 }
 0x460   : > { %3497 = vrsqrt.f32 %v1612_v62 }
 0x461   : > { %v1588_v55 = vpop.xlane.xlu1 %1587 }
 0x462   : > { %v1613_v0 = vmax.f32 %v1588_v55, 1e-24 }
 0x464   : > { %3499 = vrsqrt.f32 %v1613_v0 }
 0x465   : > { %v1590_v49 = vpop.xlane.xlu1 %1589 }
 0x466   : > { %v1614_v33 = vmax.f32 %v1590_v49, 1e-24  ;;  %v3496_v1 = vpop.eup %3495 }
 0x467   : > { %v1639_v6 = vmul.f32 %v3496_v1, %v4537_v34 }
 0x468   : > { %3501 = vrsqrt.f32 %v1614_v33 }
 0x469   : > { %v1592_v4 = vpop.xlane.xlu0 %1591 }
 0x46a   : > { %v3498_v2 = vpop.eup %3497  ;;  %v1615_v61 = vmax.f32 %v1592_v4, 1e-24 }
 0x46b   : > { %v1640_v13 = vmul.f32 %v3498_v2, %v4540_v36  ;;  %v1594_v20 = vpop.xlane.xlu1 %1593 }
 0x46c   : > { %v1616_v58 = vmax.f32 %v1594_v20, 1e-24  ;;  %3503 = vrsqrt.f32 %v1615_v61 }
 0x46d   : > { %v1653_v44 = vpack.c.bf16 %v1640_v13, %v1639_v6 }
 0x46e   : > { %3505 = vrsqrt.f32 %v1616_v58  ;;  %v3500_v12 = vpop.eup %3499 }
 0x46f   : > { %3058 = vmatmul.mubr.bf16.vlgmr.msra.gmra.mrb[28].mxu1 %v1653_v44  ;;  %v1641_v36 = vmul.f32 %v3500_v12, %v4554_v42 }
 0x470   : > { %3137 = vmatpush3.bf16.msra.mxu1 %v4546_v37  ;;  %3061 = vmatprep.mubr.msk.bf16.mxu1 %vm3999_vm1, %v3998_v52 }
 0x471   : > { %3134 = vmatprep.subr.bf16.mxu1 %v4563_v29  ;;  %v1596_v19 = vpop.xlane.xlu0 %1595 }
 0x472   : > { %v3502_v48 = vpop.eup %3501  ;;  %v1617_v34 = vmax.f32 %v1596_v19, 1e-24 }
 0x473   : > { %v1642_v18 = vmul.f32 %v3502_v48, %v4557_v46  ;;  %v1598_v21 = vpop.xlane.xlu1 %1597 }
 0x474   : > { %3138 = vmatpush3.bf16.msra.mxu1 %v4563_v29  ;;  %v1618_v17 = vmax.f32 %v1598_v21, 1e-24  ;;  %3507 = vrsqrt.f32 %v1617_v34 }
 0x475   : > { %3135 = vmatprep.subr.bf16.mxu1 %v4579_v60  ;;  %v1654_v25 = vpack.c.bf16 %v1642_v18, %v1641_v36 }
 0x476   : > { %3509 = vrsqrt.f32 %v1618_v17  ;;  %v3504_v37 = vpop.eup %3503 }
 0x477   : > { %3062 = vmatmul.mubr.bf16.gmra.mrb[32].mxu1 %v1654_v25  ;;  %v1643_v32 = vmul.f32 %v3504_v37, %v4570_v39 }
 0x478   : > { %3139 = vmatpush3.bf16.msra.mxu1 %v4579_v60  ;;  %3065 = vmatprep.mubr.msk.bf16.mxu1 %vm3999_vm1, %v3998_v52  ;;  %v3506_v26 = vpop.eup %3505 }
 0x479   : > { %3142 = vmatprep.subr.msk.bf16.mxu1 %vm2258_vm0, %v4593_v7  ;;  %v1600_v42 = vpop.xlane.xlu0 %1599  ;;  %v1644_v46 = vmul.f32 %v3506_v26, %v4573_v41 }
 0x47a   : > { %v1619_v29 = vmax.f32 %v1600_v42, 1e-24 }
 0x47b   : > { %v1602_v30 = vpop.xlane.xlu1 %1601  ;;  %v1655_v10 = vpack.c.bf16 %v1644_v46, %v1643_v32 }
 0x47c   : > { %3140 = vmatpush3.bf16.msra.mxu1 %v4601_v14  ;;  %v1620_v27 = vmax.f32 %v1602_v30, 1e-24  ;;  %3511 = vrsqrt.f32 %v1619_v29 }
 0x47e   : > { %3513 = vrsqrt.f32 %v1620_v27  ;;  %v3508_v60 = vpop.eup %3507 }
 0x47f   : > { %3066 = vmatmul.mubr.bf16.gmra.mrb[36].mxu1 %v1655_v10  ;;  %v1645_v38 = vmul.f32 %v3508_v60, %v4586_v5 }
 0x480   : > { %3069 = vmatprep.mubr.msk.bf16.mxu1 %vm3999_vm1, %v3998_v52  ;;  %v3510_v22 = vpop.eup %3509 }
 0x481   : > { %v1604_v7 = vpop.xlane.xlu0 %1603  ;;  %v1646_v24 = vmul.f32 %v3510_v22, %v4589_v11 }
 0x482   : > { %v1621_v41 = vmax.f32 %v1604_v7, 1e-24 }
 0x483   : > { %v1606_v39 = vpop.xlane.xlu1 %1605  ;;  %v1656_v45 = vpack.c.bf16 %v1646_v24, %v1645_v38 }
 0x484   : > { %v1622_v43 = vmax.f32 %v1606_v39, 1e-24  ;;  %3515 = vrsqrt.f32 %v1621_v41 }
 0x486   : > { %3517 = vrsqrt.f32 %v1622_v43  ;;  %v3512_v14 = vpop.eup %3511 }
 0x487   : > { %3070 = vmatmul.mubr.bf16.gmra.mrb[40].mxu1 %v1656_v45  ;;  %v1647_v11 = vmul.f32 %v3512_v14, %v4607_v63 }
 0x488   : > { %3073 = vmatprep.mubr.msk.bf16.mxu1 %vm3999_vm1, %v3998_v52  ;;  %v3514_v28 = vpop.eup %3513 }
 0x489   : > { %v1608_v50 = vpop.xlane.xlu0 %1607  ;;  %v1648_v16 = vmul.f32 %v3514_v28, %v4610_v8 }
 0x48a   : > { %v1623_v47 = vmax.f32 %v1608_v50, 1e-24 }
 0x48b   : > { %v1610_v51 = vpop.xlane.xlu1 %1609  ;;  %v1657_v5 = vpack.c.bf16 %v1648_v16, %v1647_v11 }
 0x48c   : > { %v1624_v54 = vmax.f32 %v1610_v51, 1e-24  ;;  %3519 = vrsqrt.f32 %v1623_v47 }
 0x48e   : > { %3521 = vrsqrt.f32 %v1624_v54  ;;  %v3516_v56 = vpop.eup %3515 }
 0x48f   : > { %3074 = vmatmul.mubr.bf16.gmra.mrb[44].mxu1 %v1657_v5  ;;  %v1649_v59 = vmul.f32 %v3516_v56, %v4626_v15 }
 0x490   : > { %3077 = vmatprep.mubr.msk.bf16.mxu1 %vm3999_vm1, %v3998_v52  ;;  %v3518_v40 = vpop.eup %3517 }
 0x491   : > { %v1650_v57 = vmul.f32 %v3518_v40, %v4631_v31 }
 0x493   : > { %v1658_v8 = vpack.c.bf16 %v1650_v57, %v1649_v59 }
 0x496   : > { %v3520_v62 = vpop.eup %3519 }
 0x497   : > { %3078 = vmatmul.mubr.bf16.gmra.mrb[48].mxu1 %v1658_v8  ;;  %v1651_v0 = vmul.f32 %v3520_v62, %v4639_v9 }
 0x498   : > { %3081 = vmatprep.mubr.msk.bf16.mxu1 %vm3999_vm1, %v3998_v52  ;;  %v3522_v63 = vpop.eup %3521 }
 0x499   : > { %v1652_v55 = vmul.f32 %v3522_v63, %v4642_v53 }
 0x49b   : > { %v1659_v49 = vpack.c.bf16 %v1652_v55, %v1651_v0 }
 0x49f   : > { %3082 = vmatmul.mubr.bf16.gmra.mrb[52].mxu1 %v1659_v49 }
 0x542   : > { %v1758_v33 = vpop.f32.mrb[28].mxu1 }
 0x543   : > { %1813 = vst [vmem:[%s4683_s8] sm:$0xff] %v1758_v33  ;;  %v3059_v1 = vpop.f32.mrb[29].mxu1  ;;  %v4686_v2 = vmul.f32 14.285714, %v1758_v33 }
 0x544   : > { %v1761_v52 = vpop.f32.mrb[30].mxu1 }
 0x545   : > { %1814 = vst [vmem:[%s4683_s8 + $0x8] sm:$0xff] %v1761_v52  ;;  %1841 = vmax.xlane.f32.xlu0 %v4686_v2  ;;  %v3060_v4 = vpop.f32.mrb[31].mxu1  ;;  %v4690_v6 = vmul.f32 14.285714, %v1761_v52 }
 0x547   : > { %1843 = vmax.xlane.f32.xlu1 %v4690_v6 }
 0x54a   : > { %v1766_v13 = vpop.f32.mrb[32].mxu1 }
 0x54b   : > { %1815 = vst [vmem:[%s4683_s8 + $0x10] sm:$0xff] %v1766_v13  ;;  %v3063_v61 = vpop.f32.mrb[33].mxu1  ;;  %v4694_v20 = vmul.f32 14.285714, %v1766_v13 }
 0x54c   : > { %v1769_v58 = vpop.f32.mrb[34].mxu1 }
 0x54d   : > { %1816 = vst [vmem:[%s4683_s8 + $0x18] sm:$0xff] %v1769_v58  ;;  %1845 = vmax.xlane.f32.xlu0 %v4694_v20  ;;  %v3064_v44 = vpop.f32.mrb[35].mxu1  ;;  %v4698_v12 = vmul.f32 14.285714, %v1769_v58 }
 0x54f   : > { %1847 = vmax.xlane.f32.xlu1 %v4698_v12 }
 0x552   : > { %v1774_v48 = vpop.f32.mrb[36].mxu1 }
 0x553   : > { %1817 = vst [vmem:[%s4683_s8 + $0x20] sm:$0xff] %v1774_v48  ;;  %v3067_v19 = vpop.f32.mrb[37].mxu1  ;;  %v4702_v34 = vmul.f32 14.285714, %v1774_v48 }
 0x554   : > { %v1777_v36 = vpop.f32.mrb[38].mxu1 }
 0x555   : > { %1818 = vst [vmem:[%s4683_s8 + $0x28] sm:$0xff] %v1777_v36  ;;  %1849 = vmax.xlane.f32.xlu0 %v4702_v34  ;;  %v3068_v18 = vpop.f32.mrb[39].mxu1  ;;  %v4706_v21 = vmul.f32 14.285714, %v1777_v36 }
 0x557   : > { %1851 = vmax.xlane.f32.xlu1 %v4706_v21 }
 0x55a   : > { %v1782_v17 = vpop.f32.mrb[40].mxu1 }
 0x55b   : > { %1819 = vst [vmem:[%s4683_s8 + $0x30] sm:$0xff] %v1782_v17  ;;  %v3071_v25 = vpop.f32.mrb[41].mxu1  ;;  %v4710_v37 = vmul.f32 14.285714, %v1782_v17 }
 0x55c   : > { %v1785_v26 = vpop.f32.mrb[42].mxu1 }
 0x55d   : > { %1820 = vst [vmem:[%s4683_s8 + $0x38] sm:$0xff] %v1785_v26  ;;  %1853 = vmax.xlane.f32.xlu0 %v4710_v37  ;;  %v3072_v42 = vpop.f32.mrb[43].mxu1  ;;  %v4714_v46 = vmul.f32 14.285714, %v1785_v26 }
 0x55f   : > { %1855 = vmax.xlane.f32.xlu1 %v4714_v46 }
 0x562   : > { %v1790_v29 = vpop.f32.mrb[44].mxu1 }
 0x563   : > { %1821 = vst [vmem:[%s4683_s8 + $0x40] sm:$0xff] %v1790_v29  ;;  %v3075_v32 = vpop.f32.mrb[45].mxu1  ;;  %v4718_v30 = vmul.f32 14.285714, %v1790_v29 }
 0x564   : > { %v1793_v27 = vpop.f32.mrb[46].mxu1 }
 0x565   : > { %1822 = vst [vmem:[%s4683_s8 + $0x48] sm:$0xff] %v1793_v27  ;;  %1857 = vmax.xlane.f32.xlu0 %v4718_v30  ;;  %v3076_v10 = vpop.f32.mrb[47].mxu1  ;;  %v4722_v60 = vmul.f32 14.285714, %v1793_v27 }
 0x567   : > { %1859 = vmax.xlane.f32.xlu1 %v4722_v60 }
 0x56a   : > { %v1798_v22 = vpop.f32.mrb[48].mxu1 }
 0x56b   : > { %1823 = vst [vmem:[%s4683_s8 + $0x50] sm:$0xff] %v1798_v22  ;;  %v3079_v7 = vpop.f32.mrb[49].mxu1  ;;  %v4726_v24 = vmul.f32 14.285714, %v1798_v22 }
 0x56c   : > { %v1801_v41 = vpop.f32.mrb[50].mxu1 }
 0x56d   : > { %1824 = vst [vmem:[%s4683_s8 + $0x58] sm:$0xff] %v1801_v41  ;;  %1861 = vmax.xlane.f32.xlu0 %v4726_v24  ;;  %v3080_v38 = vpop.f32.mrb[51].mxu1  ;;  %v4730_v39 = vmul.f32 14.285714, %v1801_v41 }
 0x56f   : > { %1863 = vmax.xlane.f32.xlu1 %v4730_v39 }
 0x572   : > { %v1806_v43 = vpop.f32.mrb[52].mxu1 }
 0x573   : > { %1825 = vst [vmem:[%s4683_s8 + $0x60] sm:$0xff] %v1806_v43  ;;  %v3083_v45 = vpop.f32.mrb[53].mxu1  ;;  %v4734_v14 = vmul.f32 14.285714, %v1806_v43 }
 0x574   : > { %v1809_v28 = vpop.f32.mrb[54].mxu1 }
 0x575   : > { %1826 = vst [vmem:[%s4683_s8 + $0x68] sm:$0xff] %v1809_v28  ;;  %1865 = vmax.xlane.f32.xlu0 %v4734_v14  ;;  %v3084_v50 = vpop.f32.mrb[55].mxu1  ;;  %v4738_v16 = vmul.f32 14.285714, %v1809_v28 }
 0x577   : > { %1867 = vmax.xlane.f32.xlu1 %v4738_v16 }
 0x5d2   : > { %v1842_v47 = vpop.xlane.xlu0 %1841 }
 0x5d3   : > { %v1869_v11 = vsub.f32 %v4686_v2, %v1842_v47 }
 0x5d4   : > { %v1844_v51 = vpop.xlane.xlu1 %1843 }
 0x5d5   : > { %v1883_v54 = vmul.f32 1.442695, %v1869_v11  ;;  %v1870_v5 = vsub.f32 %v4690_v6, %v1844_v51 }
 0x5d7   : > { %3523 = vpow2.f32 %v1883_v54  ;;  %v1885_v56 = vmul.f32 1.442695, %v1870_v5 }
 0x5d9   : > { %3525 = vpow2.f32 %v1885_v56 }
 0x5da   : > { %v1846_v40 = vpop.xlane.xlu0 %1845 }
 0x5db   : > { %v1871_v57 = vsub.f32 %v4694_v20, %v1846_v40 }
 0x5dc   : > { %v1848_v59 = vpop.xlane.xlu1 %1847 }
 0x5dd   : > { %v1887_v8 = vmul.f32 1.442695, %v1871_v57  ;;  %v1872_v62 = vsub.f32 %v4698_v12, %v1848_v59 }
 0x5df   : > { %3527 = vpow2.f32 %v1887_v8  ;;  %v1889_v63 = vmul.f32 1.442695, %v1872_v62 }
 0x5e1   : > { %v4745_v55 = vpop.eup %3523  ;;  %3529 = vpow2.f32 %v1889_v63 }
 0x5e2   : > { %1911 = vadd.xlane.f32.xlu0 %v4745_v55  ;;  %v1850_v0 = vpop.xlane.xlu0 %1849 }
 0x5e3   : > { %v4748_v49 = vpop.eup %3525  ;;  %v1873_v33 = vsub.f32 %v4702_v34, %v1850_v0 }
 0x5e4   : > { %v1852_v1 = vpop.xlane.xlu1 %1851  ;;  %1913 = vadd.xlane.f32.xlu1 %v4748_v49 }
 0x5e5   : > { %v1891_v2 = vmul.f32 1.442695, %v1873_v33  ;;  %v1874_v52 = vsub.f32 %v4706_v21, %v1852_v1 }
 0x5e7   : > { %3531 = vpow2.f32 %v1891_v2  ;;  %v1893_v4 = vmul.f32 1.442695, %v1874_v52 }
 0x5e9   : > { %v4753_v6 = vpop.eup %3527  ;;  %3533 = vpow2.f32 %v1893_v4 }
 0x5ea   : > { %1915 = vadd.xlane.f32.xlu0 %v4753_v6  ;;  %v1854_v13 = vpop.xlane.xlu0 %1853 }
 0x5eb   : > { %v4756_v61 = vpop.eup %3529  ;;  %v1875_v20 = vsub.f32 %v4710_v37, %v1854_v13 }
 0x5ec   : > { %v1856_v58 = vpop.xlane.xlu1 %1855  ;;  %1917 = vadd.xlane.f32.xlu1 %v4756_v61 }
 0x5ed   : > { %v1895_v44 = vmul.f32 1.442695, %v1875_v20  ;;  %v1876_v12 = vsub.f32 %v4714_v46, %v1856_v58 }
 0x5ef   : > { %3535 = vpow2.f32 %v1895_v44  ;;  %v1897_v48 = vmul.f32 1.442695, %v1876_v12 }
 0x5f1   : > { %v4761_v19 = vpop.eup %3531  ;;  %3537 = vpow2.f32 %v1897_v48 }
 0x5f2   : > { %1919 = vadd.xlane.f32.xlu0 %v4761_v19  ;;  %v1858_v34 = vpop.xlane.xlu0 %1857 }
 0x5f3   : > { %v4764_v36 = vpop.eup %3533  ;;  %v1877_v18 = vsub.f32 %v4718_v30, %v1858_v34 }
 0x5f4   : > { %v1860_v21 = vpop.xlane.xlu1 %1859  ;;  %1921 = vadd.xlane.f32.xlu1 %v4764_v36 }
 0x5f5   : > { %v1899_v17 = vmul.f32 1.442695, %v1877_v18  ;;  %v1878_v25 = vsub.f32 %v4722_v60, %v1860_v21 }
 0x5f7   : > { %3539 = vpow2.f32 %v1899_v17  ;;  %v1901_v37 = vmul.f32 1.442695, %v1878_v25 }
 0x5f9   : > { %v4769_v26 = vpop.eup %3535  ;;  %3541 = vpow2.f32 %v1901_v37 }
 0x5fa   : > { %1923 = vadd.xlane.f32.xlu0 %v4769_v26  ;;  %v1862_v42 = vpop.xlane.xlu0 %1861 }
 0x5fb   : > { %v4772_v46 = vpop.eup %3537  ;;  %v1879_v29 = vsub.f32 %v4726_v24, %v1862_v42 }
 0x5fc   : > { %v1864_v32 = vpop.xlane.xlu1 %1863  ;;  %1925 = vadd.xlane.f32.xlu1 %v4772_v46 }
 0x5fd   : > { %v1903_v30 = vmul.f32 1.442695, %v1879_v29  ;;  %v1880_v27 = vsub.f32 %v4730_v39, %v1864_v32 }
 0x5ff   : > { %3543 = vpow2.f32 %v1903_v30  ;;  %v1905_v10 = vmul.f32 1.442695, %v1880_v27 }
 0x601   : > { %v4777_v60 = vpop.eup %3539  ;;  %3545 = vpow2.f32 %v1905_v10 }
 0x602   : > { %1927 = vadd.xlane.f32.xlu0 %v4777_v60  ;;  %v1866_v22 = vpop.xlane.xlu0 %1865 }
 0x603   : > { %v4780_v7 = vpop.eup %3541  ;;  %v1881_v41 = vsub.f32 %v4734_v14, %v1866_v22 }
 0x604   : > { %1929 = vadd.xlane.f32.xlu1 %v4780_v7  ;;  %v1868_v24 = vpop.xlane.xlu1 %1867 }
 0x605   : > { %v1907_v38 = vmul.f32 1.442695, %v1881_v41  ;;  %v1882_v43 = vsub.f32 %v4738_v16, %v1868_v24 }
 0x607   : > { %3547 = vpow2.f32 %v1907_v38  ;;  %v1909_v39 = vmul.f32 1.442695, %v1882_v43 }
 0x609   : > { %v4785_v45 = vpop.eup %3543  ;;  %3549 = vpow2.f32 %v1909_v39 }
 0x60a   : > { %1931 = vadd.xlane.f32.xlu0 %v4785_v45 }
 0x60b   : > { %v4788_v28 = vpop.eup %3545 }
 0x60c   : > { %1933 = vadd.xlane.f32.xlu1 %v4788_v28 }
 0x611   : > { %v4791_v50 = vpop.eup %3547 }
 0x612   : > { %1935 = vadd.xlane.f32.xlu0 %v4791_v50 }
 0x613   : > { %v4794_v14 = vpop.eup %3549 }
 0x614   : > { %1937 = vadd.xlane.f32.xlu1 %v4794_v14 }
 0x66f   : > { %v1912_v16 = vpop.xlane.xlu0 %1911 }
 0x670   : > { %3551 = vrcp.f32 %v1912_v16 }
 0x671   : > { %v1914_v47 = vpop.xlane.xlu1 %1913 }
 0x672   : > { %3553 = vrcp.f32 %v1914_v47 }
 0x677   : > { %v1916_v11 = vpop.xlane.xlu0 %1915 }
 0x678   : > { %3555 = vrcp.f32 %v1916_v11 }
 0x679   : > { %v1918_v51 = vpop.xlane.xlu1 %1917 }
 0x67a   : > { %v3552_v54 = vpop.eup %3551  ;;  %3557 = vrcp.f32 %v1918_v51 }
 0x67b   : > { %v1953_v5 = vmul.f32 %v3552_v54, %v4745_v55 }
 0x67c   : > { %v3554_v56 = vpop.eup %3553 }
 0x67d   : > { %v1954_v40 = vmul.f32 %v3554_v56, %v4748_v49  ;;  %v1967_v59 = vadd.f32 1e-06, %v1953_v5 }
 0x67f   : > { %v1920_v57 = vpop.xlane.xlu0 %1919  ;;  %v1968_v8 = vadd.f32 1e-06, %v1954_v40 }
 0x680   : > { %3559 = vrcp.f32 %v1920_v57 }
 0x681   : > { %v1922_v62 = vpop.xlane.xlu1 %1921  ;;  %v2202_v63 = vpack.c.bf16 %v1968_v8, %v1967_v59  ;;  %v2024_v58 = vadd.f32 %v1968_v8, %v1967_v59 }
 0x682   : > { %v3556_v0 = vpop.eup %3555  ;;  %3561 = vrcp.f32 %v1922_v62 }
 0x683   : > { %2210 = vxpose.xlu0.c.b16.start [1/4] (short) %v2202_v63, 128  ;;  %v1955_v33 = vmul.f32 %v3556_v0, %v4753_v6 }
 0x684   : > { %v3558_v1 = vpop.eup %3557 }
 0x685   : > { %v1956_v2 = vmul.f32 %v3558_v1, %v4756_v61  ;;  %v1969_v4 = vadd.f32 1e-06, %v1955_v33  ;;  %v1988_v61 = vadd.s32 48, %v4370_v3 }
 0x687   : > { %v1924_v52 = vpop.xlane.xlu0 %1923  ;;  %v1970_v55 = vadd.f32 1e-06, %v1956_v2  ;;  %v2025_v48 = vadd.f32 %v2024_v58, %v1969_v4  ;;  %vm1995_vm2 = vcmp.lt.s32.totalorder %v1988_v61, 49  ;;  %v2179_v61 = vpack.c.bf16 %v4631_v31, %v4626_v15 }
 0x688   : > { %3563 = vrcp.f32 %v1924_v52 }
 0x689   : > { %v1926_v13 = vpop.xlane.xlu1 %1925  ;;  %v2203_v49 = vpack.c.bf16 %v1970_v55, %v1969_v4  ;;  %v2026_v17 = vadd.f32 %v2025_v48, %v1970_v55  ;;  %v2199_v15 = vunpack.c.h.b16 %v2179_v61 }
 0x68a   : > { %v3560_v20 = vpop.eup %3559  ;;  %3565 = vrcp.f32 %v1926_v13 }
 0x68b   : > { %2211 = vxpose.xlu0.c.b16.cont [2/4] (short) %v2203_v49, 128  ;;  %v1957_v44 = vmul.f32 %v3560_v20, %v4761_v19 }
 0x68c   : > { %v3562_v12 = vpop.eup %3561 }
 0x68d   : > { %v1958_v34 = vmul.f32 %v3562_v12, %v4764_v36  ;;  %v1971_v18 = vadd.f32 1e-06, %v1957_v44 }
 0x68f   : > { %v1928_v6 = vpop.xlane.xlu0 %1927  ;;  %v1972_v21 = vadd.f32 1e-06, %v1958_v34  ;;  %v2027_v29 = vadd.f32 %v2026_v17, %v1971_v18 }
 0x690   : > { %3567 = vrcp.f32 %v1928_v6 }
 0x691   : > { %v1930_v25 = vpop.xlane.xlu1 %1929  ;;  %v2204_v37 = vpack.c.bf16 %v1972_v21, %v1971_v18  ;;  %v2028_v10 = vadd.f32 %v2027_v29, %v1972_v21  ;;  %v2180_v29 = vpack.c.bf16 %v4642_v53, %v4639_v9 }
 0x692   : > { %v3564_v42 = vpop.eup %3563  ;;  %3569 = vrcp.f32 %v1930_v25 }
 0x693   : > { %2212 = vxpose.xlu0.c.b16.cont [3/4] (short) %v2204_v37, 128  ;;  %v1959_v32 = vmul.f32 %v3564_v42, %v4769_v26  ;;  %v2198_v42 = vunpack.c.l.b16 %v2179_v61 }
 0x694   : > { %v3566_v30 = vpop.eup %3565 }
 0x695   : > { %v1973_v19 = vadd.f32 1e-06, %v1959_v32  ;;  %v1960_v24 = vmul.f32 %v3566_v30, %v4772_v46  ;;  %v2197_v32 = vunpack.c.h.b16 %v4618_v23  ;;  %v2941_v23 = vpack.c.bf16 %v4642_v53, %v4642_v53 }
 0x697   : > { %v1932_v27 = vpop.xlane.xlu0 %1931  ;;  %v2016_v36 = vsel %vm1995_vm2, %v1973_v19, 0.0  ;;  %v1974_v39 = vadd.f32 1e-06, %v1960_v24  ;;  %v2376_v30 = vpack.c.b16 %v2198_v42, %v2197_v32 }
 0x698   : > { %3571 = vrcp.f32 %v1932_v27  ;;  %v2205_v22 = vpack.c.bf16 %v2016_v36, %v2016_v36  ;;  %v2029_v3 = vadd.f32 %v2028_v10, %v2016_v36  ;;  %v2200_v27 = vunpack.c.l.b16 %v2180_v29 }
 0x699   : > { %v1934_v41 = vpop.xlane.xlu1 %1933  ;;  %v2407_v10 = vsel %vm2258_vm0, %v2941_v23, 0 }
 0x69a   : > { %v3568_v38 = vpop.eup %3567  ;;  %3573 = vrcp.f32 %v1934_v41  ;;  %2213 = vxpose.xlu0.c.b16.end [4/4] (short) %v2205_v22, 128  ;;  %v2030_v26 = vrot.slane %v2029_v3, 4  ;;  %v2377_v36 = vpack.c.b16 %v2200_v27, %v2199_v15 }
 0x69b   : > { %v1961_v43 = vmul.f32 %v3568_v38, %v4777_v60 }
 0x69c   : > { %v3570_v47 = vpop.eup %3569  ;;  %v2031_v54 = vadd.f32 %v2030_v26, %v2029_v3 }
 0x69d   : > { %v1975_v16 = vadd.f32 1e-06, %v1961_v43  ;;  %v1962_v56 = vmul.f32 %v3570_v47, %v4780_v7 }
 0x69e   : > { %v2032_v59 = vrot.slane %v2031_v54, 2 }
 0x69f   : > { %v1936_v11 = vpop.xlane.xlu0 %1935  ;;  %v2206_v51 = vpack.c.bf16 %v1975_v16, %v1974_v39  ;;  %v2036_v8 = vadd.f32 %v1975_v16, %v1974_v39  ;;  %v1976_v60 = vadd.f32 1e-06, %v1962_v56 }
 0x6a0   : > { %3575 = vrcp.f32 %v1936_v11  ;;  %v2033_v33 = vadd.f32 %v2032_v59, %v2031_v54 }
 0x6a1   : > { %v1938_v5 = vpop.xlane.xlu1 %1937  ;;  %2359 = vxpose.xlu1.c.b16.start [1/4] (short) %v2206_v51, 128  ;;  %v2037_v1 = vadd.f32 %v2036_v8, %v1976_v60 }
 0x6a2   : > { %v3572_v40 = vpop.eup %3571  ;;  %3577 = vrcp.f32 %v1938_v5  ;;  %v2034_v13 = vrot.slane %v2033_v33, 1 }
 0x6a3   : > { %v1963_v46 = vmul.f32 %v3572_v40, %v4785_v45 }
 0x6a4   : > { %v3574_v57 = vpop.eup %3573  ;;  %v2035_v12 = vadd.f32 %v2034_v13, %v2033_v33 }
 0x6a5   : > { %v1977_v62 = vadd.f32 1e-06, %v1963_v46  ;;  %v1964_v0 = vmul.f32 %v3574_v57, %v4788_v28 }
 0x6a7   : > { %v2207_v63 = vpack.c.bf16 %v1977_v62, %v1976_v60  ;;  %v2038_v52 = vadd.f32 %v2037_v1, %v1977_v62  ;;  %v1978_v7 = vadd.f32 1e-06, %v1964_v0 }
 0x6a9   : > { %2360 = vxpose.xlu1.c.b16.cont [2/4] (short) %v2207_v63, 128  ;;  %v2039_v20 = vadd.f32 %v2038_v52, %v1978_v7 }
 0x6aa   : > { %v3576_v2 = vpop.eup %3575 }
 0x6ab   : > { %v1965_v4 = vmul.f32 %v3576_v2, %v4791_v50 }
 0x6ac   : > { %v3578_v55 = vpop.eup %3577 }
 0x6ad   : > { %v1979_v49 = vadd.f32 1e-06, %v1965_v4  ;;  %v1966_v45 = vmul.f32 %v3578_v55, %v4794_v14 }
 0x6af   : > { %v2208_v58 = vpack.c.bf16 %v1979_v49, %v1978_v7  ;;  %v1980_v44 = vadd.f32 1e-06, %v1966_v45  ;;  %v2040_v48 = vadd.f32 %v2039_v20, %v1979_v49 }
 0x6b1   : > { %2361 = vxpose.xlu1.c.b16.cont [3/4] (short) %v2208_v58, 128  ;;  %v2023_v28 = vsel %vm1995_vm2, %v1980_v44, 0.0 }
 0x6b2   : > { %v2209_v34 = vpack.c.bf16 %v2023_v28, %v2023_v28  ;;  %v2041_v6 = vadd.f32 %v2040_v48, %v2023_v28 }
 0x6b3   : > { %2049 = vbcast.lane.b32.xlu0 %v2035_v12, 256 }
 0x6b4   : > { %v2042_v50 = vrot.slane %v2041_v6, 4 }
 0x6b5   : > { %2362 = vxpose.xlu1.c.b16.end [4/4] (short) %v2209_v34, 128 }
 0x6b6   : > { %v2043_v18 = vadd.f32 %v2042_v50, %v2041_v6 }
 0x6b7   : > { %2065 = vbcast.lane.b32.xlu0 %v2035_v12, 288 }
 0x6b8   : > { %v2044_v21 = vrot.slane %v2043_v18, 2 }
 0x6ba   : > { %v2045_v14 = vadd.f32 %v2044_v21, %v2043_v18 }
 0x6bb   : > { %2073 = vbcast.lane.b32.xlu0 %v2035_v12, 304 }
 0x6bc   : > { %v2046_v17 = vrot.slane %v2045_v14, 1 }
 0x6be   : > { %v2047_v25 = vadd.f32 %v2046_v17, %v2045_v14 }
 0x6bf   : > { %2081 = vbcast.lane.b32.xlu0 %v2035_v12, 320 }
 0x6c3   : > { %2089 = vbcast.lane.b32.xlu0 %v2035_v12, 336 }
 0x6c7   : > { %2097 = vbcast.lane.b32.xlu0 %v2035_v12, 352 }
 0x6c9   : > { %2053 = vbcast.lane.b32.xlu1 %v2035_v12, 264 }
 0x6cb   : > { %2105 = vbcast.lane.b32.xlu0 %v2035_v12, 368 }
 0x6cd   : > { %2057 = vbcast.lane.b32.xlu1 %v2035_v12, 272 }
 0x6cf   : > { %2112 = vbcast.lane.b32.xlu0 %v2047_v25, 256 }
 0x6d1   : > { %2061 = vbcast.lane.b32.xlu1 %v2035_v12, 280 }
 0x6d3   : > { %2120 = vbcast.lane.b32.xlu0 %v2047_v25, 272 }
 0x6d5   : > { %2069 = vbcast.lane.b32.xlu1 %v2035_v12, 296 }
 0x6d7   : > { %2128 = vbcast.lane.b32.xlu0 %v2047_v25, 288 }
 0x6d9   : > { %2077 = vbcast.lane.b32.xlu1 %v2035_v12, 312 }
 0x6db   : > { %2136 = vbcast.lane.b32.xlu0 %v2047_v25, 304 }
 0x6dd   : > { %2085 = vbcast.lane.b32.xlu1 %v2035_v12, 328 }
 0x6df   : > { %2144 = vbcast.lane.b32.xlu0 %v2047_v25, 320 }
 0x6e1   : > { %2093 = vbcast.lane.b32.xlu1 %v2035_v12, 344 }
 0x6e3   : > { %2152 = vbcast.lane.b32.xlu0 %v2047_v25, 336 }
 0x6e5   : > { %2101 = vbcast.lane.b32.xlu1 %v2035_v12, 360 }
 0x6e7   : > { %2160 = vbcast.lane.b32.xlu0 %v2047_v25, 352 }
 0x6e9   : > { %2109 = vbcast.lane.b32.xlu1 %v2035_v12, 376 }
 0x6eb   : > { %2168 = vbcast.lane.b32.xlu0 %v2047_v25, 368 }
 0x6ed   : > { %2116 = vbcast.lane.b32.xlu1 %v2047_v25, 264 }
 0x6f1   : > { %2124 = vbcast.lane.b32.xlu1 %v2047_v25, 280 }
 0x6f4   : > { %v2218_v37 = vpop.trf.xlu0 }
 0x6f5   : > { %2132 = vbcast.lane.b32.xlu1 %v2047_v25, 296  ;;  %3093 = vmatprep.mubr.msk.bf16.mxu0 %vm2233_vm3, %v2218_v37 }
 0x6f8   : > { %v2219_v19 = vpop.trf.xlu0 }
 0x6f9   : > { %2140 = vbcast.lane.b32.xlu1 %v2047_v25, 312  ;;  %3094 = vmatmul.mubr.msk.bf16.vlgmr.msra.gmra.mrb[56].mxu0 %vm2233_vm3, %v2219_v19 }
 0x6fa   : > { %3110 = vmatpush3.bf16.msra.mxu0 %v4628_v35 }
 0x6fb   : > { %3111 = vmatprep.subr.bf16.mxu0 %v2376_v30 }
 0x6fc   : > { %v2220_v31 = vpop.trf.xlu0 }
 0x6fd   : > { %2148 = vbcast.lane.b32.xlu1 %v2047_v25, 328  ;;  %3097 = vmatprep.mubr.msk.bf16.mxu0 %vm2233_vm3, %v2220_v31 }
 0x6fe   : > { %3112 = vmatpush3.bf16.msra.mxu0 %v2376_v30 }
 0x6ff   : > { %3113 = vmatprep.subr.bf16.mxu0 %v2377_v36 }
 0x700   : > { %v2221_v9 = vpop.trf.xlu0 }
 0x701   : > { %2156 = vbcast.lane.b32.xlu1 %v2047_v25, 344  ;;  %3098 = vmatmul.mubr.msk.bf16.gmra.mrb[60].mxu0 %vm2233_vm3, %v2221_v9 }
 0x702   : > { %3114 = vmatpush3.bf16.msra.mxu0 %v2377_v36 }
 0x703   : > { %3143 = vmatprep.subr.msk.bf16.mxu0 %vm2258_vm0, %v2941_v23 }
 0x704   : > { %v2222_v35 = vpop.trf.xlu0 }
 0x705   : > { %2164 = vbcast.lane.b32.xlu1 %v2047_v25, 360  ;;  %3101 = vmatprep.mubr.msk.bf16.mxu1 %vm2233_vm3, %v2222_v35 }
 0x706   : > { %3116 = vmatpush3.bf16.msra.mxu0 %v2407_v10 }
 0x708   : > { %v2223_v22 = vpop.trf.xlu0 }
 0x709   : > { %2172 = vbcast.lane.b32.xlu1 %v2047_v25, 376  ;;  %3102 = vmatmul.mubr.msk.bf16.vlgmr.msra.gmra.mrb[56].mxu1 %vm2233_vm3, %v2223_v22 }
 0x70c   : > { %v2224_v41 = vpop.trf.xlu0 }
 0x70d   : > { %3105 = vmatprep.mubr.msk.bf16.mxu1 %vm2233_vm3, %v2224_v41 }
 0x70f   : > { %v2367_v3 = vpop.trf.xlu1 }
 0x710   : > { %3117 = vmatprep.mubr.msk.bf16.mxu0 %vm2233_vm3, %v2367_v3  ;;  %v2225_v53 = vpop.trf.xlu0 }
 0x711   : > { %3106 = vmatmul.mubr.msk.bf16.gmra.mrb[60].mxu1 %vm2233_vm3, %v2225_v53 }
 0x713   : > { %v2368_v24 = vpop.trf.xlu1 }
 0x714   : > { %3118 = vmatmul.mubr.msk.bf16.vlgmr.msra.gmra.mrb[64].mxu0 %vm2233_vm3, %v2368_v24 }
 0x717   : > { %v2369_v38 = vpop.trf.xlu1 }
 0x718   : > { %3121 = vmatprep.mubr.msk.bf16.mxu0 %vm2233_vm3, %v2369_v38 }
 0x71b   : > { %v2370_v43 = vpop.trf.xlu1 }
 0x71c   : > { %3122 = vmatmul.mubr.msk.bf16.gmra.mrb[68].mxu0 %vm2233_vm3, %v2370_v43 }
 0x71f   : > { %v2371_v26 = vpop.trf.xlu1 }
 0x720   : > { %3125 = vmatprep.mubr.msk.bf16.mxu0 %vm2233_vm3, %v2371_v26 }
 0x723   : > { %v2372_v39 = vpop.trf.xlu1 }
 0x724   : > { %3126 = vmatmul.mubr.msk.bf16.gmra.mrb[72].mxu0 %vm2233_vm3, %v2372_v39 }
 0x727   : > { %v2373_v16 = vpop.trf.xlu1 }
 0x728   : > { %3129 = vmatprep.mubr.msk.bf16.mxu0 %vm2233_vm3, %v2373_v16 }
 0x72b   : > { %v2374_v47 = vpop.trf.xlu1 }
 0x72c   : > { %3130 = vmatmul.mubr.msk.bf16.gmra.mrb[76].mxu0 %vm2233_vm3, %v2374_v47 }
 0x72d   : > { %3882 = shalt.err (!%p3879_p10)
}
 0x72e   : > { %s3883_s13 = scalar_lea.hbm %s4844_s23, 1792  ;;  %s3887_s8 = scalar_lea.hbm %s4980_s9, 3584 }
 0x72f   : > { %p3884_p11 = scmp.ne.s32.totalorder %s4844_s23, %s3883_s13  ;;  %p3888_p9 = scmp.lt.u32.totalorder %s4844_s23, %s4980_s9 }
 0x730   : > { %p3889_p7 = scmp.lt.u32.totalorder %s3887_s8, %s3883_s13  ;;  %p3891_p12 = scmp.lt.u32.totalorder %s3883_s13, %s4844_s23 }
 0x731   : > { %p3885_p0 = pnand %p3884_p11, %p5011_p13 }
 0x732   : > { %p3890_p4 = por %p3889_p7, %p3888_p9 }
 0x733   : > { %p3886_p5 = pneg %p3885_p0 }
 0x734   : > { %p3892_p1 = por %p3891_p12, %p3890_p4 }
 0x736   : > { %p3893_p3 = pnand %p3892_p1, %p3886_p5 }
 0x738   : > { %3896 = shalt.err (!%p3893_p3)
}
 0x739   : > { %s4001_s19 = smov 128   ;;  %s4002_s17 = smov 8   ;;  %v2050_v54 = vpop.permute.xlu0 %2049 }
 0x73a   : > { %3180 = dma.vmem_to_hbm [thread:$0]  (%p5011_p13), %s4847_s24, 1792, %s4844_s23, %s2608_s25, %s4001_s19, %s4001_s19, %s4002_s17  }
 0x73b   : > { %v2054_v11 = vpop.permute.xlu1 %2053  ;;  %s2832_s23 = sshll.u32 %s4330_s28, 8  ;;  %s2943_s25 = sshll.u32 %s4075_s15, 12 }
 0x73c   : > { %s4881_s24 = scalar_lea.vmem [#allocation16], %s2832_s23  ;;  %s5012_s13 = sld [smem:[#allocation28_spill]] }
 0x73d   : > { %v2066_v56 = vpop.permute.xlu0 %2065  ;;  %s2622_s20 = sshll.u32 %s4881_s24, 4  ;;  %s2603_s15 = scalar_lea.sflag [#allocation4], %s4330_s28  ;;  %s4922_s20 = int_to_ptr.vmem [resolvable:$true] %s2622_s20 }
 0x73e   : > { %s3897_s16 = scalar_lea.vmem %s4922_s20, 4096  ;;  %s4003_s8 = smov [#allocation16]  }
 0x73f   : > { %v2058_v51 = vpop.permute.xlu1 %2057  ;;  %p3898_p2 = scmp.ne.s32.totalorder %s4922_s20, %s3897_s16  ;;  %s3901_s26 = sshll.u32 %s4003_s8, 4  ;;  %s3902_s26 = int_to_ptr.vmem [resolvable:$false] %s3901_s26 }
 0x740   : > { %3579 = vrcp.f32 %v2058_v51  ;;  %s3903_s14 = scalar_lea.vmem %s3902_s26, 8192  ;;  %p3904_p10 = scmp.lt.s32.totalorder %s4922_s20, %s3902_s26 }
 0x741   : > { %v2074_v46 = vpop.permute.xlu0 %2073  ;;  %3581 = vrcp.f32 %v2050_v54  ;;  %p3899_p8 = pnand %p3898_p2, %p5011_p13  ;;  %p3905_p11 = scmp.lt.s32.totalorder %s3903_s14, %s3897_s16 }
 0x742   : > { %s4920_s3 = scalar_lea.hbm %s5012_s13, %s2943_s25 }
 0x743   : > { %v2062_v5 = vpop.permute.xlu1 %2061  ;;  %p3900_p6 = pneg %p3899_p8  ;;  %p3906_p0 = por %p3905_p11, %p3904_p10 }
 0x744   : > { %3583 = vrcp.f32 %v2062_v5 }
 0x745   : > { %v2082_v59 = vpop.permute.xlu0 %2081  ;;  %3585 = vrcp.f32 %v2054_v11  ;;  %p3907_p5 = pnand %p3906_p0, %p3900_p6 }
 0x746   : > { %3587 = vrcp.f32 %v2074_v46 }
 0x747   : > { %v2070_v40 = vpop.permute.xlu1 %2069  ;;  %3589 = vrcp.f32 %v2066_v56 }
 0x749   : > { %v2090_v60 = vpop.permute.xlu0 %2089 }
 0x74a   : > { %v3580_v4 = vpop.eup %3579 }
 0x74b   : > { %v2078_v57 = vpop.permute.xlu1 %2077  ;;  %v3582_v55 = vpop.eup %3581 }
 0x74c   : > { %3591 = vrcp.f32 %v2078_v57 }
 0x74d   : > { %v2098_v63 = vpop.permute.xlu0 %2097  ;;  %3593 = vrcp.f32 %v2070_v40 }
 0x74e   : > { %v3584_v45 = vpop.eup %3583  ;;  %3595 = vrcp.f32 %v2090_v60 }
 0x74f   : > { %v2086_v8 = vpop.permute.xlu1 %2085  ;;  %v3586_v12 = vpop.eup %3585  ;;  %3597 = vrcp.f32 %v2082_v59 }
 0x750   : > { %v3588_v50 = vpop.eup %3587 }
 0x751   : > { %v2106_v33 = vpop.permute.xlu0 %2105  ;;  %v3590_v14 = vpop.eup %3589 }
 0x753   : > { %v2094_v62 = vpop.permute.xlu1 %2093 }
 0x754   : > { %3599 = vrcp.f32 %v2094_v62 }
 0x755   : > { %v2113_v2 = vpop.permute.xlu0 %2112  ;;  %3601 = vrcp.f32 %v2086_v8 }
 0x756   : > { %v3592_v61 = vpop.eup %3591  ;;  %3603 = vrcp.f32 %v2098_v63 }
 0x757   : > { %v4876_v0 = vpop.permute.xlu1 %2101  ;;  %v3594_v32 = vpop.eup %3593  ;;  %3605 = vrcp.f32 %v2106_v33 }
 0x758   : > { %v3596_v31 = vpop.eup %3595 }
 0x759   : > { %v2121_v20 = vpop.permute.xlu0 %2120  ;;  %v3598_v23 = vpop.eup %3597 }
 0x75a   : > { %3607 = vrcp.f32 %v2121_v20 }
 0x75b   : > { %v2110_v1 = vpop.permute.xlu1 %2109 }
 0x75c   : > { %3609 = vrcp.f32 %v2110_v1 }
 0x75d   : > { %v2129_v18 = vpop.permute.xlu0 %2128  ;;  %3611 = vrcp.f32 %v4876_v0 }
 0x75e   : > { %v3600_v22 = vpop.eup %3599  ;;  %3613 = vrcp.f32 %v2113_v2 }
 0x75f   : > { %v4879_v52 = vpop.permute.xlu1 %2116  ;;  %v3602_v53 = vpop.eup %3601 }
 0x760   : > { %v3604_v16 = vpop.eup %3603 }
 0x761   : > { %v2137_v15 = vpop.permute.xlu0 %2136  ;;  %v3606_v47 = vpop.eup %3605 }
 0x763   : > { %v2125_v34 = vpop.permute.xlu1 %2124 }
 0x764   : > { %3615 = vrcp.f32 %v2125_v34  ;;  %v3608_v51 = vpop.eup %3607 }
 0x765   : > { %v2145_v43 = vpop.permute.xlu0 %2144  ;;  %3617 = vrcp.f32 %v4879_v52 }
 0x766   : > { %3619 = vrcp.f32 %v2137_v15  ;;  %v3610_v56 = vpop.eup %3609 }
 0x767   : > { %v2133_v37 = vpop.permute.xlu1 %2132  ;;  %3621 = vrcp.f32 %v2129_v18  ;;  %v3612_v59 = vpop.eup %3611 }
 0x768   : > { %v3614_v63 = vpop.eup %3613 }
 0x769   : > { %v2153_v40 = vpop.permute.xlu0 %2152 }
 0x76b   : > { %v2141_v36 = vpop.permute.xlu1 %2140 }
 0x76c   : > { %3623 = vrcp.f32 %v2141_v36 }
 0x76d   : > { %3625 = vrcp.f32 %v2133_v37  ;;  %v2161_v20 = vpop.permute.xlu0 %2160 }
 0x76e   : > { %v3616_v52 = vpop.eup %3615  ;;  %3627 = vrcp.f32 %v2153_v40 }
 0x76f   : > { %v2149_v39 = vpop.permute.xlu1 %2148  ;;  %3629 = vrcp.f32 %v2145_v43 }
 0x773   : > { %v2157_v0 = vpop.permute.xlu1 %2156 }
 0x774   : > { %3631 = vrcp.f32 %v2157_v0 }
 0x775   : > { %3633 = vrcp.f32 %v2149_v39 }
 0x7cc   : > { %v3095_v7 = vpop.f32.mrb[56].mxu0 }
 0x7cd   : > { %v2540_v13 = vmul.f32 %v3580_v4, %v3095_v7  ;;  %v2296_v49 = vpop.f32.mrb[57].mxu0 }
 0x7ce   : > { %v2538_v58 = vmul.f32 %v3582_v55, %v2296_v49  ;;  %v3096_v44 = vpop.f32.mrb[58].mxu0  ;;  %v3618_v55 = vpop.eup %3617 }
 0x7cf   : > { %2572 = vst [vmem:[%s4881_s24 + $0x10] sm:$0xff] %v2540_v13  ;;  %v2541_v28 = vmul.f32 %v3584_v45, %v3096_v44  ;;  %v2299_v48 = vpop.f32.mrb[59].mxu0  ;;  %v3620_v44 = vpop.eup %3619 }
 0x7d0   : > { %2570 = vst [vmem:[%s4881_s24] sm:$0xff] %v2538_v58  ;;  %v2539_v6 = vmul.f32 %v3586_v12, %v2299_v48  ;;  %v2165_v58 = vpop.permute.xlu1 %2164 }
 0x7d1   : > { %2573 = vst [vmem:[%s4881_s24 + $0x18] sm:$0xff] %v2541_v28  ;;  %v3622_v28 = vpop.eup %3621 }
 0x7d2   : > { %2571 = vst [vmem:[%s4881_s24 + $0x8] sm:$0xff] %v2539_v6  ;;  %v3624_v6 = vpop.eup %3623 }
 0x7d4   : > { %v3099_v21 = vpop.f32.mrb[60].mxu0  ;;  %v2173_v37 = vpop.permute.xlu1 %2172 }
 0x7d5   : > { %v2544_v17 = vmul.f32 %v3588_v50, %v3099_v21  ;;  %v2312_v25 = vpop.f32.mrb[61].mxu0  ;;  %v3626_v21 = vpop.eup %3625 }
 0x7d6   : > { %v2542_v42 = vmul.f32 %v3590_v14, %v2312_v25  ;;  %v3100_v29 = vpop.f32.mrb[62].mxu0  ;;  %v2169_v14 = vpop.permute.xlu0 %2168 }
 0x7d7   : > { %2576 = vst [vmem:[%s4881_s24 + $0x30] sm:$0xff] %v2544_v17  ;;  %v2545_v19 = vmul.f32 %v3592_v61, %v3100_v29  ;;  %v2315_v30 = vpop.f32.mrb[63].mxu0  ;;  %3635 = vrcp.f32 %v2169_v14 }
 0x7d8   : > { %2574 = vst [vmem:[%s4881_s24 + $0x20] sm:$0xff] %v2542_v42  ;;  %v2543_v27 = vmul.f32 %v3594_v32, %v2315_v30  ;;  %3637 = vrcp.f32 %v2161_v20  ;;  %v3628_v42 = vpop.eup %3627 }
 0x7d9   : > { %2577 = vst [vmem:[%s4881_s24 + $0x38] sm:$0xff] %v2545_v19  ;;  %3639 = vrcp.f32 %v2173_v37  ;;  %v3630_v32 = vpop.eup %3629 }
 0x7da   : > { %2575 = vst [vmem:[%s4881_s24 + $0x28] sm:$0xff] %v2543_v27  ;;  %3641 = vrcp.f32 %v2165_v58  ;;  %v3632_v27 = vpop.eup %3631 }
 0x7db   : > { %v3634_v36 = vpop.eup %3633 }
 0x7dc   : > { %v3103_v9 = vpop.f32.mrb[56].mxu1 }
 0x7dd   : > { %v2548_v35 = vmul.f32 %v3596_v31, %v3103_v9  ;;  %v2328_v10 = vpop.f32.mrb[57].mxu1 }
 0x7de   : > { %v2546_v41 = vmul.f32 %v3598_v23, %v2328_v10  ;;  %v3104_v3 = vpop.f32.mrb[58].mxu1 }
 0x7df   : > { %2580 = vst [vmem:[%s4881_s24 + $0x50] sm:$0xff] %v2548_v35  ;;  %v2549_v24 = vmul.f32 %v3600_v22, %v3104_v3  ;;  %v2331_v38 = vpop.f32.mrb[59].mxu1 }
 0x7e0   : > { %2578 = vst [vmem:[%s4881_s24 + $0x40] sm:$0xff] %v2546_v41  ;;  %v2547_v26 = vmul.f32 %v3602_v53, %v2331_v38 }
 0x7e1   : > { %2581 = vst [vmem:[%s4881_s24 + $0x58] sm:$0xff] %v2549_v24  ;;  %v3636_v10 = vpop.eup %3635 }
 0x7e2   : > { %2579 = vst [vmem:[%s4881_s24 + $0x48] sm:$0xff] %v2547_v26  ;;  %v3638_v41 = vpop.eup %3637 }
 0x7e3   : > { %v3640_v24 = vpop.eup %3639 }
 0x7e4   : > { %v3107_v11 = vpop.f32.mrb[60].mxu1  ;;  %v3642_v26 = vpop.eup %3641 }
 0x7e5   : > { %v2552_v54 = vmul.f32 %v3606_v47, %v3107_v11  ;;  %v2344_v5 = vpop.f32.mrb[61].mxu1 }
 0x7e6   : > { %v2550_v46 = vmul.f32 %v3604_v16, %v2344_v5  ;;  %v3108_v57 = vpop.f32.mrb[62].mxu1 }
 0x7e7   : > { %2584 = vst [vmem:[%s4881_s24 + $0x70] sm:$0xff] %v2552_v54  ;;  %v2553_v8 = vmul.f32 %v3610_v56, %v3108_v57  ;;  %v2347_v60 = vpop.f32.mrb[63].mxu1  ;;  %v3119_v62 = vpop.f32.mrb[64].mxu0 }
 0x7e8   : > { %2582 = vst [vmem:[%s4881_s24 + $0x60] sm:$0xff] %v2550_v46  ;;  %v2551_v33 = vmul.f32 %v3612_v59, %v2347_v60  ;;  %v2556_v1 = vmul.f32 %v3608_v51, %v3119_v62  ;;  %v2443_v2 = vpop.f32.mrb[65].mxu0 }
 0x7e9   : > { %2585 = vst [vmem:[%s4881_s24 + $0x78] sm:$0xff] %v2553_v8  ;;  %v2554_v4 = vmul.f32 %v3614_v63, %v2443_v2  ;;  %v3120_v7 = vpop.f32.mrb[66].mxu0 }
 0x7ea   : > { %2583 = vst [vmem:[%s4881_s24 + $0x68] sm:$0xff] %v2551_v33  ;;  %2588 = vst [vmem:[%s4881_s24 + $0x90] sm:$0xff] %v2556_v1  ;;  %v2557_v13 = vmul.f32 %v3616_v52, %v3120_v7  ;;  %v2446_v49 = vpop.f32.mrb[67].mxu0 }
 0x7eb   : > { %2586 = vst [vmem:[%s4881_s24 + $0x80] sm:$0xff] %v2554_v4  ;;  %v2555_v45 = vmul.f32 %v3618_v55, %v2446_v49 }
 0x7ec   : > { %2589 = vst [vmem:[%s4881_s24 + $0x98] sm:$0xff] %v2557_v13 }
 0x7ed   : > { %2587 = vst [vmem:[%s4881_s24 + $0x88] sm:$0xff] %v2555_v45 }
 0x7ef   : > { %v3123_v12 = vpop.f32.mrb[68].mxu0 }
 0x7f0   : > { %v2560_v48 = vmul.f32 %v3620_v44, %v3123_v12  ;;  %v2459_v34 = vpop.f32.mrb[69].mxu0 }
 0x7f1   : > { %v2558_v50 = vmul.f32 %v3622_v28, %v2459_v34  ;;  %v3124_v18 = vpop.f32.mrb[70].mxu0 }
 0x7f2   : > { %2592 = vst [vmem:[%s4881_s24 + $0xb0] sm:$0xff] %v2560_v48  ;;  %v2561_v17 = vmul.f32 %v3624_v6, %v3124_v18  ;;  %v2462_v25 = vpop.f32.mrb[71].mxu0 }
 0x7f3   : > { %2590 = vst [vmem:[%s4881_s24 + $0xa0] sm:$0xff] %v2558_v50  ;;  %v2559_v61 = vmul.f32 %v3626_v21, %v2462_v25 }
 0x7f4   : > { %2593 = vst [vmem:[%s4881_s24 + $0xb8] sm:$0xff] %v2561_v17 }
 0x7f5   : > { %2591 = vst [vmem:[%s4881_s24 + $0xa8] sm:$0xff] %v2559_v61 }
 0x7f7   : > { %v3127_v29 = vpop.f32.mrb[72].mxu0 }
 0x7f8   : > { %v2564_v19 = vmul.f32 %v3628_v42, %v3127_v29  ;;  %v2475_v30 = vpop.f32.mrb[73].mxu0 }
 0x7f9   : > { %v2562_v15 = vmul.f32 %v3630_v32, %v2475_v30  ;;  %v3128_v31 = vpop.f32.mrb[74].mxu0 }
 0x7fa   : > { %2596 = vst [vmem:[%s4881_s24 + $0xd0] sm:$0xff] %v2564_v19  ;;  %v2565_v9 = vmul.f32 %v3632_v27, %v3128_v31  ;;  %v2478_v23 = vpop.f32.mrb[75].mxu0 }
 0x7fb   : > { %2594 = vst [vmem:[%s4881_s24 + $0xc0] sm:$0xff] %v2562_v15  ;;  %v2563_v35 = vmul.f32 %v3634_v36, %v2478_v23 }
 0x7fc   : > { %2597 = vst [vmem:[%s4881_s24 + $0xd8] sm:$0xff] %v2565_v9 }
 0x7fd   : > { %2595 = vst [vmem:[%s4881_s24 + $0xc8] sm:$0xff] %v2563_v35 }
 0x7ff   : > { %v3131_v22 = vpop.f32.mrb[76].mxu0 }
 0x800   : > { %v2568_v3 = vmul.f32 %v3636_v10, %v3131_v22  ;;  %v2491_v53 = vpop.f32.mrb[77].mxu0 }
 0x801   : > { %v2566_v38 = vmul.f32 %v3638_v41, %v2491_v53  ;;  %v3132_v43 = vpop.f32.mrb[78].mxu0 }
 0x802   : > { %2600 = vst [vmem:[%s4881_s24 + $0xf0] sm:$0xff] %v2568_v3  ;;  %v2569_v39 = vmul.f32 %v3640_v24, %v3132_v43  ;;  %v2494_v16 = vpop.f32.mrb[79].mxu0 }
 0x803   : > { %2598 = vst [vmem:[%s4881_s24 + $0xe0] sm:$0xff] %v2566_v38  ;;  %v2567_v47 = vmul.f32 %v3642_v26, %v2494_v16 }
 0x804   : > { %2601 = vst [vmem:[%s4881_s24 + $0xf8] sm:$0xff] %v2569_v39 }
 0x805   : > { %2599 = vst [vmem:[%s4881_s24 + $0xe8] sm:$0xff] %v2567_v47 }
 0x806   : > { %3910 = shalt.err (!%p3907_p5)
}
 0x807   : > { %s3911_s23 = scalar_lea.hbm %s4920_s3, 4096  ;;  %s3915_s18 = scalar_lea.hbm %s5012_s13, 8192 }
 0x808   : > { %p3912_p9 = scmp.ne.s32.totalorder %s4920_s3, %s3911_s23  ;;  %p3916_p12 = scmp.lt.u32.totalorder %s4920_s3, %s5012_s13 }
 0x809   : > { %p3917_p1 = scmp.lt.u32.totalorder %s3915_s18, %s3911_s23  ;;  %p3919_p2 = scmp.lt.u32.totalorder %s3911_s23, %s4920_s3 }
 0x80a   : > { %p3913_p7 = pnand %p3912_p9, %p5011_p13 }
 0x80b   : > { %p3918_p3 = por %p3917_p1, %p3916_p12 }
 0x80c   : > { %p3914_p4 = pneg %p3913_p7 }
 0x80d   : > { %p3920_p8 = por %p3919_p2, %p3918_p3 }
 0x80f   : > { %p3921_p6 = pnand %p3920_p8, %p3914_p4 }
 0x811   : > { %3924 = shalt.err (!%p3921_p6)
}
 0x812   : > { %3179 = dma.vmem_to_hbm [thread:$0]  (%p5011_p13), %s4922_s20, 4096, %s4920_s3, %s2603_s15, %s4001_s19, %s4001_s19, %s4002_s17  }
 0x813 PF: > { %s2654_s16 = sand.u32 1, %s3971_s30   ;;  %p5013_p10 = scmp.ne.s32.totalorder %s4998_s22, 0 }
 0x814   : > { %p5014_p11 = scmp.ge.s32.totalorder %s3983_s12, 2  ;;  %s2655_s26 = scalar_lea.sflag [#allocation4], %s2654_s16 }
 0x816   : > { %p3210_p0 = pnand %p5014_p11, %p5013_p10 }
 0x818   : > { %3962 = dma.done.wait (!%p3210_p0), %s2655_s26, 4096  }
 0x819   : > { %3964 = vsyncadd (!%p3210_p0), %s2655_s26, 4294963200  ;;  %s2664_s1 = scalar_lea.sflag [#allocation18], %s2654_s16 }
 0x81a   : > { %3966 = dma.done.wait (!%p3210_p0), %s2664_s1, 1792  }
 0x81b   : > { %3968 = vsyncadd (!%p3210_p0), %s2664_s1, 4294965504  ;;  %p30_p13 = scmp.ge.s32.totalorder %s4254_s27, 4   ;;  %s5015_s30 = smov %s3975_s10 }
 0x81c   : > { %s5016_s10 = smov %s3979_s11  ;;  %s5017_s11 = smov %s4266_s21 }
 0x81d   : > { %s5018_s12 = smov %s4254_s27  ;;  %32 = sbr.rel (!%p30_p13) target bundleno = 15 (0xf), region = 142 }
 0x824   :  { %2669 = vsyncpa [#allocation3], 1 }
 0x825   :  { %2671 = vsyncpa [#allocation3 + $0x1], 1 }
 0x826   :  { %2672 = vsyncpa [#allocation6], 1 }
 0x827   :  { %2673 = vsyncpa [#allocation9], 1 }
 0x828   :  { %2674 = vsyncpa [#allocation12], 1 }
 0x829   :  { %2675 = vsyncpa [#allocation15], 1 }
 0x82a   :  { %2676 = vsyncpa [#allocation4], 1 }
 0x82b   :  { %2678 = vsyncpa [#allocation4 + $0x1], 1 }
 0x82c   :  { %2679 = vsyncpa [#allocation18], 1 }
 0x82d   :  { %2681 = vsyncpa [#allocation18 + $0x1], 1 }

// kernel: tpu_custom_call.1
= control target key start
LH: loop header
LB: loop body
LE: loop exit
PB: predicated region body
PF: predicated region fallthrough
CT: control target
= control target key end

     0   :  { %s4971_s0 = inlined_call_operand.hbm [shape: bf16[4,56,128], index: 0, kind: input, shape index: {}]   ;;  %s4972_s1 = inlined_call_operand.hbm [shape: bf16[128,256], index: 1, kind: input, shape index: {}]   ;;  %s4973_s2 = inlined_call_operand.hbm [shape: f32[1,256], index: 2, kind: input, shape index: {}]   ;;  %s4974_s3 = inlined_call_operand.hbm [shape: bf16[256,256], index: 3, kind: input, shape index: {}]   ;;  %s4975_s4 = inlined_call_operand.hbm [shape: f32[1,256], index: 4, kind: input, shape index: {}]   ;;  %s4976_s5 = inlined_call_operand.hbm [shape: bf16[256,128], index: 5, kind: input, shape index: {}]   ;;  %s4977_s6 = inlined_call_operand.hbm [shape: f32[1,128], index: 6, kind: input, shape index: {}]   ;;  %s4978_s7 = inlined_call_operand.hbm [shape: bf16[128,128], index: 7, kind: input, shape index: {}]   ;;  %s4979_s8 = inlined_call_operand.hbm [shape: f32[4,128,128], index: 8, kind: output, shape index: {0}]   ;;  %s4980_s9 = inlined_call_operand.hbm [shape: f32[4,56,128], index: 9, kind: output, shape index: {1}]  }
   0x1   :  { %4987 = sst [smem:[#allocation26_spill]] %s4972_s1 }
   0x2   :  { %4988 = sst [smem:[#allocation27_spill]] %s4974_s3 }
   0x3   :  { %4989 = sst [smem:[#allocation28_spill]] %s4979_s8 }
   0x4   :  { %15 = vsyncpa [#allocation3], 0 }
   0x5   :  { %17 = vsyncpa [#allocation3 + $0x1], 0 }
   0x6   :  { %18 = vsyncpa [#allocation6], 0 }
   0x7   :  { %19 = vsyncpa [#allocation9], 0 }
   0x8   :  { %20 = vsyncpa [#allocation12], 0 }
   0x9   :  { %21 = vsyncpa [#allocation15], 0 }
   0xa   :  { %22 = vsyncpa [#allocation4], 0 }
   0xb   :  { %24 = vsyncpa [#allocation4 + $0x1], 0 }
   0xc   :  { %25 = vsyncpa [#allocation18], 0 }
   0xd   :  { %27 = vsyncpa [#allocation18 + $0x1], 0  ;;  %s4054_s30 = smov 0   ;;  %s4056_s10 = smov 0  }
   0xe   :  { %s4058_s11 = smov 0   ;;  %s4060_s12 = smov 0  }
   0xf LB: > { %s3985_s13 = smov [#allocation5]   ;;  %s4075_s15 = sadd.s32 4294967295, %s3983_s12   ;;  %s3983_s12 = sphi %s4060_s12, %s5018_s12   ;;  %s3979_s11 = sphi %s4058_s11, %s5017_s11   ;;  %s3975_s10 = sphi %s4056_s10, %s5016_s10   ;;  %s3971_s30 = sphi %s4054_s30, %s5015_s30  }
  0x10   : > { %s275_s14 = sshll.u32 %s3985_s13, 4  ;;  %p2812_p0 = scmp.ge.s32.totalorder %s3983_s12, 1  ;;  %s4080_s14 = int_to_ptr.vmem [resolvable:$true] %s275_s14 }
  0x11   : > { %p4982_p1 = scmp.eq.s32.totalorder %s4075_s15, 0  ;;  %p263_p2 = scmp.lt.s32.totalorder %s3983_s12, 3 }
  0x12   : > { %s3986_s17 = smov [#allocation8]   ;;  %s3987_s20 = smov [#allocation11]  }
  0x13   : > { %p4082_p3 = pnand %p2812_p0, %p263_p2  ;;  %s299_s18 = sshll.u32 %s3986_s17, 4  ;;  %s4095_s18 = int_to_ptr.vmem [resolvable:$true] %s299_s18 }
  0x14   : > { %s323_s21 = sshll.u32 %s3987_s20, 4  ;;  %s4992_s1 = sld [smem:[#allocation26_spill]]  ;;  %s4097_s21 = int_to_ptr.vmem [resolvable:$true] %s323_s21 }
  0x15   : > { %s4990_s16 = scalar_select %p4082_p3, 1, 0 }
  0x16   : > { %p3183_p5 = pneg %p4082_p3 }
  0x18   : > { %p4091_p6 = pnand %p3183_p5, %p4982_p1 }
  0x1a   : > { %s3643_s24 = scalar_lea.hbm %s4992_s1, 2048  ;;  %p4107_p8 = pneg %p4091_p6 }
  0x1b   : > { %p3644_p7 = scmp.ne.s32.totalorder %s4992_s1, %s3643_s24  ;;  %p3650_p11 = scmp.lt.u32.totalorder %s3643_s24, %s4992_s1 }
  0x1d   : > { %p3646_p9 = pnand %p4107_p8, %p3644_p7 }
  0x1f   : > { %p3647_p10 = pneg %p3646_p9 }
  0x21   : > { %p3652_p12 = pnand %p3650_p11, %p3647_p10 }
  0x23   : > { %3655 = shalt.err (!%p3652_p12)
}
  0x24   : > { %s3656_s13 = scalar_lea.vmem %s4080_s14, 2048  ;;  %p3664_p5 = scmp.lt.s32.totalorder %s4080_s14, %s4080_s14 }
  0x25   : > { %p3657_p13 = scmp.ne.s32.totalorder %s4080_s14, %s3656_s13  ;;  %p3665_p4 = scmp.lt.s32.totalorder %s3656_s13, %s3656_s13 }
  0x27   : > { %p3659_p0 = pnand %p3657_p13, %p4107_p8  ;;  %p3666_p7 = por %p3665_p4, %p3664_p5 }
  0x29   : > { %p3660_p2 = pneg %p3659_p0 }
  0x2b   : > { %p3667_p9 = pnand %p3666_p7, %p3660_p2 }
  0x2d   : > { %3670 = shalt.err (!%p3667_p9)
}
  0x2e   : > { %s3988_s17 = smov 128   ;;  %s3989_s20 = smov 8  }
  0x2f   : > { %3186 = dma.hbm_to_vmem [thread:$0]  (!%p4091_p6), %s4992_s1, 2048, %s4080_s14, [#allocation6], %s3988_s17, %s3988_s17, %s3989_s20  }
  0x30   : > { %s4994_s3 = sld [smem:[#allocation27_spill]] }
  0x36   : > { %s3671_s26 = scalar_lea.hbm %s4994_s3, 4096 }
  0x37   : > { %p3672_p4 = scmp.ne.s32.totalorder %s4994_s3, %s3671_s26  ;;  %p3678_p12 = scmp.lt.u32.totalorder %s3671_s26, %s4994_s3 }
  0x39   : > { %p3674_p10 = pnand %p3672_p4, %p4107_p8 }
  0x3b   : > { %p3675_p11 = pneg %p3674_p10 }
  0x3d   : > { %p3680_p13 = pnand %p3678_p12, %p3675_p11 }
  0x3f   : > { %3683 = shalt.err (!%p3680_p13)
}
  0x40   : > { %s3684_s14 = scalar_lea.vmem %s4095_s18, 4096  ;;  %p3692_p7 = scmp.lt.s32.totalorder %s4095_s18, %s4095_s18 }
  0x41   : > { %p3685_p0 = scmp.ne.s32.totalorder %s4095_s18, %s3684_s14  ;;  %p3693_p9 = scmp.lt.s32.totalorder %s3684_s14, %s3684_s14 }
  0x43   : > { %p3687_p2 = pnand %p3685_p0, %p4107_p8  ;;  %p3694_p4 = por %p3693_p9, %p3692_p7 }
  0x45   : > { %p3688_p5 = pneg %p3687_p2 }
  0x47   : > { %p3695_p10 = pnand %p3694_p4, %p3688_p5 }
  0x49   : > { %3698 = shalt.err (!%p3695_p10)
}
  0x4a   : > { %3192 = dma.hbm_to_vmem [thread:$0]  (!%p4091_p6), %s4994_s3, 4096, %s4095_s18, [#allocation9], %s3988_s17, %s3988_s17, %s3989_s20  }
  0x4b   : > { %s3699_s25 = scalar_lea.hbm %s4976_s5, 2048 }
  0x4c   : > { %p3700_p11 = scmp.ne.s32.totalorder %s4976_s5, %s3699_s25  ;;  %p3706_p0 = scmp.lt.u32.totalorder %s3699_s25, %s4976_s5 }
  0x4e   : > { %p3702_p12 = pnand %p3700_p11, %p4107_p8 }
  0x50   : > { %p3703_p13 = pneg %p3702_p12 }
  0x52   : > { %p3708_p2 = pnand %p3706_p0, %p3703_p13 }
  0x54   : > { %3711 = shalt.err (!%p3708_p2)
}
  0x55   : > { %s3712_s18 = scalar_lea.vmem %s4097_s21, 2048  ;;  %p3720_p4 = scmp.lt.s32.totalorder %s4097_s21, %s4097_s21 }
  0x56   : > { %p3713_p5 = scmp.ne.s32.totalorder %s4097_s21, %s3712_s18  ;;  %p3721_p10 = scmp.lt.s32.totalorder %s3712_s18, %s3712_s18 }
  0x58   : > { %p3715_p7 = pnand %p3713_p5, %p4107_p8  ;;  %p3722_p11 = por %p3721_p10, %p3720_p4 }
  0x5a   : > { %p3716_p9 = pneg %p3715_p7 }
  0x5c   : > { %p3723_p12 = pnand %p3722_p11, %p3716_p9 }
  0x5e   : > { %3726 = shalt.err (!%p3723_p12)
}
  0x5f   : > { %s4984_s17 = smov 64   ;;  %s4985_s20 = smov 4  }
  0x60   : > { %3198 = dma.hbm_to_vmem [thread:$0]  (!%p4091_p6), %s4976_s5, 2048, %s4097_s21, [#allocation12], %s4984_s17, %s4984_s17, %s4985_s20  }
  0x61   : > { %s3992_s22 = smov [#allocation7]   ;;  %s3993_s24 = smov [#allocation10]  }
  0x62   : > { %s289_s23 = sshll.u32 %s3992_s22, 4  ;;  %s313_s25 = sshll.u32 %s3993_s24, 4  ;;  %s290_s23 = int_to_ptr.vmem [resolvable:$true] %s289_s23  ;;  %s314_s25 = int_to_ptr.vmem [resolvable:$true] %s313_s25 }
  0x63   : > { %s3727_s29 = scalar_lea.hbm %s4973_s2, 32 }
  0x64   : > { %p3728_p13 = scmp.ne.s32.totalorder %s4973_s2, %s3727_s29  ;;  %p3734_p5 = scmp.lt.u32.totalorder %s3727_s29, %s4973_s2 }
  0x66   : > { %p3730_p0 = pnand %p3728_p13, %p4107_p8 }
  0x68   : > { %p3731_p2 = pneg %p3730_p0 }
  0x6a   : > { %p3736_p7 = pnand %p3734_p5, %p3731_p2 }
  0x6c   : > { %3739 = shalt.err (!%p3736_p7)
}
  0x6d   : > { %s3740_s21 = scalar_lea.vmem %s290_s23, 32  ;;  %p3748_p11 = scmp.lt.s32.totalorder %s290_s23, %s290_s23 }
  0x6e   : > { %p3741_p9 = scmp.ne.s32.totalorder %s290_s23, %s3740_s21  ;;  %p3749_p12 = scmp.lt.s32.totalorder %s3740_s21, %s3740_s21 }
  0x70   : > { %p3743_p4 = pnand %p3741_p9, %p4107_p8  ;;  %p3750_p1 = por %p3749_p12, %p3748_p11 }
  0x72   : > { %p3744_p10 = pneg %p3743_p4 }
  0x74   : > { %p3751_p3 = pnand %p3750_p1, %p3744_p10 }
  0x76   : > { %3754 = shalt.err (!%p3751_p3)
}
  0x77   : > { %3189 = dma.hbm_to_vmem [thread:$0]  (!%p4091_p6), %s4973_s2, 32, %s290_s23, [#allocation6]  }
  0x78   : > { %s3755_s22 = scalar_lea.hbm %s4975_s4, 32 }
  0x79   : > { %p3756_p13 = scmp.ne.s32.totalorder %s4975_s4, %s3755_s22  ;;  %p3762_p3 = scmp.lt.u32.totalorder %s3755_s22, %s4975_s4 }
  0x7b   : > { %p3758_p0 = pnand %p3756_p13, %p4107_p8 }
  0x7d   : > { %p3759_p1 = pneg %p3758_p0 }
  0x7f   : > { %p3764_p2 = pnand %p3762_p3, %p3759_p1 }
  0x81   : > { %3767 = shalt.err (!%p3764_p2)
}
  0x82   : > { %s3768_s13 = scalar_lea.vmem %s314_s25, 32  ;;  %p3776_p4 = scmp.lt.s32.totalorder %s314_s25, %s314_s25 }
  0x83   : > { %p3769_p5 = scmp.ne.s32.totalorder %s314_s25, %s3768_s13  ;;  %p3777_p10 = scmp.lt.s32.totalorder %s3768_s13, %s3768_s13 }
  0x85   : > { %p3771_p7 = pnand %p3769_p5, %p4107_p8  ;;  %p3778_p11 = por %p3777_p10, %p3776_p4 }
  0x87   : > { %p3772_p9 = pneg %p3771_p7 }
  0x89   : > { %p3779_p12 = pnand %p3778_p11, %p3772_p9 }
  0x8b   : > { %3782 = shalt.err (!%p3779_p12)
}
  0x8c   : > { %3195 = dma.hbm_to_vmem [thread:$0]  (!%p4091_p6), %s4975_s4, 32, %s314_s25, [#allocation9]  }
  0x8d   : > { %s3994_s21 = smov [#allocation13]   ;;  %s3995_s8 = smov [#allocation14]  }
  0x8e   : > { %s337_s14 = sshll.u32 %s3994_s21, 4  ;;  %s347_s1 = sshll.u32 %s3995_s8, 4  ;;  %s338_s14 = int_to_ptr.vmem [resolvable:$true] %s337_s14  ;;  %s348_s1 = int_to_ptr.vmem [resolvable:$true] %s347_s1 }
  0x8f   : > { %s3783_s24 = scalar_lea.hbm %s4977_s6, 16 }
  0x90   : > { %p3784_p13 = scmp.ne.s32.totalorder %s4977_s6, %s3783_s24  ;;  %p3790_p3 = scmp.lt.u32.totalorder %s3783_s24, %s4977_s6 }
  0x92   : > { %p3786_p0 = pnand %p3784_p13, %p4107_p8 }
  0x94   : > { %p3787_p1 = pneg %p3786_p0 }
  0x96   : > { %p3792_p2 = pnand %p3790_p3, %p3787_p1 }
  0x98   : > { %3795 = shalt.err (!%p3792_p2)
}
  0x99   : > { %s3796_s25 = scalar_lea.vmem %s338_s14, 16  ;;  %s3803_s23 = scalar_lea.vmem %s338_s14, 32 }
  0x9a   : > { %p3797_p5 = scmp.ne.s32.totalorder %s338_s14, %s3796_s25  ;;  %p3804_p4 = scmp.lt.s32.totalorder %s338_s14, %s338_s14 }
  0x9b   : > { %p3805_p10 = scmp.lt.s32.totalorder %s3803_s23, %s3796_s25 }
  0x9c   : > { %p3799_p7 = pnand %p3797_p5, %p4107_p8 }
  0x9d   : > { %p3806_p11 = por %p3805_p10, %p3804_p4 }
  0x9e   : > { %p3800_p9 = pneg %p3799_p7 }
  0xa0   : > { %p3807_p12 = pnand %p3806_p11, %p3800_p9 }
  0xa2   : > { %3810 = shalt.err (!%p3807_p12)
}
  0xa3   : > { %3201 = dma.hbm_to_vmem [thread:$0]  (!%p4091_p6), %s4977_s6, 16, %s338_s14, [#allocation12]  }
  0xa4   : > { %s3811_s22 = scalar_lea.hbm %s4978_s7, 1024 }
  0xa5   : > { %p3812_p13 = scmp.ne.s32.totalorder %s4978_s7, %s3811_s22  ;;  %p3818_p3 = scmp.lt.u32.totalorder %s3811_s22, %s4978_s7 }
  0xa7   : > { %p3814_p0 = pnand %p3812_p13, %p4107_p8 }
  0xa9   : > { %p3815_p1 = pneg %p3814_p0 }
  0xab   : > { %p3820_p2 = pnand %p3818_p3, %p3815_p1 }
  0xad   : > { %3823 = shalt.err (!%p3820_p2)
}
  0xae   : > { %s3824_s13 = scalar_lea.vmem %s348_s1, 1024  ;;  %p3832_p4 = scmp.lt.s32.totalorder %s348_s1, %s348_s1 }
  0xaf   : > { %p3825_p5 = scmp.ne.s32.totalorder %s348_s1, %s3824_s13  ;;  %p3833_p10 = scmp.lt.s32.totalorder %s3824_s13, %s3824_s13 }
  0xb1   : > { %p3827_p7 = pnand %p3825_p5, %p4107_p8  ;;  %p3834_p11 = por %p3833_p10, %p3832_p4 }
  0xb3   : > { %p3828_p9 = pneg %p3827_p7 }
  0xb5   : > { %p3835_p12 = pnand %p3834_p11, %p3828_p9 }
  0xb7   : > { %3838 = shalt.err (!%p3835_p12)
}
  0xb8   : > { %3204 = dma.hbm_to_vmem [thread:$0]  (!%p4091_p6), %s4978_s7, 1024, %s348_s1, [#allocation15], %s4984_s17, %s4984_s17, %s4985_s20  }
  0xb9   : > { %s2811_s19 = sadd.s32 4294967294, %s3983_s12   ;;  %s4254_s27 = sadd.s32 1, %s3983_s12  }
  0xba   : > { %s40_s23 = sadd.s32 1, %s3979_s11  ;;  %s37_s18 = ssub.s32 %s3983_s12, %s4254_s27 }
  0xbb   : > { %p47_p8 = scmp.ne.s32.totalorder %s3979_s11, %s3975_s10  ;;  %p38_p13 = scmp.eq.s32.totalorder %s37_s18, 0 }
  0xbc   : > { %p48_p0 = scmp.eq.s32.totalorder %s3983_s12, 0  ;;  %p53_p1 = scmp.ne.s32.totalorder %s3975_s10, %s3971_s30 }
  0xbd   : > { %p224_p3 = scmp.eq.s32.totalorder %s4075_s15, 1  ;;  %p4995_p5 = scmp.eq.s32.totalorder %s4075_s15, 0 }
  0xbe   : > { %s4266_s21 = scalar_select %p38_p13, %s3979_s11, %s40_s23  }
  0xbf   : > { %p49_p2 = por %p48_p0, %p47_p8  ;;  %p4270_p7 = por %p4995_p5, %p53_p1 }
  0xc0   : > { %p4274_p6 = por %p224_p3, %p47_p8  ;;  %p230_p9 = scmp.eq.s32.totalorder %s2811_s19, 1 }
  0xc1   : > { %p3223_p4 = scmp.lt.s32.totalorder %s3983_s12, 2  ;;  %s361_s3 = sand.u32 1, %s3979_s11  }
  0xc2   : > { %s4997_s1 = scalar_select %p4274_p6, 1, 0 }
  0xc3   : > { %p4280_p10 = por %p230_p9, %p53_p1  ;;  %s3144_s24 = smul.u32 56, %s361_s3 }
  0xc4   : > { %p4284_p11 = pnand %p3223_p4, %p49_p2  ;;  %s3145_s28 = smul.u32 896, %s3983_s12 }
  0xc5   : > { %s4998_s22 = scalar_select %p4280_p10, 1, 0 }
  0xc6   : > { %s4292_s14 = scalar_lea.hbm %s4971_s0, %s3145_s28  ;;  %s365_s25 = scalar_lea.vmem [#allocation2], %s3144_s24 }
  0xc7   : > { %s373_s19 = sshll.u32 %s365_s25, 4  ;;  %s4296_s23 = scalar_lea.sflag [#allocation3], %s361_s3  ;;  %s4294_s19 = int_to_ptr.vmem [resolvable:$true] %s373_s19 }
  0xc8   : > { %s3839_s18 = scalar_lea.hbm %s4292_s14, 896  ;;  %p3841_p8 = pneg %p4284_p11 }
  0xc9   : > { %p3840_p12 = scmp.ne.s32.totalorder %s4292_s14, %s3839_s18  ;;  %s3844_s13 = scalar_lea.hbm %s4971_s0, 1792 }
  0xca   : > { %p3845_p1 = scmp.lt.u32.totalorder %s4292_s14, %s4971_s0  ;;  %p3846_p3 = scmp.lt.u32.totalorder %s3844_s13, %s3839_s18 }
  0xcb   : > { %p3842_p13 = pnand %p3841_p8, %p3840_p12  ;;  %p3848_p5 = scmp.lt.u32.totalorder %s3839_s18, %s4292_s14 }
  0xcc   : > { %p3847_p2 = por %p3846_p3, %p3845_p1 }
  0xcd   : > { %p3843_p0 = pneg %p3842_p13 }
  0xce   : > { %p3849_p9 = por %p3848_p5, %p3847_p2 }
  0xd0   : > { %p3850_p4 = pnand %p3849_p9, %p3843_p0 }
  0xd2   : > { %3853 = shalt.err (!%p3850_p4)
}
  0xd3   : > { %s3854_s3 = scalar_lea.vmem %s4294_s19, 896  ;;  %s3996_s24 = smov [#allocation2]  }
  0xd4   : > { %p3855_p12 = scmp.ne.s32.totalorder %s4294_s19, %s3854_s3  ;;  %s3859_s25 = sshll.u32 %s3996_s24, 4  ;;  %s3860_s25 = int_to_ptr.vmem [resolvable:$false] %s3859_s25 }
  0xd5   : > { %s3861_s17 = scalar_lea.vmem %s3860_s25, 1792  ;;  %p3862_p6 = scmp.lt.s32.totalorder %s4294_s19, %s3860_s25 }
  0xd6   : > { %p3857_p13 = pnand %p3855_p12, %p3841_p8  ;;  %p3863_p1 = scmp.lt.s32.totalorder %s3861_s17, %s3854_s3 }
  0xd8   : > { %p3858_p10 = pneg %p3857_p13  ;;  %p3864_p3 = por %p3863_p1, %p3862_p6 }
  0xda   : > { %p3865_p2 = pnand %p3864_p3, %p3858_p10 }
  0xdc   : > { %3868 = shalt.err (!%p3865_p2)
}
  0xdd   : > { %s5000_s20 = smov 4   ;;  %s5001_s18 = smov 64  }
  0xde   : > { %3208 = dma.hbm_to_vmem [thread:$0]  (!%p4284_p11), %s4292_s14, 896, %s4294_s19, %s4296_s23, %s5001_s18, %s5001_s18, %s5000_s20  }
  0xdf   : > { %p5002_p8 = scmp.ne.s32.totalorder %s4990_s16, 0 }
  0xe0   : > { %s4330_s28 = sand.u32 (!%p5002_p8), 1, %s3975_s10  }
  0xe1   : > { %385 = sbr.rel (%p5002_p8) target bundleno = 2067 (0x813), region = 52  ;;  %s388_s13 = scalar_lea.sflag (!%p5002_p8), [#allocation3], %s4330_s28 }
  0xe2   : > { %s3146_s29 = smul.u32 (!%p5002_p8), 56, %s4330_s28 }
  0xe4   : > { %s4334_s3 = scalar_lea.vmem (!%p5002_p8), [#allocation2], %s3146_s29 }
  0xe8   : > { %3942 = dma.done.wait (%p4270_p7), %s388_s13, 896  }
  0xe9   : > { %3944 = vsyncadd (%p4270_p7), %s388_s13, 4294966400  ;;  %p5003_p6 = scmp.eq.s32.totalorder %s4075_s15, 0 }
  0xeb   : > { %3946 = dma.done.wait (%p5003_p6), [#allocation6], 2080   ;;  %p5004_p10 = pmov %p5003_p6 }
  0xec   : > { %p5005_p11 = pmov %p5003_p6 }
  0xed   : > { %3948 = vsyncadd (%p5004_p10), [#allocation6], 4294965216 }
  0xee   : > { %3950 = dma.done.wait (%p5005_p11), [#allocation9], 4128   ;;  %p5006_p0 = pmov %p5003_p6 }
  0xf0   : > { %3952 = vsyncadd (%p5006_p0), [#allocation9], 4294963168  ;;  %p5007_p5 = pmov %p5006_p0 }
  0xf1   : > { %p5008_p9 = pmov %p5006_p0 }
  0xf2   : > { %3954 = dma.done.wait (%p5007_p5), [#allocation12], 2064  }
  0xf3   : > { %3956 = vsyncadd (%p5008_p9), [#allocation12], 4294965232  ;;  %p5009_p7 = pmov %p5006_p0 }
  0xf4   : > { %p5010_p4 = pmov %p5006_p0 }
  0xf5   : > { %3958 = dma.done.wait (%p5009_p7), [#allocation15], 1024  }
  0xf6   : > { %3960 = vsyncadd (%p5010_p4), [#allocation15], 4294966272  ;;  %v3997_v0 = vmov 0   ;;  %v3280_v1 = vld [vmem:[#allocation5 + $0x4] ss:$8 sps:$4 sm:$0xff]   ;;  %v3305_v30 = vld [vmem:[%s4334_s3 + $0x8] sm:$0xff]  }
  0xf7   : > { %659 = vmatprep.mubr.bf16.mxu0 %v3997_v0  ;;  %v3282_v2 = vld [vmem:[#allocation5] ss:$8 sps:$4 sm:$0xff]   ;;  %627 = vmatprep.subr.bf16.mxu0 %v3280_v1  ;;  %v3283_v3 = vld [vmem:[#allocation5 + $0x14] ss:$8 sps:$4 sm:$0xff]   ;;  %v3285_v4 = vld [vmem:[#allocation5 + $0x10] ss:$8 sps:$4 sm:$0xff]  }
  0xf8   : > { %628 = vmatpush1.bf16.msra.mxu0 %v3282_v2  ;;  %v3286_v5 = vld [vmem:[#allocation5 + $0x24] ss:$8 sps:$4 sm:$0xff]   ;;  %v3288_v6 = vld [vmem:[#allocation5 + $0x20] ss:$8 sps:$4 sm:$0xff]   ;;  %v3289_v7 = vld [vmem:[#allocation5 + $0x34] ss:$8 sps:$4 sm:$0xff]   ;;  %v495_v2 = vlaneseq }
  0xf9   : > { %629 = vmatprep.subr.bf16.mxu0 %v3283_v3  ;;  %v3291_v8 = vld [vmem:[#allocation5 + $0x30] ss:$8 sps:$4 sm:$0xff]   ;;  %v3292_v9 = vld [vmem:[#allocation5 + $0x44] ss:$8 sps:$4 sm:$0xff]   ;;  %v3294_v10 = vld [vmem:[#allocation5 + $0x40] ss:$8 sps:$4 sm:$0xff]  }
  0xfa   : > { %v3295_v11 = vld [vmem:[#allocation5 + $0x54] ss:$8 sps:$4 sm:$0xff]   ;;  %v3297_v12 = vld [vmem:[#allocation5 + $0x50] ss:$8 sps:$4 sm:$0xff]   ;;  %v3313_v14 = vld [vmem:[#allocation8] ss:$8 sps:$4 sm:$0xff]  }
  0xfb   : > { %v3311_v13 = vld [vmem:[#allocation8 + $0x4] ss:$8 sps:$4 sm:$0xff]   ;;  %v3314_v15 = vld [vmem:[#allocation8 + $0x14] ss:$8 sps:$4 sm:$0xff]   ;;  %v3316_v17 = vld [vmem:[#allocation8 + $0x10] ss:$8 sps:$4 sm:$0xff]  }
  0xfc   : > { %630 = vmatpush1.bf16.msra.mxu0 %v3285_v4  ;;  %v3298_v16 = vld [vmem:[#allocation5 + $0x64] ss:$8 sps:$4 sm:$0xff]   ;;  %1088 = vmatprep.subr.bf16.mxu1 %v3311_v13  ;;  %v3300_v19 = vld [vmem:[#allocation5 + $0x60] ss:$8 sps:$4 sm:$0xff]   ;;  %v3301_v20 = vld [vmem:[#allocation5 + $0x74] ss:$8 sps:$4 sm:$0xff]  }
  0xfd   : > { %631 = vmatprep.subr.bf16.mxu0 %v3286_v5  ;;  %1089 = vmatpush1.bf16.msra.mxu1 %v3313_v14  ;;  %v3317_v18 = vld [vmem:[#allocation8 + $0x24] ss:$8 sps:$4 sm:$0xff]   ;;  %v3319_v21 = vld [vmem:[#allocation8 + $0x20] ss:$8 sps:$4 sm:$0xff]   ;;  %v3320_v22 = vld [vmem:[#allocation8 + $0x34] ss:$8 sps:$4 sm:$0xff]  }
  0xfe   : > { %1090 = vmatprep.subr.bf16.mxu1 %v3314_v15  ;;  %v3303_v23 = vld [vmem:[#allocation5 + $0x70] ss:$8 sps:$4 sm:$0xff]   ;;  %v3325_v27 = vld [vmem:[#allocation8 + $0x40] ss:$8 sps:$4 sm:$0xff]   ;;  %v4370_v3 = vshrl.u32 %v495_v2, 7  ;;  %vm2258_vm0 = vcmask 1043456  }
  0xff   : > { %v3322_v24 = vld [vmem:[#allocation8 + $0x30] ss:$8 sps:$4 sm:$0xff]   ;;  %v3323_v26 = vld [vmem:[#allocation8 + $0x44] ss:$8 sps:$4 sm:$0xff]   ;;  %v3326_v28 = vld [vmem:[#allocation8 + $0x54] ss:$8 sps:$4 sm:$0xff]  }
 0x100   : > { %632 = vmatpush1.bf16.msra.mxu0 %v3288_v6  ;;  %v3304_v25 = vld [vmem:[%s4334_s3] sm:$0xff]   ;;  %v3306_v35 = vld [vmem:[%s4334_s3 + $0x10] sm:$0xff]   ;;  %v3307_v40 = vld [vmem:[%s4334_s3 + $0x18] sm:$0xff]   ;;  %v497_v4 = vsub.s32 0, %v4370_v3  ;;  %v501_v6 = vsub.s32 1, %v4370_v3  ;;  %vm3999_vm1 = vmmov 0  }
 0x101   : > { %633 = vmatprep.subr.bf16.mxu0 %v3289_v7  ;;  %1091 = vmatpush1.bf16.msra.mxu1 %v3316_v17  ;;  %v3328_v29 = vld [vmem:[#allocation8 + $0x50] ss:$8 sps:$4 sm:$0xff]   ;;  %v3329_v31 = vld [vmem:[#allocation8 + $0x64] ss:$8 sps:$4 sm:$0xff]   ;;  %v3331_v32 = vld [vmem:[#allocation8 + $0x60] ss:$8 sps:$4 sm:$0xff]  }
 0x102   : > { %1092 = vmatprep.subr.bf16.mxu1 %v3317_v18  ;;  %v3332_v33 = vld [vmem:[#allocation8 + $0x74] ss:$8 sps:$4 sm:$0xff]   ;;  %v3334_v34 = vld [vmem:[#allocation8 + $0x70] ss:$8 sps:$4 sm:$0xff]   ;;  %v3335_v36 = vld [vmem:[#allocation8 + $0x84] ss:$8 sps:$4 sm:$0xff]  }
 0x103   : > { %v3337_v37 = vld [vmem:[#allocation8 + $0x80] ss:$8 sps:$4 sm:$0xff]   ;;  %v3338_v38 = vld [vmem:[#allocation8 + $0x94] ss:$8 sps:$4 sm:$0xff]   ;;  %v3340_v39 = vld [vmem:[#allocation8 + $0x90] ss:$8 sps:$4 sm:$0xff]  }
 0x104   : > { %634 = vmatpush1.bf16.msra.mxu0 %v3291_v8  ;;  %v3308_v41 = vld [vmem:[%s4334_s3 + $0x20] sm:$0xff]   ;;  %v3309_v42 = vld [vmem:[%s4334_s3 + $0x28] sm:$0xff]   ;;  %v3310_v43 = vld [vmem:[%s4334_s3 + $0x30] sm:$0xff]   ;;  %s3147_s16 = smul.u32 112, %s4330_s28  ;;  %vm2233_vm3 = vcmask 457728   ;;  %s2608_s25 = scalar_lea.sflag [#allocation18], %s4330_s28 }
 0x105   : > { %635 = vmatprep.subr.bf16.mxu0 %v3292_v9  ;;  %1093 = vmatpush1.bf16.msra.mxu1 %v3319_v21  ;;  %v3341_v44 = vld [vmem:[#allocation8 + $0xa4] ss:$8 sps:$4 sm:$0xff]   ;;  %v3343_v45 = vld [vmem:[#allocation8 + $0xa0] ss:$8 sps:$4 sm:$0xff]   ;;  %v3344_v46 = vld [vmem:[#allocation8 + $0xb4] ss:$8 sps:$4 sm:$0xff]  }
 0x106   : > { %1094 = vmatprep.subr.bf16.mxu1 %v3320_v22  ;;  %v3346_v47 = vld [vmem:[#allocation8 + $0xb0] ss:$8 sps:$4 sm:$0xff]   ;;  %v3347_v48 = vld [vmem:[#allocation8 + $0xc4] ss:$8 sps:$4 sm:$0xff]   ;;  %v3349_v49 = vld [vmem:[#allocation8 + $0xc0] ss:$8 sps:$4 sm:$0xff]  }
 0x107   : > { %v3350_v50 = vld [vmem:[#allocation8 + $0xd4] ss:$8 sps:$4 sm:$0xff]   ;;  %v3352_v51 = vld [vmem:[#allocation8 + $0xd0] ss:$8 sps:$4 sm:$0xff]   ;;  %v3353_v52 = vld [vmem:[#allocation8 + $0xe4] ss:$8 sps:$4 sm:$0xff]  }
 0x108   : > { %636 = vmatpush1.bf16.msra.mxu0 %v3294_v10  ;;  %v3355_v53 = vld [vmem:[#allocation8 + $0xe0] ss:$8 sps:$4 sm:$0xff]   ;;  %v3356_v54 = vld [vmem:[#allocation8 + $0xf4] ss:$8 sps:$4 sm:$0xff]   ;;  %v3358_v55 = vld [vmem:[#allocation8 + $0xf0] ss:$8 sps:$4 sm:$0xff]  }
 0x109   : > { %637 = vmatprep.subr.bf16.mxu0 %v3295_v11  ;;  %1095 = vmatpush1.bf16.msra.mxu1 %v3322_v24  ;;  %v3359_v56 = vld [vmem:[#allocation11 + $0x40] sm:$0xff]   ;;  %v3361_v58 = vld [vmem:[#allocation11 + $0x48] sm:$0xff]   ;;  %v3363_v60 = vld [vmem:[#allocation11 + $0x50] sm:$0xff]   ;;  %s4683_s8 = scalar_lea.vmem [#allocation17], %s3147_s16  ;;  %s3148_s26 = smul.u32 1792, %s4075_s15 }
 0x10a   : > { %1096 = vmatprep.subr.bf16.mxu1 %v3323_v26  ;;  %v3360_v57 = vld [vmem:[#allocation11] sm:$0xff]   ;;  %v3362_v59 = vld [vmem:[#allocation11 + $0x8] sm:$0xff]   ;;  %v3364_v61 = vld [vmem:[#allocation11 + $0x10] sm:$0xff]   ;;  %s2639_s24 = sshll.u32 %s4683_s8, 4  ;;  %p5011_p13 = scmp.ne.s32.totalorder %s4997_s1, 0  ;;  %s4847_s24 = int_to_ptr.vmem [resolvable:$true] %s2639_s24 }
 0x10b   : > { %v3365_v62 = vld [vmem:[#allocation11 + $0x58] sm:$0xff]   ;;  %v3368_v1 = vld [vmem:[#allocation11 + $0x20] sm:$0xff]   ;;  %s4844_s23 = scalar_lea.hbm %s4980_s9, %s3148_s26  ;;  %s3869_s17 = scalar_lea.vmem %s4847_s24, 1792 }
 0x10c   : > { %638 = vmatpush1.bf16.msra.mxu0 %v3297_v12  ;;  %v3366_v63 = vld [vmem:[#allocation11 + $0x18] sm:$0xff]   ;;  %p3870_p12 = scmp.ne.s32.totalorder %s4847_s24, %s3869_s17  ;;  %s4000_s20 = smov [#allocation17]  }
 0x10d   : > { %639 = vmatprep.subr.bf16.mxu0 %v3298_v16  ;;  %1097 = vmatpush1.bf16.msra.mxu1 %v3325_v27  ;;  %v493_v5 = vld [vmem:[#allocation7] sm:$0x3]  ;;  %s3873_s18 = sshll.u32 %s4000_s20, 4  ;;  %s3874_s18 = int_to_ptr.vmem [resolvable:$false] %s3873_s18 }
 0x10e   : > { %1098 = vmatprep.subr.bf16.mxu1 %v3326_v28  ;;  %v4376_v7 = vrot.slane %v493_v5, %v497_v4  ;;  %v4380_v8 = vrot.slane %v493_v5, %v501_v6  ;;  %p3871_p1 = pnand %p3870_p12, %p5011_p13  ;;  %s3875_s29 = scalar_lea.vmem %s3874_s18, 3584 }
 0x10f   : > { %p3876_p2 = scmp.lt.s32.totalorder %s4847_s24, %s3874_s18  ;;  %p3877_p8 = scmp.lt.s32.totalorder %s3875_s29, %s3869_s17 }
 0x110   : > { %640 = vmatpush1.bf16.msra.mxu0 %v3300_v19  ;;  %p3872_p3 = pneg %p3871_p1 }
 0x111   : > { %641 = vmatprep.subr.bf16.mxu0 %v3301_v20  ;;  %1099 = vmatpush1.bf16.msra.mxu1 %v3328_v29  ;;  %p3878_p6 = por %p3877_p8, %p3876_p2 }
 0x112   : > { %1100 = vmatprep.subr.bf16.mxu1 %v3329_v31 }
 0x113   : > { %p3879_p10 = pnand %p3878_p6, %p3872_p3 }
 0x114   : > { %642 = vmatpush1.bf16.msra.mxu0 %v3303_v23 }
 0x115   : > { %1101 = vmatpush1.bf16.msra.mxu1 %v3331_v32  ;;  %2944 = vmatprep.subr.bf16.mxu0 %v3359_v56 }
 0x116   : > { %1102 = vmatprep.subr.bf16.mxu1 %v3332_v33 }
 0x117   : > { %660 = vmatmul.mubr.bf16.vlgmr.msra.gmra.mrb[0].mxu0 %v3304_v25 }
 0x118   : > { %669 = vmatprep.mubr.bf16.mxu0 %v3997_v0  ;;  %2945 = vmatpush3.bf16.msra.mxu0 %v3360_v57 }
 0x119   : > { %1103 = vmatpush1.bf16.msra.mxu1 %v3334_v34  ;;  %2946 = vmatprep.subr.bf16.mxu0 %v3361_v58 }
 0x11a   : > { %1104 = vmatprep.subr.bf16.mxu1 %v3335_v36 }
 0x11c   : > { %2947 = vmatpush3.bf16.msra.mxu0 %v3362_v59 }
 0x11d   : > { %1105 = vmatpush1.bf16.msra.mxu1 %v3337_v37  ;;  %2948 = vmatprep.subr.bf16.mxu0 %v3363_v60 }
 0x11e   : > { %1106 = vmatprep.subr.bf16.mxu1 %v3338_v38 }
 0x11f   : > { %670 = vmatmul.mubr.bf16.gmra.mrb[4].mxu0 %v3305_v30 }
 0x120   : > { %679 = vmatprep.mubr.bf16.mxu0 %v3997_v0  ;;  %2949 = vmatpush3.bf16.msra.mxu0 %v3364_v61 }
 0x121   : > { %1107 = vmatpush1.bf16.msra.mxu1 %v3340_v39  ;;  %2950 = vmatprep.subr.bf16.mxu0 %v3365_v62 }
 0x122   : > { %1108 = vmatprep.subr.bf16.mxu1 %v3341_v44 }
 0x124   : > { %2951 = vmatpush3.bf16.msra.mxu0 %v3366_v63 }
 0x125   : > { %1109 = vmatpush1.bf16.msra.mxu1 %v3343_v45 }
 0x126   : > { %1110 = vmatprep.subr.bf16.mxu1 %v3344_v46 }
 0x127   : > { %680 = vmatmul.mubr.bf16.gmra.mrb[8].mxu0 %v3306_v35 }
 0x128   : > { %689 = vmatprep.mubr.bf16.mxu0 %v3997_v0 }
 0x129   : > { %1111 = vmatpush1.bf16.msra.mxu1 %v3346_v47 }
 0x12a   : > { %1112 = vmatprep.subr.bf16.mxu1 %v3347_v48 }
 0x12d   : > { %1113 = vmatpush1.bf16.msra.mxu1 %v3349_v49 }
 0x12e   : > { %1114 = vmatprep.subr.bf16.mxu1 %v3350_v50 }
 0x12f   : > { %690 = vmatmul.mubr.bf16.gmra.mrb[12].mxu0 %v3307_v40 }
 0x130   : > { %699 = vmatprep.mubr.bf16.mxu0 %v3997_v0 }
 0x131   : > { %1115 = vmatpush1.bf16.msra.mxu1 %v3352_v51 }
 0x132   : > { %1116 = vmatprep.subr.bf16.mxu1 %v3353_v52 }
 0x135   : > { %1117 = vmatpush1.bf16.msra.mxu1 %v3355_v53 }
 0x136   : > { %1118 = vmatprep.subr.bf16.mxu1 %v3356_v54 }
 0x137   : > { %700 = vmatmul.mubr.bf16.gmra.mrb[16].mxu0 %v3308_v41 }
 0x138   : > { %709 = vmatprep.mubr.bf16.mxu0 %v3997_v0 }
 0x139   : > { %1119 = vmatpush1.bf16.msra.mxu1 %v3358_v55 }
 0x13f   : > { %710 = vmatmul.mubr.bf16.gmra.mrb[20].mxu0 %v3309_v42 }
 0x140   : > { %719 = vmatprep.mubr.bf16.mxu0 %v3997_v0  ;;  %v3367_v0 = vld [vmem:[#allocation11 + $0x60] sm:$0xff]  }
 0x141   : > { %2952 = vmatprep.subr.bf16.mxu0 %v3367_v0 }
 0x142   : > { %2953 = vmatpush3.bf16.msra.mxu0 %v3368_v1 }
 0x147   : > { %720 = vmatmul.mubr.bf16.gmra.mrb[24].mxu0 %v3310_v43 }
 0x1ea   : > { %v661_v9 = vpop.f32.mrb[0].mxu0 }
 0x1eb   : > { %v662_v10 = vadd.f32 %v661_v9, %v4376_v7  ;;  %v663_v11 = vpop.f32.mrb[1].mxu0 }
 0x1ec   : > { %v664_v12 = vadd.f32 %v663_v11, %v4380_v8  ;;  %v665_v13 = vpop.f32.mrb[2].mxu0 }
 0x1ed   : > { %v758_v14 = vmul.f32 0.70710677, %v662_v10  ;;  %v666_v15 = vadd.f32 %v665_v13, %v4376_v7  ;;  %v667_v16 = vpop.f32.mrb[3].mxu0  ;;  %v730_v37 = vmul.f32 0.5, %v662_v10 }
 0x1ee   : > { %v759_v17 = vmul.f32 0.70710677, %v664_v12  ;;  %v668_v18 = vadd.f32 %v667_v16, %v4380_v8  ;;  %v731_v47 = vmul.f32 0.5, %v664_v12 }
 0x1ef   : > { %3383 = verf.f32 %v758_v14  ;;  %v760_v19 = vmul.f32 0.70710677, %v666_v15  ;;  %v732_v42 = vmul.f32 0.5, %v666_v15 }
 0x1f0   : > { %3385 = verf.f32 %v759_v17  ;;  %v761_v20 = vmul.f32 0.70710677, %v668_v18  ;;  %v733_v53 = vmul.f32 0.5, %v668_v18 }
 0x1f1   : > { %3387 = verf.f32 %v760_v19 }
 0x1f2   : > { %3389 = verf.f32 %v761_v20  ;;  %v671_v21 = vpop.f32.mrb[4].mxu0 }
 0x1f3   : > { %v672_v22 = vadd.f32 %v671_v21, %v4376_v7  ;;  %v673_v23 = vpop.f32.mrb[5].mxu0 }
 0x1f4   : > { %v674_v24 = vadd.f32 %v673_v23, %v4380_v8  ;;  %v675_v25 = vpop.f32.mrb[6].mxu0 }
 0x1f5   : > { %v762_v26 = vmul.f32 0.70710677, %v672_v22  ;;  %v676_v27 = vadd.f32 %v675_v25, %v4376_v7  ;;  %v677_v28 = vpop.f32.mrb[7].mxu0  ;;  %v734_v13 = vmul.f32 0.5, %v672_v22 }
 0x1f6   : > { %v763_v29 = vmul.f32 0.70710677, %v674_v24  ;;  %v678_v30 = vadd.f32 %v677_v28, %v4380_v8  ;;  %v735_v18 = vmul.f32 0.5, %v674_v24 }
 0x1f7   : > { %3391 = verf.f32 %v762_v26  ;;  %v764_v31 = vmul.f32 0.70710677, %v676_v27  ;;  %v736_v14 = vmul.f32 0.5, %v676_v27 }
 0x1f8   : > { %3393 = verf.f32 %v763_v29  ;;  %v765_v32 = vmul.f32 0.70710677, %v678_v30  ;;  %v737_v19 = vmul.f32 0.5, %v678_v30 }
 0x1f9   : > { %v3384_v33 = vpop.eup %3383  ;;  %3395 = verf.f32 %v764_v31 }
 0x1fa   : > { %v3386_v34 = vpop.eup %3385  ;;  %3397 = verf.f32 %v765_v32  ;;  %v681_v35 = vpop.f32.mrb[8].mxu0  ;;  %v814_v38 = vadd.f32 1.0, %v3384_v33 }
 0x1fb   : > { %v3388_v36 = vpop.eup %3387  ;;  %v4391_v39 = vadd.f32 %v681_v35, %v4376_v7  ;;  %v683_v40 = vpop.f32.mrb[9].mxu0  ;;  %v815_v46 = vadd.f32 1.0, %v3386_v34 }
 0x1fc   : > { %v3390_v41 = vpop.eup %3389  ;;  %v816_v43 = vadd.f32 1.0, %v3388_v36  ;;  %v4394_v44 = vadd.f32 %v683_v40, %v4380_v8  ;;  %v685_v45 = vpop.f32.mrb[10].mxu0  ;;  %v842_v56 = vmul.f32 %v814_v38, %v730_v37 }
 0x1fd   : > { %v766_v48 = vmul.f32 0.70710677, %v4391_v39  ;;  %v4398_v49 = vadd.f32 %v685_v45, %v4376_v7  ;;  %v687_v50 = vpop.f32.mrb[11].mxu0  ;;  %v817_v51 = vadd.f32 1.0, %v3390_v41  ;;  %v843_v59 = vmul.f32 %v815_v46, %v731_v47 }
 0x1fe   : > { %v844_v52 = vmul.f32 %v816_v43, %v732_v42  ;;  %v767_v54 = vmul.f32 0.70710677, %v4394_v44  ;;  %v4402_v55 = vadd.f32 %v687_v50, %v4380_v8  ;;  %v738_v45 = vmul.f32 0.5, %v4391_v39 }
 0x1ff   : > { %3399 = verf.f32 %v766_v48  ;;  %v768_v57 = vmul.f32 0.70710677, %v4398_v49  ;;  %v845_v60 = vmul.f32 %v817_v51, %v733_v53  ;;  %v740_v46 = vmul.f32 0.5, %v4398_v49 }
 0x200   : > { %3401 = verf.f32 %v767_v54  ;;  %v769_v58 = vmul.f32 0.70710677, %v4402_v55  ;;  %v870_v62 = vpack.c.bf16 %v844_v52, %v842_v56  ;;  %v739_v51 = vmul.f32 0.5, %v4394_v44 }
 0x201   : > { %v3392_v61 = vpop.eup %3391  ;;  %3403 = verf.f32 %v768_v57  ;;  %v871_v2 = vpack.c.bf16 %v845_v60, %v843_v59  ;;  %v741_v52 = vmul.f32 0.5, %v4402_v55 }
 0x202   : > { %v3394_v63 = vpop.eup %3393  ;;  %v818_v0 = vadd.f32 1.0, %v3392_v61  ;;  %3405 = verf.f32 %v769_v58  ;;  %v691_v1 = vpop.f32.mrb[12].mxu0 }
 0x203   : > { %v3396_v5 = vpop.eup %3395  ;;  %v819_v9 = vadd.f32 1.0, %v3394_v63  ;;  %v4407_v10 = vadd.f32 %v691_v1, %v4376_v7  ;;  %v693_v11 = vpop.f32.mrb[13].mxu0  ;;  %1120 = vmatprep.mubr.bf16.mxu1 %v871_v2 }
 0x204   : > { %v3398_v12 = vpop.eup %3397  ;;  %v820_v15 = vadd.f32 1.0, %v3396_v5  ;;  %v4410_v16 = vadd.f32 %v693_v11, %v4380_v8  ;;  %v695_v17 = vpop.f32.mrb[14].mxu0  ;;  %1121 = vmatmul.mubr.bf16.vlgmr.msra.gmra.mrb[0].mxu1 %v870_v62  ;;  %v846_v25 = vmul.f32 %v818_v0, %v734_v13 }
 0x205   : > { %v821_v20 = vadd.f32 1.0, %v3398_v12  ;;  %v770_v21 = vmul.f32 0.70710677, %v4407_v10  ;;  %v697_v23 = vpop.f32.mrb[15].mxu0  ;;  %v696_v22 = vadd.f32 %v695_v17, %v4376_v7  ;;  %v847_v27 = vmul.f32 %v819_v9, %v735_v18 }
 0x206   : > { %v848_v26 = vmul.f32 %v820_v15, %v736_v14  ;;  %v771_v28 = vmul.f32 0.70710677, %v4410_v16  ;;  %v698_v31 = vadd.f32 %v697_v23, %v4380_v8  ;;  %v742_v13 = vmul.f32 0.5, %v4407_v10 }
 0x207   : > { %v849_v29 = vmul.f32 %v821_v20, %v737_v19  ;;  %3407 = verf.f32 %v770_v21  ;;  %v772_v32 = vmul.f32 0.70710677, %v696_v22  ;;  %v743_v19 = vmul.f32 0.5, %v4410_v16 }
 0x208   : > { %3409 = verf.f32 %v771_v28  ;;  %v872_v24 = vpack.c.bf16 %v848_v26, %v846_v25  ;;  %v773_v33 = vmul.f32 0.70710677, %v698_v31  ;;  %v744_v20 = vmul.f32 0.5, %v696_v22 }
 0x209   : > { %v3400_v30 = vpop.eup %3399  ;;  %v873_v34 = vpack.c.bf16 %v849_v29, %v847_v27  ;;  %3411 = verf.f32 %v772_v32  ;;  %v745_v26 = vmul.f32 0.5, %v698_v31 }
 0x20a   : > { %v3402_v35 = vpop.eup %3401  ;;  %v822_v36 = vadd.f32 1.0, %v3400_v30  ;;  %v701_v37 = vpop.f32.mrb[16].mxu0  ;;  %3413 = verf.f32 %v773_v33 }
 0x20b   : > { %v3404_v38 = vpop.eup %3403  ;;  %v823_v40 = vadd.f32 1.0, %v3402_v35  ;;  %v4417_v41 = vadd.f32 %v701_v37, %v4376_v7  ;;  %v703_v42 = vpop.f32.mrb[17].mxu0  ;;  %1130 = vmatprep.mubr.bf16.mxu1 %v873_v34 }
 0x20c   : > { %v3406_v43 = vpop.eup %3405  ;;  %v824_v47 = vadd.f32 1.0, %v3404_v38  ;;  %v4422_v48 = vadd.f32 %v703_v42, %v4380_v8  ;;  %v705_v50 = vpop.f32.mrb[18].mxu0  ;;  %1131 = vmatmul.mubr.bf16.gmra.mrb[4].mxu1 %v872_v24  ;;  %v850_v57 = vmul.f32 %v822_v36, %v738_v45 }
 0x20d   : > { %v825_v53 = vadd.f32 1.0, %v3406_v43  ;;  %v774_v54 = vmul.f32 0.70710677, %v4417_v41  ;;  %v707_v56 = vpop.f32.mrb[19].mxu0  ;;  %v706_v49 = vadd.f32 %v705_v50, %v4376_v7  ;;  %v851_v59 = vmul.f32 %v823_v40, %v739_v51 }
 0x20e   : > { %v852_v58 = vmul.f32 %v824_v47, %v740_v46  ;;  %v775_v39 = vmul.f32 0.70710677, %v4422_v48  ;;  %v708_v61 = vadd.f32 %v707_v56, %v4380_v8  ;;  %v746_v45 = vmul.f32 0.5, %v4417_v41 }
 0x20f   : > { %v853_v60 = vmul.f32 %v825_v53, %v741_v52  ;;  %3415 = verf.f32 %v774_v54  ;;  %v776_v44 = vmul.f32 0.70710677, %v706_v49  ;;  %v747_v52 = vmul.f32 0.5, %v4422_v48 }
 0x210   : > { %3417 = verf.f32 %v775_v39  ;;  %v874_v62 = vpack.c.bf16 %v852_v58, %v850_v57  ;;  %v777_v63 = vmul.f32 0.70710677, %v708_v61  ;;  %v748_v53 = vmul.f32 0.5, %v706_v49 }
 0x211   : > { %v3408_v55 = vpop.eup %3407  ;;  %v875_v0 = vpack.c.bf16 %v853_v60, %v851_v59  ;;  %3419 = verf.f32 %v776_v44  ;;  %v749_v58 = vmul.f32 0.5, %v708_v61 }
 0x212   : > { %v3410_v1 = vpop.eup %3409  ;;  %v711_v2 = vpop.f32.mrb[20].mxu0  ;;  %v826_v5 = vadd.f32 1.0, %v3408_v55  ;;  %3421 = verf.f32 %v777_v63 }
 0x213   : > { %v4431_v9 = vadd.f32 %v711_v2, %v4376_v7  ;;  %v713_v11 = vpop.f32.mrb[21].mxu0  ;;  %1140 = vmatprep.mubr.bf16.mxu1 %v875_v0  ;;  %v3412_v12 = vpop.eup %3411  ;;  %v827_v14 = vadd.f32 1.0, %v3410_v1 }
 0x214   : > { %v4435_v15 = vadd.f32 %v713_v11, %v4380_v8  ;;  %v715_v17 = vpop.f32.mrb[22].mxu0  ;;  %v3414_v18 = vpop.eup %3413  ;;  %v828_v21 = vadd.f32 1.0, %v3412_v12  ;;  %1141 = vmatmul.mubr.bf16.gmra.mrb[8].mxu1 %v874_v62  ;;  %v854_v29 = vmul.f32 %v826_v5, %v742_v13 }
 0x215   : > { %v778_v23 = vmul.f32 0.70710677, %v4431_v9  ;;  %v717_v25 = vpop.f32.mrb[23].mxu0  ;;  %v829_v28 = vadd.f32 1.0, %v3414_v18  ;;  %v716_v10 = vadd.f32 %v715_v17, %v4376_v7  ;;  %v855_v30 = vmul.f32 %v827_v14, %v743_v19 }
 0x216   : > { %v779_v27 = vmul.f32 0.70710677, %v4435_v15  ;;  %v856_v32 = vmul.f32 %v828_v21, %v744_v20  ;;  %v718_v24 = vadd.f32 %v717_v25, %v4380_v8  ;;  %v750_v13 = vmul.f32 0.5, %v4431_v9 }
 0x217   : > { %3423 = verf.f32 %v778_v23  ;;  %v857_v33 = vmul.f32 %v829_v28, %v745_v26  ;;  %v780_v16 = vmul.f32 0.70710677, %v716_v10  ;;  %v752_v14 = vmul.f32 0.5, %v716_v10 }
 0x218   : > { %3425 = verf.f32 %v779_v27  ;;  %v781_v34 = vmul.f32 0.70710677, %v718_v24  ;;  %v876_v35 = vpack.c.bf16 %v856_v32, %v854_v29  ;;  %v751_v17 = vmul.f32 0.5, %v4435_v15 }
 0x219   : > { %v3416_v22 = vpop.eup %3415  ;;  %3427 = verf.f32 %v780_v16  ;;  %v877_v37 = vpack.c.bf16 %v857_v33, %v855_v30  ;;  %v753_v18 = vmul.f32 0.5, %v718_v24 }
 0x21a   : > { %v3418_v36 = vpop.eup %3417  ;;  %v721_v31 = vpop.f32.mrb[24].mxu0  ;;  %v830_v38 = vadd.f32 1.0, %v3416_v22  ;;  %3429 = verf.f32 %v781_v34 }
 0x21b   : > { %v722_v40 = vadd.f32 %v721_v31, %v4376_v7  ;;  %v723_v42 = vpop.f32.mrb[25].mxu0  ;;  %v3420_v43 = vpop.eup %3419  ;;  %v831_v46 = vadd.f32 1.0, %v3418_v36  ;;  %1150 = vmatprep.mubr.bf16.mxu1 %v877_v37 }
 0x21c   : > { %v724_v47 = vadd.f32 %v723_v42, %v4380_v8  ;;  %v725_v50 = vpop.f32.mrb[26].mxu0  ;;  %v3422_v51 = vpop.eup %3421  ;;  %v832_v54 = vadd.f32 1.0, %v3420_v43  ;;  %1151 = vmatmul.mubr.bf16.gmra.mrb[12].mxu1 %v876_v35  ;;  %v858_v44 = vmul.f32 %v830_v38, %v746_v45  ;;  %v3369_v43 = vld [vmem:[#allocation11 + $0x68] sm:$0xff]  }
 0x21d   : > { %v782_v56 = vmul.f32 0.70710677, %v722_v40  ;;  %v727_v57 = vpop.f32.mrb[27].mxu0  ;;  %v833_v39 = vadd.f32 1.0, %v3422_v51  ;;  %v726_v60 = vadd.f32 %v725_v50, %v4376_v7  ;;  %v859_v55 = vmul.f32 %v831_v46, %v747_v52  ;;  %v3370_v45 = vld [vmem:[#allocation11 + $0x28] sm:$0xff]   ;;  %2954 = vmatprep.subr.bf16.mxu0 %v3369_v43  ;;  %v3371_v46 = vld [vmem:[#allocation11 + $0x70] sm:$0xff]  }
 0x21e   : > { %v783_v59 = vmul.f32 0.70710677, %v724_v47  ;;  %v860_v41 = vmul.f32 %v832_v54, %v748_v53  ;;  %v728_v62 = vadd.f32 %v727_v57, %v4380_v8  ;;  %v754_v10 = vmul.f32 0.5, %v722_v40  ;;  %2955 = vmatpush3.bf16.msra.mxu0 %v3370_v45  ;;  %v3372_v40 = vld [vmem:[#allocation11 + $0x30] sm:$0xff]   ;;  %v3373_v50 = vld [vmem:[#allocation11 + $0x78] sm:$0xff]   ;;  %v3375_v51 = vld [vmem:[#allocation14] sm:$0xff]  }
 0x21f   : > { %3431 = verf.f32 %v782_v56  ;;  %v861_v63 = vmul.f32 %v833_v39, %v749_v58  ;;  %v784_v0 = vmul.f32 0.70710677, %v726_v60  ;;  %v756_v16 = vmul.f32 0.5, %v726_v60  ;;  %2956 = vmatprep.subr.bf16.mxu0 %v3371_v46  ;;  %v3376_v53 = vld [vmem:[#allocation14 + $0x8] sm:$0xff]   ;;  %v3377_v54 = vld [vmem:[#allocation14 + $0x10] sm:$0xff]   ;;  %v3378_v56 = vld [vmem:[#allocation14 + $0x18] sm:$0xff]  }
 0x220   : > { %3433 = verf.f32 %v783_v59  ;;  %v785_v49 = vmul.f32 0.70710677, %v728_v62  ;;  %v878_v1 = vpack.c.bf16 %v860_v41, %v858_v44  ;;  %v755_v15 = vmul.f32 0.5, %v724_v47  ;;  %v3374_v47 = vld [vmem:[#allocation11 + $0x38] sm:$0xff]   ;;  %v3379_v57 = vld [vmem:[#allocation14 + $0x20] sm:$0xff]   ;;  %v3380_v58 = vld [vmem:[#allocation14 + $0x28] sm:$0xff]  }
 0x221   : > { %v3424_v48 = vpop.eup %3423  ;;  %3435 = verf.f32 %v784_v0  ;;  %v879_v5 = vpack.c.bf16 %v861_v63, %v859_v55  ;;  %v757_v24 = vmul.f32 0.5, %v728_v62  ;;  %v3998_v52 = vmov 0.0   ;;  %v916_v39 = vld [vmem:[#allocation10] sm:$0x3] }
 0x222   : > { %v3426_v2 = vpop.eup %3425  ;;  %v834_v61 = vadd.f32 1.0, %v3424_v48  ;;  %3437 = verf.f32 %v785_v49  ;;  %2957 = vmatpush3.bf16.msra.mxu0 %v3372_v40  ;;  %3041 = vmatprep.subr.bf16.mxu1 %v3998_v52  ;;  %v4459_v59 = vrot.slane %v916_v39, %v497_v4  ;;  %v4463_v60 = vrot.slane %v916_v39, %v501_v6 }
 0x223   : > { %v3428_v11 = vpop.eup %3427  ;;  %v835_v12 = vadd.f32 1.0, %v3426_v2  ;;  %1160 = vmatprep.mubr.bf16.mxu1 %v879_v5  ;;  %2958 = vmatprep.subr.bf16.mxu0 %v3373_v50 }
 0x224   : > { %v3430_v7 = vpop.eup %3429  ;;  %v836_v8 = vadd.f32 1.0, %v3428_v11  ;;  %1161 = vmatmul.mubr.bf16.gmra.mrb[16].mxu1 %v878_v1  ;;  %v862_v20 = vmul.f32 %v834_v61, %v750_v13 }
 0x225   : > { %v837_v19 = vadd.f32 1.0, %v3430_v7  ;;  %v863_v23 = vmul.f32 %v835_v12, %v751_v17  ;;  %3042 = vmatpush3.bf16.xpose.msra.mxu1 %v3375_v51 }
 0x226   : > { %v864_v21 = vmul.f32 %v836_v8, %v752_v14  ;;  %2959 = vmatpush3.bf16.msra.mxu0 %v3374_v47  ;;  %3043 = vmatprep.subr.bf16.mxu1 %v3998_v52 }
 0x227   : > { %v865_v25 = vmul.f32 %v837_v19, %v753_v18 }
 0x228   : > { %v880_v28 = vpack.c.bf16 %v864_v21, %v862_v20 }
 0x229   : > { %v3432_v26 = vpop.eup %3431  ;;  %v881_v29 = vpack.c.bf16 %v865_v25, %v863_v23 }
 0x22a   : > { %v3434_v27 = vpop.eup %3433  ;;  %v838_v32 = vadd.f32 1.0, %v3432_v26 }
 0x22b   : > { %v3436_v30 = vpop.eup %3435  ;;  %v839_v33 = vadd.f32 1.0, %v3434_v27  ;;  %1170 = vmatprep.mubr.bf16.mxu1 %v881_v29 }
 0x22c   : > { %v3438_v9 = vpop.eup %3437  ;;  %v840_v22 = vadd.f32 1.0, %v3436_v30  ;;  %1171 = vmatmul.mubr.bf16.gmra.mrb[20].mxu1 %v880_v28  ;;  %v866_v35 = vmul.f32 %v838_v32, %v754_v10 }
 0x22d   : > { %v841_v34 = vadd.f32 1.0, %v3438_v9  ;;  %v867_v31 = vmul.f32 %v839_v33, %v755_v15  ;;  %3044 = vmatpush3.bf16.xpose.msra.mxu1 %v3376_v53 }
 0x22e   : > { %v868_v36 = vmul.f32 %v840_v22, %v756_v16  ;;  %3045 = vmatprep.subr.bf16.mxu1 %v3998_v52 }
 0x22f   : > { %v869_v37 = vmul.f32 %v841_v34, %v757_v24 }
 0x230   : > { %v882_v38 = vpack.c.bf16 %v868_v36, %v866_v35 }
 0x231   : > { %v883_v42 = vpack.c.bf16 %v869_v37, %v867_v31 }
 0x233   : > { %1180 = vmatprep.mubr.bf16.mxu1 %v883_v42 }
 0x234   : > { %1181 = vmatmul.mubr.bf16.gmra.mrb[24].mxu1 %v882_v38 }
 0x235   : > { %3046 = vmatpush3.bf16.xpose.msra.mxu1 %v3377_v54  ;;  %3057 = vmatprep.mubr.msk.bf16.mxu1 %vm3999_vm1, %v3998_v52 }
 0x236   : > { %3047 = vmatprep.subr.bf16.mxu1 %v3998_v52 }
 0x23d   : > { %3048 = vmatpush3.bf16.xpose.msra.mxu1 %v3378_v56 }
 0x23e   : > { %3049 = vmatprep.subr.bf16.mxu1 %v3998_v52 }
 0x245   : > { %3050 = vmatpush3.bf16.xpose.msra.mxu1 %v3379_v57 }
 0x246   : > { %3051 = vmatprep.subr.bf16.mxu1 %v3998_v52 }
 0x24d   : > { %3052 = vmatpush3.bf16.xpose.msra.mxu1 %v3380_v58 }
 0x24e   : > { %3053 = vmatprep.subr.bf16.mxu1 %v3998_v52 }
 0x2d7   : > { %v1122_v44 = vpop.f32.mrb[0].mxu1 }
 0x2d8   : > { %v1123_v41 = vadd.f32 %v1122_v44, %v4459_v59  ;;  %v1124_v62 = vpop.f32.mrb[1].mxu1 }
 0x2d9   : > { %v1125_v55 = vadd.f32 %v1124_v62, %v4463_v60  ;;  %v1126_v63 = vpop.f32.mrb[2].mxu1 }
 0x2da   : > { %v1219_v0 = vmul.f32 0.70710677, %v1123_v41  ;;  %v1127_v48 = vadd.f32 %v1126_v63, %v4459_v59  ;;  %v1128_v49 = vpop.f32.mrb[3].mxu1  ;;  %v1191_v33 = vmul.f32 0.5, %v1123_v41 }
 0x2db   : > { %v1220_v1 = vmul.f32 0.70710677, %v1125_v55  ;;  %v1129_v2 = vadd.f32 %v1128_v49, %v4463_v60  ;;  %v1192_v15 = vmul.f32 0.5, %v1125_v55 }
 0x2dc   : > { %3439 = verf.f32 %v1219_v0  ;;  %v1221_v4 = vmul.f32 0.70710677, %v1127_v48  ;;  %v1193_v9 = vmul.f32 0.5, %v1127_v48 }
 0x2dd   : > { %3441 = verf.f32 %v1220_v1  ;;  %v1222_v5 = vmul.f32 0.70710677, %v1129_v2  ;;  %v1194_v24 = vmul.f32 0.5, %v1129_v2 }
 0x2de   : > { %3443 = verf.f32 %v1221_v4 }
 0x2df   : > { %3445 = verf.f32 %v1222_v5  ;;  %v1132_v6 = vpop.f32.mrb[4].mxu1 }
 0x2e0   : > { %v1133_v61 = vadd.f32 %v1132_v6, %v4459_v59  ;;  %v1134_v11 = vpop.f32.mrb[5].mxu1 }
 0x2e1   : > { %v1135_v12 = vadd.f32 %v1134_v11, %v4463_v60  ;;  %v1136_v7 = vpop.f32.mrb[6].mxu1 }
 0x2e2   : > { %v1223_v13 = vmul.f32 0.70710677, %v1133_v61  ;;  %v1137_v14 = vadd.f32 %v1136_v7, %v4459_v59  ;;  %v1138_v8 = vpop.f32.mrb[7].mxu1  ;;  %v1195_v55 = vmul.f32 0.5, %v1133_v61 }
 0x2e3   : > { %v1224_v17 = vmul.f32 0.70710677, %v1135_v12  ;;  %v1139_v18 = vadd.f32 %v1138_v8, %v4463_v60  ;;  %v1196_v1 = vmul.f32 0.5, %v1135_v12 }
 0x2e4   : > { %3447 = verf.f32 %v1223_v13  ;;  %v1225_v19 = vmul.f32 0.70710677, %v1137_v14  ;;  %v1197_v63 = vmul.f32 0.5, %v1137_v14 }
 0x2e5   : > { %3449 = verf.f32 %v1224_v17  ;;  %v1226_v20 = vmul.f32 0.70710677, %v1139_v18  ;;  %v1198_v2 = vmul.f32 0.5, %v1139_v18 }
 0x2e6   : > { %v3440_v21 = vpop.eup %3439  ;;  %3451 = verf.f32 %v1225_v19 }
 0x2e7   : > { %v3442_v23 = vpop.eup %3441  ;;  %v1275_v25 = vadd.f32 1.0, %v3440_v21  ;;  %3453 = verf.f32 %v1226_v20  ;;  %v1142_v26 = vpop.f32.mrb[8].mxu1 }
 0x2e8   : > { %v3444_v28 = vpop.eup %3443  ;;  %v1276_v27 = vadd.f32 1.0, %v3442_v23  ;;  %v4474_v29 = vadd.f32 %v1142_v26, %v4459_v59  ;;  %v1144_v32 = vpop.f32.mrb[9].mxu1 }
 0x2e9   : > { %v3446_v30 = vpop.eup %3445  ;;  %v1277_v10 = vadd.f32 1.0, %v3444_v28  ;;  %v4477_v16 = vadd.f32 %v1144_v32, %v4463_v60  ;;  %v1146_v22 = vpop.f32.mrb[10].mxu1  ;;  %v1303_v31 = vmul.f32 %v1275_v25, %v1191_v33 }
 0x2ea   : > { %v1278_v34 = vadd.f32 1.0, %v3446_v30  ;;  %v1227_v35 = vmul.f32 0.70710677, %v4474_v29  ;;  %v1148_v36 = vpop.f32.mrb[11].mxu1  ;;  %v1147_v42 = vadd.f32 %v1146_v22, %v4459_v59  ;;  %v1304_v43 = vmul.f32 %v1276_v27, %v1192_v15 }
 0x2eb   : > { %v1305_v37 = vmul.f32 %v1277_v10, %v1193_v9  ;;  %v1228_v38 = vmul.f32 0.70710677, %v4477_v16  ;;  %v1149_v46 = vadd.f32 %v1148_v36, %v4463_v60  ;;  %v1199_v30 = vmul.f32 0.5, %v4474_v29 }
 0x2ec   : > { %v1306_v45 = vmul.f32 %v1278_v34, %v1194_v24  ;;  %3455 = verf.f32 %v1227_v35  ;;  %v1229_v50 = vmul.f32 0.70710677, %v1147_v42  ;;  %v1200_v15 = vmul.f32 0.5, %v4477_v16 }
 0x2ed   : > { %v1331_v40 = vpack.c.bf16 %v1305_v37, %v1303_v31  ;;  %3457 = verf.f32 %v1228_v38  ;;  %v1230_v51 = vmul.f32 0.70710677, %v1149_v46  ;;  %v1201_v24 = vmul.f32 0.5, %v1147_v42 }
 0x2ee   : > { %v3448_v47 = vpop.eup %3447  ;;  %v1332_v53 = vpack.c.bf16 %v1306_v45, %v1304_v43  ;;  %3459 = verf.f32 %v1229_v50  ;;  %v1202_v31 = vmul.f32 0.5, %v1149_v46 }
 0x2ef   : > { %v3450_v54 = vpop.eup %3449  ;;  %v1279_v56 = vadd.f32 1.0, %v3448_v47  ;;  %v1152_v57 = vpop.f32.mrb[12].mxu1  ;;  %3461 = verf.f32 %v1230_v51 }
 0x2f0   : > { %v3452_v58 = vpop.eup %3451  ;;  %v1280_v39 = vadd.f32 1.0, %v3450_v54  ;;  %v4484_v44 = vadd.f32 %v1152_v57, %v4459_v59  ;;  %v1154_v41 = vpop.f32.mrb[13].mxu1  ;;  %1512 = vmatprep.mubr.bf16.mxu0 %v1332_v53 }
 0x2f1   : > { %v3454_v62 = vpop.eup %3453  ;;  %v1281_v0 = vadd.f32 1.0, %v3452_v58  ;;  %v4487_v48 = vadd.f32 %v1154_v41, %v4463_v60  ;;  %v1156_v49 = vpop.f32.mrb[14].mxu1  ;;  %1513 = vmatmul.mubr.bf16.vlgmr.msra.gmra.mrb[28].mxu0 %v1331_v40  ;;  %v1307_v11 = vmul.f32 %v1279_v56, %v1195_v55 }
 0x2f2   : > { %v1282_v4 = vadd.f32 1.0, %v3454_v62  ;;  %v1231_v5 = vmul.f32 0.70710677, %v4484_v44  ;;  %v1158_v6 = vpop.f32.mrb[15].mxu1  ;;  %v1157_v8 = vadd.f32 %v1156_v49, %v4459_v59  ;;  %v1308_v61 = vmul.f32 %v1280_v39, %v1196_v1 }
 0x2f3   : > { %v1309_v7 = vmul.f32 %v1281_v0, %v1197_v63  ;;  %v1232_v13 = vmul.f32 0.70710677, %v4487_v48  ;;  %v1159_v17 = vadd.f32 %v1158_v6, %v4463_v60  ;;  %v1203_v62 = vmul.f32 0.5, %v4484_v44 }
 0x2f4   : > { %v1310_v14 = vmul.f32 %v1282_v4, %v1198_v2  ;;  %3463 = verf.f32 %v1231_v5  ;;  %v1233_v19 = vmul.f32 0.70710677, %v1157_v8  ;;  %v1204_v1 = vmul.f32 0.5, %v4487_v48 }
 0x2f5   : > { %3465 = verf.f32 %v1232_v13  ;;  %v1333_v20 = vpack.c.bf16 %v1309_v7, %v1307_v11  ;;  %v1234_v18 = vmul.f32 0.70710677, %v1159_v17  ;;  %v1205_v2 = vmul.f32 0.5, %v1157_v8 }
 0x2f6   : > { %v3456_v12 = vpop.eup %3455  ;;  %v1334_v21 = vpack.c.bf16 %v1310_v14, %v1308_v61  ;;  %3467 = verf.f32 %v1233_v19  ;;  %v1206_v11 = vmul.f32 0.5, %v1159_v17 }
 0x2f7   : > { %v3458_v23 = vpop.eup %3457  ;;  %v1162_v25 = vpop.f32.mrb[16].mxu1  ;;  %v1283_v26 = vadd.f32 1.0, %v3456_v12  ;;  %3469 = verf.f32 %v1234_v18 }
 0x2f8   : > { %v4494_v28 = vadd.f32 %v1162_v25, %v4459_v59  ;;  %v1164_v27 = vpop.f32.mrb[17].mxu1  ;;  %1520 = vmatprep.mubr.bf16.mxu0 %v1334_v21  ;;  %v3460_v32 = vpop.eup %3459  ;;  %v1284_v33 = vadd.f32 1.0, %v3458_v23 }
 0x2f9   : > { %v4498_v9 = vadd.f32 %v1164_v27, %v4463_v60  ;;  %v1166_v10 = vpop.f32.mrb[18].mxu1  ;;  %1521 = vmatmul.mubr.bf16.gmra.mrb[32].mxu0 %v1333_v20  ;;  %v3462_v22 = vpop.eup %3461  ;;  %v1285_v34 = vadd.f32 1.0, %v3460_v32  ;;  %v1311_v43 = vmul.f32 %v1283_v26, %v1199_v30 }
 0x2fa   : > { %v1235_v35 = vmul.f32 0.70710677, %v4494_v28  ;;  %v1168_v36 = vpop.f32.mrb[19].mxu1  ;;  %v1286_v37 = vadd.f32 1.0, %v3462_v22  ;;  %v4504_v29 = vadd.f32 %v1166_v10, %v4459_v59  ;;  %v1312_v50 = vmul.f32 %v1284_v33, %v1200_v15 }
 0x2fb   : > { %v1236_v38 = vmul.f32 0.70710677, %v4498_v9  ;;  %v1313_v45 = vmul.f32 %v1285_v34, %v1201_v24  ;;  %v4507_v40 = vadd.f32 %v1168_v36, %v4463_v60  ;;  %v1207_v33 = vmul.f32 0.5, %v4494_v28 }
 0x2fc   : > { %3471 = verf.f32 %v1235_v35  ;;  %v1314_v16 = vmul.f32 %v1286_v37, %v1202_v31  ;;  %v1237_v42 = vmul.f32 0.70710677, %v4504_v29  ;;  %v1208_v34 = vmul.f32 0.5, %v4498_v9 }
 0x2fd   : > { %3473 = verf.f32 %v1236_v38  ;;  %v1238_v46 = vmul.f32 0.70710677, %v4507_v40  ;;  %v1335_v51 = vpack.c.bf16 %v1313_v45, %v1311_v43  ;;  %v1209_v35 = vmul.f32 0.5, %v4504_v29 }
 0x2fe   : > { %v3464_v47 = vpop.eup %3463  ;;  %3475 = verf.f32 %v1237_v42  ;;  %v1336_v56 = vpack.c.bf16 %v1314_v16, %v1312_v50  ;;  %v1210_v38 = vmul.f32 0.5, %v4507_v40 }
 0x2ff   : > { %v3466_v53 = vpop.eup %3465  ;;  %v1172_v54 = vpop.f32.mrb[20].mxu1  ;;  %v1287_v57 = vadd.f32 1.0, %v3464_v47  ;;  %3477 = verf.f32 %v1238_v46 }
 0x300   : > { %v4512_v58 = vadd.f32 %v1172_v54, %v4459_v59  ;;  %v1174_v39 = vpop.f32.mrb[21].mxu1  ;;  %v3468_v41 = vpop.eup %3467  ;;  %v1288_v55 = vadd.f32 1.0, %v3466_v53  ;;  %1528 = vmatprep.mubr.bf16.mxu0 %v1336_v56 }
 0x301   : > { %v4516_v63 = vadd.f32 %v1174_v39, %v4463_v60  ;;  %v1176_v0 = vpop.f32.mrb[22].mxu1  ;;  %v3470_v49 = vpop.eup %3469  ;;  %v1289_v4 = vadd.f32 1.0, %v3468_v41  ;;  %1529 = vmatmul.mubr.bf16.gmra.mrb[36].mxu0 %v1335_v51  ;;  %v1315_v61 = vmul.f32 %v1287_v57, %v1203_v62 }
 0x302   : > { %v1239_v5 = vmul.f32 0.70710677, %v4512_v58  ;;  %v1178_v6 = vpop.f32.mrb[23].mxu1  ;;  %v1290_v7 = vadd.f32 1.0, %v3470_v49  ;;  %v1177_v44 = vadd.f32 %v1176_v0, %v4459_v59  ;;  %v1316_v20 = vmul.f32 %v1288_v55, %v1204_v1 }
 0x303   : > { %v1240_v13 = vmul.f32 0.70710677, %v4516_v63  ;;  %v1317_v14 = vmul.f32 %v1289_v4, %v1205_v2  ;;  %v1179_v19 = vadd.f32 %v1178_v6, %v4463_v60  ;;  %v1211_v41 = vmul.f32 0.5, %v4512_v58 }
 0x304   : > { %3479 = verf.f32 %v1239_v5  ;;  %v1318_v12 = vmul.f32 %v1290_v7, %v1206_v11  ;;  %v1241_v48 = vmul.f32 0.70710677, %v1177_v44  ;;  %v1213_v62 = vmul.f32 0.5, %v1177_v44 }
 0x305   : > { %3481 = verf.f32 %v1240_v13  ;;  %v1242_v18 = vmul.f32 0.70710677, %v1179_v19  ;;  %v1337_v21 = vpack.c.bf16 %v1317_v14, %v1315_v61  ;;  %v1212_v55 = vmul.f32 0.5, %v4516_v63 }
 0x306   : > { %v3472_v8 = vpop.eup %3471  ;;  %3483 = verf.f32 %v1241_v48  ;;  %v1338_v25 = vpack.c.bf16 %v1318_v12, %v1316_v20  ;;  %v1214_v0 = vmul.f32 0.5, %v1179_v19 }
 0x307   : > { %v3474_v23 = vpop.eup %3473  ;;  %v1182_v17 = vpop.f32.mrb[24].mxu1  ;;  %v1291_v26 = vadd.f32 1.0, %v3472_v8  ;;  %3485 = verf.f32 %v1242_v18 }
 0x308   : > { %v1183_v27 = vadd.f32 %v1182_v17, %v4459_v59  ;;  %v1184_v32 = vpop.f32.mrb[25].mxu1  ;;  %v3476_v30 = vpop.eup %3475  ;;  %v1292_v10 = vadd.f32 1.0, %v3474_v23  ;;  %1536 = vmatprep.mubr.bf16.mxu0 %v1338_v25 }
 0x309   : > { %v1185_v22 = vadd.f32 %v1184_v32, %v4463_v60  ;;  %v1186_v15 = vpop.f32.mrb[26].mxu1  ;;  %v3478_v24 = vpop.eup %3477  ;;  %v1293_v36 = vadd.f32 1.0, %v3476_v30  ;;  %1537 = vmatmul.mubr.bf16.gmra.mrb[40].mxu0 %v1337_v21  ;;  %v1319_v50 = vmul.f32 %v1291_v26, %v1207_v33  ;;  %v3381_v32 = vld [vmem:[#allocation14 + $0x30] sm:$0xff]   ;;  %v3382_v30 = vld [vmem:[#allocation14 + $0x38] sm:$0xff]  }
 0x30a   : > { %v1243_v31 = vmul.f32 0.70710677, %v1183_v27  ;;  %v1188_v37 = vpop.f32.mrb[27].mxu1  ;;  %v1294_v43 = vadd.f32 1.0, %v3478_v24  ;;  %v1187_v28 = vadd.f32 %v1186_v15, %v4459_v59  ;;  %v1320_v47 = vmul.f32 %v1292_v10, %v1208_v34  ;;  %3054 = vmatpush3.bf16.xpose.msra.mxu1 %v3381_v32  ;;  %v4534_v33 = vld [vmem:[#allocation13] ss:$0 sm:$0xff] }
 0x30b   : > { %v1244_v45 = vmul.f32 0.70710677, %v1185_v22  ;;  %v1321_v16 = vmul.f32 %v1293_v36, %v1209_v35  ;;  %v1189_v42 = vadd.f32 %v1188_v37, %v4463_v60  ;;  %v1215_v44 = vmul.f32 0.5, %v1183_v27  ;;  %3055 = vmatprep.subr.bf16.mxu1 %v3998_v52 }
 0x30c   : > { %3487 = verf.f32 %v1243_v31  ;;  %v1322_v46 = vmul.f32 %v1294_v43, %v1210_v38  ;;  %v1245_v9 = vmul.f32 0.70710677, %v1187_v28  ;;  %v1217_v12 = vmul.f32 0.5, %v1187_v28 }
 0x30d   : > { %3489 = verf.f32 %v1244_v45  ;;  %v1246_v51 = vmul.f32 0.70710677, %v1189_v42  ;;  %v1339_v53 = vpack.c.bf16 %v1321_v16, %v1319_v50  ;;  %v1216_v63 = vmul.f32 0.5, %v1185_v22 }
 0x30e   : > { %v3480_v29 = vpop.eup %3479  ;;  %3491 = verf.f32 %v1245_v9  ;;  %v1340_v56 = vpack.c.bf16 %v1322_v46, %v1320_v47  ;;  %v1218_v19 = vmul.f32 0.5, %v1189_v42 }
 0x30f   : > { %v3482_v54 = vpop.eup %3481  ;;  %v1295_v40 = vadd.f32 1.0, %v3480_v29  ;;  %3493 = verf.f32 %v1246_v51 }
 0x310   : > { %v3484_v57 = vpop.eup %3483  ;;  %v1296_v39 = vadd.f32 1.0, %v3482_v54  ;;  %1544 = vmatprep.mubr.bf16.mxu0 %v1340_v56 }
 0x311   : > { %v3486_v59 = vpop.eup %3485  ;;  %v1297_v60 = vadd.f32 1.0, %v3484_v57  ;;  %1545 = vmatmul.mubr.bf16.gmra.mrb[44].mxu0 %v1339_v53  ;;  %v1323_v1 = vmul.f32 %v1295_v40, %v1211_v41 }
 0x312   : > { %v1298_v49 = vadd.f32 1.0, %v3486_v59  ;;  %v1324_v4 = vmul.f32 %v1296_v39, %v1212_v55  ;;  %3056 = vmatpush3.bf16.xpose.msra.mxu1 %v3382_v30 }
 0x313   : > { %v1325_v2 = vmul.f32 %v1297_v60, %v1213_v62 }
 0x314   : > { %v1326_v5 = vmul.f32 %v1298_v49, %v1214_v0 }
 0x315   : > { %v1341_v11 = vpack.c.bf16 %v1325_v2, %v1323_v1 }
 0x316   : > { %v3488_v6 = vpop.eup %3487  ;;  %v1342_v13 = vpack.c.bf16 %v1326_v5, %v1324_v4 }
 0x317   : > { %v3490_v7 = vpop.eup %3489  ;;  %v1299_v61 = vadd.f32 1.0, %v3488_v6 }
 0x318   : > { %v3492_v14 = vpop.eup %3491  ;;  %v1300_v20 = vadd.f32 1.0, %v3490_v7  ;;  %1552 = vmatprep.mubr.bf16.mxu0 %v1342_v13 }
 0x319   : > { %v3494_v58 = vpop.eup %3493  ;;  %v1301_v48 = vadd.f32 1.0, %v3492_v14  ;;  %1553 = vmatmul.mubr.bf16.gmra.mrb[48].mxu0 %v1341_v11  ;;  %v1327_v18 = vmul.f32 %v1299_v61, %v1215_v44 }
 0x31a   : > { %v1302_v8 = vadd.f32 1.0, %v3494_v58  ;;  %v1328_v23 = vmul.f32 %v1300_v20, %v1216_v63 }
 0x31b   : > { %v1329_v21 = vmul.f32 %v1301_v48, %v1217_v12 }
 0x31c   : > { %v1330_v17 = vmul.f32 %v1302_v8, %v1218_v19 }
 0x31d   : > { %v1343_v25 = vpack.c.bf16 %v1329_v21, %v1327_v18 }
 0x31e   : > { %v1344_v26 = vpack.c.bf16 %v1330_v17, %v1328_v23 }
 0x320   : > { %1560 = vmatprep.mubr.bf16.mxu0 %v1344_v26 }
 0x321   : > { %1561 = vmatmul.mubr.bf16.gmra.mrb[52].mxu0 %v1343_v25 }
 0x3c4   : > { %v2960_v27 = vpop.f32.mrb[28].mxu0 }
 0x3c5   : > { %v2961_v10 = vpop.f32.mrb[29].mxu0 }
 0x3c6   : > { %v2962_v22 = vadd.f32 %v2961_v10, %v2960_v27  ;;  %v2963_v15 = vpop.f32.mrb[30].mxu0 }
 0x3c7   : > { %v2964_v24 = vpop.f32.mrb[31].mxu0 }
 0x3c8   : > { %v4537_v34 = vadd.f32 %v2962_v22, %v4534_v33  ;;  %v2965_v35 = vadd.f32 %v2964_v24, %v2963_v15 }
 0x3ca   : > { %v4540_v36 = vadd.f32 %v2965_v35, %v4534_v33  ;;  %v1569_v31 = vmul.f32 %v4537_v34, %v4537_v34 }
 0x3cc   : > { %v4546_v37 = vpack.c.bf16 %v4540_v36, %v4537_v34  ;;  %v2966_v38 = vpop.f32.mrb[32].mxu0  ;;  %1583 = vadd.xlane.f32.xlu0 %v1569_v31  ;;  %v1570_v50 = vmul.f32 %v4540_v36, %v4540_v36 }
 0x3cd   : > { %v2967_v43 = vpop.f32.mrb[33].mxu0 }
 0x3ce   : > { %v2968_v45 = vadd.f32 %v2967_v43, %v2966_v38  ;;  %v2969_v28 = vpop.f32.mrb[34].mxu0  ;;  %3085 = vmatprep.subr.bf16.mxu0 %v4546_v37  ;;  %3133 = vmatprep.subr.bf16.mxu1 %v4546_v37 }
 0x3cf   : > { %v2970_v16 = vpop.f32.mrb[35].mxu0  ;;  %3086 = vmatpush3.bf16.msra.mxu0 %v4546_v37 }
 0x3d0   : > { %v4554_v42 = vadd.f32 %v2968_v45, %v4534_v33  ;;  %v2971_v47 = vadd.f32 %v2970_v16, %v2969_v28  ;;  %1585 = vadd.xlane.f32.xlu0 %v1570_v50 }
 0x3d2   : > { %v4557_v46 = vadd.f32 %v2971_v47, %v4534_v33  ;;  %v1571_v9 = vmul.f32 %v4554_v42, %v4554_v42 }
 0x3d4   : > { %v4563_v29 = vpack.c.bf16 %v4557_v46, %v4554_v42  ;;  %1587 = vadd.xlane.f32.xlu1 %v1571_v9  ;;  %v2972_v51 = vpop.f32.mrb[36].mxu0  ;;  %v1572_v54 = vmul.f32 %v4557_v46, %v4557_v46 }
 0x3d5   : > { %v2973_v53 = vpop.f32.mrb[37].mxu0 }
 0x3d6   : > { %3087 = vmatprep.subr.bf16.mxu0 %v4563_v29  ;;  %v2974_v56 = vadd.f32 %v2973_v53, %v2972_v51  ;;  %v2975_v40 = vpop.f32.mrb[38].mxu0 }
 0x3d7   : > { %3088 = vmatpush3.bf16.msra.mxu0 %v4563_v29  ;;  %v2976_v57 = vpop.f32.mrb[39].mxu0 }
 0x3d8   : > { %1589 = vadd.xlane.f32.xlu1 %v1572_v54  ;;  %v4570_v39 = vadd.f32 %v2974_v56, %v4534_v33  ;;  %v2977_v59 = vadd.f32 %v2976_v57, %v2975_v40 }
 0x3da   : > { %v4573_v41 = vadd.f32 %v2977_v59, %v4534_v33  ;;  %v1573_v62 = vmul.f32 %v4570_v39, %v4570_v39 }
 0x3dc   : > { %v4579_v60 = vpack.c.bf16 %v4573_v41, %v4570_v39  ;;  %v2978_v55 = vpop.f32.mrb[40].mxu0  ;;  %1591 = vadd.xlane.f32.xlu0 %v1573_v62  ;;  %v1574_v0 = vmul.f32 %v4573_v41, %v4573_v41 }
 0x3dd   : > { %v2979_v49 = vpop.f32.mrb[41].mxu0 }
 0x3de   : > { %v2980_v1 = vadd.f32 %v2979_v49, %v2978_v55  ;;  %v2981_v2 = vpop.f32.mrb[42].mxu0  ;;  %1593 = vadd.xlane.f32.xlu1 %v1574_v0  ;;  %3089 = vmatprep.subr.bf16.mxu0 %v4579_v60 }
 0x3df   : > { %v2982_v4 = vpop.f32.mrb[43].mxu0  ;;  %3090 = vmatpush3.bf16.msra.mxu0 %v4579_v60 }
 0x3e0   : > { %v4586_v5 = vadd.f32 %v2980_v1, %v4534_v33  ;;  %v2983_v6 = vadd.f32 %v2982_v4, %v2981_v2 }
 0x3e2   : > { %v4589_v11 = vadd.f32 %v2983_v6, %v4534_v33  ;;  %v4593_v7 = vpack.c.bf16 %v4586_v5, %v4586_v5  ;;  %v1575_v13 = vmul.f32 %v4586_v5, %v4586_v5 }
 0x3e4   : > { %v2984_v61 = vpop.f32.mrb[44].mxu0  ;;  %3141 = vmatprep.subr.msk.bf16.mxu0 %vm2258_vm0, %v4593_v7  ;;  %1595 = vadd.xlane.f32.xlu0 %v1575_v13  ;;  %v4601_v14 = vsel %vm2258_vm0, %v4593_v7, 0  ;;  %v1576_v20 = vmul.f32 %v4589_v11, %v4589_v11  ;;  %v2177_v21 = vpack.c.bf16 %v4589_v11, %v4586_v5 }
 0x3e5   : > { %v2985_v58 = vpop.f32.mrb[45].mxu0  ;;  %3092 = vmatpush3.bf16.msra.mxu0 %v4601_v14 }
 0x3e6   : > { %v2986_v44 = vadd.f32 %v2985_v58, %v2984_v61  ;;  %v2987_v12 = vpop.f32.mrb[46].mxu0  ;;  %1597 = vadd.xlane.f32.xlu1 %v1576_v20  ;;  %v2195_v27 = vunpack.c.h.b16 %v2177_v21 }
 0x3e7   : > { %v2988_v48 = vpop.f32.mrb[47].mxu0 }
 0x3e8   : > { %v4607_v63 = vadd.f32 %v2986_v44, %v4534_v33  ;;  %v2989_v19 = vadd.f32 %v2988_v48, %v2987_v12 }
 0x3ea   : > { %v4610_v8 = vadd.f32 %v2989_v19, %v4534_v33  ;;  %v1577_v18 = vmul.f32 %v4607_v63, %v4607_v63 }
 0x3ec   : > { %v4618_v23 = vpack.c.bf16 %v4610_v8, %v4607_v63  ;;  %v2990_v17 = vpop.f32.mrb[48].mxu0  ;;  %1599 = vadd.xlane.f32.xlu0 %v1577_v18  ;;  %v1578_v25 = vmul.f32 %v4610_v8, %v4610_v8 }
 0x3ed   : > { %v2991_v26 = vpop.f32.mrb[49].mxu0 }
 0x3ee   : > { %v2992_v32 = vadd.f32 %v2991_v26, %v2990_v17  ;;  %v2993_v30 = vpop.f32.mrb[50].mxu0  ;;  %1601 = vadd.xlane.f32.xlu1 %v1578_v25  ;;  %v2196_v10 = vunpack.c.l.b16 %v4618_v23 }
 0x3ef   : > { %v2994_v22 = vpop.f32.mrb[51].mxu0 }
 0x3f0   : > { %v4626_v15 = vadd.f32 %v2992_v32, %v4534_v33  ;;  %v2995_v24 = vadd.f32 %v2994_v22, %v2993_v30  ;;  %v4628_v35 = vpack.c.b16 %v2196_v10, %v2195_v27 }
 0x3f2   : > { %v4631_v31 = vadd.f32 %v2995_v24, %v4534_v33  ;;  %3109 = vmatprep.subr.bf16.mxu0 %v4628_v35  ;;  %v1579_v38 = vmul.f32 %v4626_v15, %v4626_v15 }
 0x3f4   : > { %v2996_v43 = vpop.f32.mrb[52].mxu0  ;;  %1603 = vadd.xlane.f32.xlu0 %v1579_v38  ;;  %v1580_v45 = vmul.f32 %v4631_v31, %v4631_v31 }
 0x3f5   : > { %v2997_v28 = vpop.f32.mrb[53].mxu0 }
 0x3f6   : > { %v2998_v50 = vadd.f32 %v2997_v28, %v2996_v43  ;;  %v2999_v16 = vpop.f32.mrb[54].mxu0  ;;  %1605 = vadd.xlane.f32.xlu1 %v1580_v45 }
 0x3f7   : > { %v3000_v47 = vpop.f32.mrb[55].mxu0 }
 0x3f8   : > { %v4639_v9 = vadd.f32 %v2998_v50, %v4534_v33  ;;  %v3001_v51 = vadd.f32 %v3000_v47, %v2999_v16 }
 0x3fa   : > { %v4642_v53 = vadd.f32 %v3001_v51, %v4534_v33  ;;  %v1581_v54 = vmul.f32 %v4639_v9, %v4639_v9 }
 0x3fc   : > { %1607 = vadd.xlane.f32.xlu0 %v1581_v54  ;;  %v1582_v56 = vmul.f32 %v4642_v53, %v4642_v53 }
 0x3fe   : > { %1609 = vadd.xlane.f32.xlu1 %v1582_v56 }
 0x459   : > { %v1584_v40 = vpop.xlane.xlu0 %1583 }
 0x45a   : > { %v1611_v57 = vmax.f32 %v1584_v40, 1e-24 }
 0x45c   : > { %3495 = vrsqrt.f32 %v1611_v57 }
 0x45d   : > { %v1586_v59 = vpop.xlane.xlu0 %1585 }
 0x45e   : > { %v1612_v62 = vmax.f32 %v1586_v59, 1e-24 }
 0x460   : > { %3497 = vrsqrt.f32 %v1612_v62 }
 0x461   : > { %v1588_v55 = vpop.xlane.xlu1 %1587 }
 0x462   : > { %v1613_v0 = vmax.f32 %v1588_v55, 1e-24 }
 0x464   : > { %3499 = vrsqrt.f32 %v1613_v0 }
 0x465   : > { %v1590_v49 = vpop.xlane.xlu1 %1589 }
 0x466   : > { %v1614_v33 = vmax.f32 %v1590_v49, 1e-24  ;;  %v3496_v1 = vpop.eup %3495 }
 0x467   : > { %v1639_v6 = vmul.f32 %v3496_v1, %v4537_v34 }
 0x468   : > { %3501 = vrsqrt.f32 %v1614_v33 }
 0x469   : > { %v1592_v4 = vpop.xlane.xlu0 %1591 }
 0x46a   : > { %v3498_v2 = vpop.eup %3497  ;;  %v1615_v61 = vmax.f32 %v1592_v4, 1e-24 }
 0x46b   : > { %v1640_v13 = vmul.f32 %v3498_v2, %v4540_v36  ;;  %v1594_v20 = vpop.xlane.xlu1 %1593 }
 0x46c   : > { %v1616_v58 = vmax.f32 %v1594_v20, 1e-24  ;;  %3503 = vrsqrt.f32 %v1615_v61 }
 0x46d   : > { %v1653_v44 = vpack.c.bf16 %v1640_v13, %v1639_v6 }
 0x46e   : > { %3505 = vrsqrt.f32 %v1616_v58  ;;  %v3500_v12 = vpop.eup %3499 }
 0x46f   : > { %3058 = vmatmul.mubr.bf16.vlgmr.msra.gmra.mrb[28].mxu1 %v1653_v44  ;;  %v1641_v36 = vmul.f32 %v3500_v12, %v4554_v42 }
 0x470   : > { %3137 = vmatpush3.bf16.msra.mxu1 %v4546_v37  ;;  %3061 = vmatprep.mubr.msk.bf16.mxu1 %vm3999_vm1, %v3998_v52 }
 0x471   : > { %3134 = vmatprep.subr.bf16.mxu1 %v4563_v29  ;;  %v1596_v19 = vpop.xlane.xlu0 %1595 }
 0x472   : > { %v3502_v48 = vpop.eup %3501  ;;  %v1617_v34 = vmax.f32 %v1596_v19, 1e-24 }
 0x473   : > { %v1642_v18 = vmul.f32 %v3502_v48, %v4557_v46  ;;  %v1598_v21 = vpop.xlane.xlu1 %1597 }
 0x474   : > { %3138 = vmatpush3.bf16.msra.mxu1 %v4563_v29  ;;  %v1618_v17 = vmax.f32 %v1598_v21, 1e-24  ;;  %3507 = vrsqrt.f32 %v1617_v34 }
 0x475   : > { %3135 = vmatprep.subr.bf16.mxu1 %v4579_v60  ;;  %v1654_v25 = vpack.c.bf16 %v1642_v18, %v1641_v36 }
 0x476   : > { %3509 = vrsqrt.f32 %v1618_v17  ;;  %v3504_v37 = vpop.eup %3503 }
 0x477   : > { %3062 = vmatmul.mubr.bf16.gmra.mrb[32].mxu1 %v1654_v25  ;;  %v1643_v32 = vmul.f32 %v3504_v37, %v4570_v39 }
 0x478   : > { %3139 = vmatpush3.bf16.msra.mxu1 %v4579_v60  ;;  %3065 = vmatprep.mubr.msk.bf16.mxu1 %vm3999_vm1, %v3998_v52  ;;  %v3506_v26 = vpop.eup %3505 }
 0x479   : > { %3142 = vmatprep.subr.msk.bf16.mxu1 %vm2258_vm0, %v4593_v7  ;;  %v1600_v42 = vpop.xlane.xlu0 %1599  ;;  %v1644_v46 = vmul.f32 %v3506_v26, %v4573_v41 }
 0x47a   : > { %v1619_v29 = vmax.f32 %v1600_v42, 1e-24 }
 0x47b   : > { %v1602_v30 = vpop.xlane.xlu1 %1601  ;;  %v1655_v10 = vpack.c.bf16 %v1644_v46, %v1643_v32 }
 0x47c   : > { %3140 = vmatpush3.bf16.msra.mxu1 %v4601_v14  ;;  %v1620_v27 = vmax.f32 %v1602_v30, 1e-24  ;;  %3511 = vrsqrt.f32 %v1619_v29 }
 0x47e   : > { %3513 = vrsqrt.f32 %v1620_v27  ;;  %v3508_v60 = vpop.eup %3507 }
 0x47f   : > { %3066 = vmatmul.mubr.bf16.gmra.mrb[36].mxu1 %v1655_v10  ;;  %v1645_v38 = vmul.f32 %v3508_v60, %v4586_v5 }
 0x480   : > { %3069 = vmatprep.mubr.msk.bf16.mxu1 %vm3999_vm1, %v3998_v52  ;;  %v3510_v22 = vpop.eup %3509 }
 0x481   : > { %v1604_v7 = vpop.xlane.xlu0 %1603  ;;  %v1646_v24 = vmul.f32 %v3510_v22, %v4589_v11 }
 0x482   : > { %v1621_v41 = vmax.f32 %v1604_v7, 1e-24 }
 0x483   : > { %v1606_v39 = vpop.xlane.xlu1 %1605  ;;  %v1656_v45 = vpack.c.bf16 %v1646_v24, %v1645_v38 }
 0x484   : > { %v1622_v43 = vmax.f32 %v1606_v39, 1e-24  ;;  %3515 = vrsqrt.f32 %v1621_v41 }
 0x486   : > { %3517 = vrsqrt.f32 %v1622_v43  ;;  %v3512_v14 = vpop.eup %3511 }
 0x487   : > { %3070 = vmatmul.mubr.bf16.gmra.mrb[40].mxu1 %v1656_v45  ;;  %v1647_v11 = vmul.f32 %v3512_v14, %v4607_v63 }
 0x488   : > { %3073 = vmatprep.mubr.msk.bf16.mxu1 %vm3999_vm1, %v3998_v52  ;;  %v3514_v28 = vpop.eup %3513 }
 0x489   : > { %v1608_v50 = vpop.xlane.xlu0 %1607  ;;  %v1648_v16 = vmul.f32 %v3514_v28, %v4610_v8 }
 0x48a   : > { %v1623_v47 = vmax.f32 %v1608_v50, 1e-24 }
 0x48b   : > { %v1610_v51 = vpop.xlane.xlu1 %1609  ;;  %v1657_v5 = vpack.c.bf16 %v1648_v16, %v1647_v11 }
 0x48c   : > { %v1624_v54 = vmax.f32 %v1610_v51, 1e-24  ;;  %3519 = vrsqrt.f32 %v1623_v47 }
 0x48e   : > { %3521 = vrsqrt.f32 %v1624_v54  ;;  %v3516_v56 = vpop.eup %3515 }
 0x48f   : > { %3074 = vmatmul.mubr.bf16.gmra.mrb[44].mxu1 %v1657_v5  ;;  %v1649_v59 = vmul.f32 %v3516_v56, %v4626_v15 }
 0x490   : > { %3077 = vmatprep.mubr.msk.bf16.mxu1 %vm3999_vm1, %v3998_v52  ;;  %v3518_v40 = vpop.eup %3517 }
 0x491   : > { %v1650_v57 = vmul.f32 %v3518_v40, %v4631_v31 }
 0x493   : > { %v1658_v8 = vpack.c.bf16 %v1650_v57, %v1649_v59 }
 0x496   : > { %v3520_v62 = vpop.eup %3519 }
 0x497   : > { %3078 = vmatmul.mubr.bf16.gmra.mrb[48].mxu1 %v1658_v8  ;;  %v1651_v0 = vmul.f32 %v3520_v62, %v4639_v9 }
 0x498   : > { %3081 = vmatprep.mubr.msk.bf16.mxu1 %vm3999_vm1, %v3998_v52  ;;  %v3522_v63 = vpop.eup %3521 }
 0x499   : > { %v1652_v55 = vmul.f32 %v3522_v63, %v4642_v53 }
 0x49b   : > { %v1659_v49 = vpack.c.bf16 %v1652_v55, %v1651_v0 }
 0x49f   : > { %3082 = vmatmul.mubr.bf16.gmra.mrb[52].mxu1 %v1659_v49 }
 0x542   : > { %v1758_v33 = vpop.f32.mrb[28].mxu1 }
 0x543   : > { %1813 = vst [vmem:[%s4683_s8] sm:$0xff] %v1758_v33  ;;  %v3059_v1 = vpop.f32.mrb[29].mxu1  ;;  %v4686_v2 = vmul.f32 14.285714, %v1758_v33 }
 0x544   : > { %v1761_v52 = vpop.f32.mrb[30].mxu1 }
 0x545   : > { %1814 = vst [vmem:[%s4683_s8 + $0x8] sm:$0xff] %v1761_v52  ;;  %1841 = vmax.xlane.f32.xlu0 %v4686_v2  ;;  %v3060_v4 = vpop.f32.mrb[31].mxu1  ;;  %v4690_v6 = vmul.f32 14.285714, %v1761_v52 }
 0x547   : > { %1843 = vmax.xlane.f32.xlu1 %v4690_v6 }
 0x54a   : > { %v1766_v13 = vpop.f32.mrb[32].mxu1 }
 0x54b   : > { %1815 = vst [vmem:[%s4683_s8 + $0x10] sm:$0xff] %v1766_v13  ;;  %v3063_v61 = vpop.f32.mrb[33].mxu1  ;;  %v4694_v20 = vmul.f32 14.285714, %v1766_v13 }
 0x54c   : > { %v1769_v58 = vpop.f32.mrb[34].mxu1 }
 0x54d   : > { %1816 = vst [vmem:[%s4683_s8 + $0x18] sm:$0xff] %v1769_v58  ;;  %1845 = vmax.xlane.f32.xlu0 %v4694_v20  ;;  %v3064_v44 = vpop.f32.mrb[35].mxu1  ;;  %v4698_v12 = vmul.f32 14.285714, %v1769_v58 }
 0x54f   : > { %1847 = vmax.xlane.f32.xlu1 %v4698_v12 }
 0x552   : > { %v1774_v48 = vpop.f32.mrb[36].mxu1 }
 0x553   : > { %1817 = vst [vmem:[%s4683_s8 + $0x20] sm:$0xff] %v1774_v48  ;;  %v3067_v19 = vpop.f32.mrb[37].mxu1  ;;  %v4702_v34 = vmul.f32 14.285714, %v1774_v48 }
 0x554   : > { %v1777_v36 = vpop.f32.mrb[38].mxu1 }
 0x555   : > { %1818 = vst [vmem:[%s4683_s8 + $0x28] sm:$0xff] %v1777_v36  ;;  %1849 = vmax.xlane.f32.xlu0 %v4702_v34  ;;  %v3068_v18 = vpop.f32.mrb[39].mxu1  ;;  %v4706_v21 = vmul.f32 14.285714, %v1777_v36 }
 0x557   : > { %1851 = vmax.xlane.f32.xlu1 %v4706_v21 }
 0x55a   : > { %v1782_v17 = vpop.f32.mrb[40].mxu1 }
 0x55b   : > { %1819 = vst [vmem:[%s4683_s8 + $0x30] sm:$0xff] %v1782_v17  ;;  %v3071_v25 = vpop.f32.mrb[41].mxu1  ;;  %v4710_v37 = vmul.f32 14.285714, %v1782_v17 }
 0x55c   : > { %v1785_v26 = vpop.f32.mrb[42].mxu1 }
 0x55d   : > { %1820 = vst [vmem:[%s4683_s8 + $0x38] sm:$0xff] %v1785_v26  ;;  %1853 = vmax.xlane.f32.xlu0 %v4710_v37  ;;  %v3072_v42 = vpop.f32.mrb[43].mxu1  ;;  %v4714_v46 = vmul.f32 14.285714, %v1785_v26 }
 0x55f   : > { %1855 = vmax.xlane.f32.xlu1 %v4714_v46 }
 0x562   : > { %v1790_v29 = vpop.f32.mrb[44].mxu1 }
 0x563   : > { %1821 = vst [vmem:[%s4683_s8 + $0x40] sm:$0xff] %v1790_v29  ;;  %v3075_v32 = vpop.f32.mrb[45].mxu1  ;;  %v4718_v30 = vmul.f32 14.285714, %v1790_v29 }
 0x564   : > { %v1793_v27 = vpop.f32.mrb[46].mxu1 }
 0x565   : > { %1822 = vst [vmem:[%s4683_s8 + $0x48] sm:$0xff] %v1793_v27  ;;  %1857 = vmax.xlane.f32.xlu0 %v4718_v30  ;;  %v3076_v10 = vpop.f32.mrb[47].mxu1  ;;  %v4722_v60 = vmul.f32 14.285714, %v1793_v27 }
 0x567   : > { %1859 = vmax.xlane.f32.xlu1 %v4722_v60 }
 0x56a   : > { %v1798_v22 = vpop.f32.mrb[48].mxu1 }
 0x56b   : > { %1823 = vst [vmem:[%s4683_s8 + $0x50] sm:$0xff] %v1798_v22  ;;  %v3079_v7 = vpop.f32.mrb[49].mxu1  ;;  %v4726_v24 = vmul.f32 14.285714, %v1798_v22 }
 0x56c   : > { %v1801_v41 = vpop.f32.mrb[50].mxu1 }
 0x56d   : > { %1824 = vst [vmem:[%s4683_s8 + $0x58] sm:$0xff] %v1801_v41  ;;  %1861 = vmax.xlane.f32.xlu0 %v4726_v24  ;;  %v3080_v38 = vpop.f32.mrb[51].mxu1  ;;  %v4730_v39 = vmul.f32 14.285714, %v1801_v41 }
 0x56f   : > { %1863 = vmax.xlane.f32.xlu1 %v4730_v39 }
 0x572   : > { %v1806_v43 = vpop.f32.mrb[52].mxu1 }
 0x573   : > { %1825 = vst [vmem:[%s4683_s8 + $0x60] sm:$0xff] %v1806_v43  ;;  %v3083_v45 = vpop.f32.mrb[53].mxu1  ;;  %v4734_v14 = vmul.f32 14.285714, %v1806_v43 }
 0x574   : > { %v1809_v28 = vpop.f32.mrb[54].mxu1 }
 0x575   : > { %1826 = vst [vmem:[%s4683_s8 + $0x68] sm:$0xff] %v1809_v28  ;;  %1865 = vmax.xlane.f32.xlu0 %v4734_v14  ;;  %v3084_v50 = vpop.f32.mrb[55].mxu1  ;;  %v4738_v16 = vmul.f32 14.285714, %v1809_v28 }
 0x577   : > { %1867 = vmax.xlane.f32.xlu1 %v4738_v16 }
 0x5d2   : > { %v1842_v47 = vpop.xlane.xlu0 %1841 }
 0x5d3   : > { %v1869_v11 = vsub.f32 %v4686_v2, %v1842_v47 }
 0x5d4   : > { %v1844_v51 = vpop.xlane.xlu1 %1843 }
 0x5d5   : > { %v1883_v54 = vmul.f32 1.442695, %v1869_v11  ;;  %v1870_v5 = vsub.f32 %v4690_v6, %v1844_v51 }
 0x5d7   : > { %3523 = vpow2.f32 %v1883_v54  ;;  %v1885_v56 = vmul.f32 1.442695, %v1870_v5 }
 0x5d9   : > { %3525 = vpow2.f32 %v1885_v56 }
 0x5da   : > { %v1846_v40 = vpop.xlane.xlu0 %1845 }
 0x5db   : > { %v1871_v57 = vsub.f32 %v4694_v20, %v1846_v40 }
 0x5dc   : > { %v1848_v59 = vpop.xlane.xlu1 %1847 }
 0x5dd   : > { %v1887_v8 = vmul.f32 1.442695, %v1871_v57  ;;  %v1872_v62 = vsub.f32 %v4698_v12, %v1848_v59 }
 0x5df   : > { %3527 = vpow2.f32 %v1887_v8  ;;  %v1889_v63 = vmul.f32 1.442695, %v1872_v62 }
 0x5e1   : > { %v4745_v55 = vpop.eup %3523  ;;  %3529 = vpow2.f32 %v1889_v63 }
 0x5e2   : > { %1911 = vadd.xlane.f32.xlu0 %v4745_v55  ;;  %v1850_v0 = vpop.xlane.xlu0 %1849 }
 0x5e3   : > { %v4748_v49 = vpop.eup %3525  ;;  %v1873_v33 = vsub.f32 %v4702_v34, %v1850_v0 }
 0x5e4   : > { %v1852_v1 = vpop.xlane.xlu1 %1851  ;;  %1913 = vadd.xlane.f32.xlu1 %v4748_v49 }
 0x5e5   : > { %v1891_v2 = vmul.f32 1.442695, %v1873_v33  ;;  %v1874_v52 = vsub.f32 %v4706_v21, %v1852_v1 }
 0x5e7   : > { %3531 = vpow2.f32 %v1891_v2  ;;  %v1893_v4 = vmul.f32 1.442695, %v1874_v52 }
 0x5e9   : > { %v4753_v6 = vpop.eup %3527  ;;  %3533 = vpow2.f32 %v1893_v4 }
 0x5ea   : > { %1915 = vadd.xlane.f32.xlu0 %v4753_v6  ;;  %v1854_v13 = vpop.xlane.xlu0 %1853 }
 0x5eb   : > { %v4756_v61 = vpop.eup %3529  ;;  %v1875_v20 = vsub.f32 %v4710_v37, %v1854_v13 }
 0x5ec   : > { %v1856_v58 = vpop.xlane.xlu1 %1855  ;;  %1917 = vadd.xlane.f32.xlu1 %v4756_v61 }
 0x5ed   : > { %v1895_v44 = vmul.f32 1.442695, %v1875_v20  ;;  %v1876_v12 = vsub.f32 %v4714_v46, %v1856_v58 }
 0x5ef   : > { %3535 = vpow2.f32 %v1895_v44  ;;  %v1897_v48 = vmul.f32 1.442695, %v1876_v12 }
 0x5f1   : > { %v4761_v19 = vpop.eup %3531  ;;  %3537 = vpow2.f32 %v1897_v48 }
 0x5f2   : > { %1919 = vadd.xlane.f32.xlu0 %v4761_v19  ;;  %v1858_v34 = vpop.xlane.xlu0 %1857 }
 0x5f3   : > { %v4764_v36 = vpop.eup %3533  ;;  %v1877_v18 = vsub.f32 %v4718_v30, %v1858_v34 }
 0x5f4   : > { %v1860_v21 = vpop.xlane.xlu1 %1859  ;;  %1921 = vadd.xlane.f32.xlu1 %v4764_v36 }
 0x5f5   : > { %v1899_v17 = vmul.f32 1.442695, %v1877_v18  ;;  %v1878_v25 = vsub.f32 %v4722_v60, %v1860_v21 }
 0x5f7   : > { %3539 = vpow2.f32 %v1899_v17  ;;  %v1901_v37 = vmul.f32 1.442695, %v1878_v25 }
 0x5f9   : > { %v4769_v26 = vpop.eup %3535  ;;  %3541 = vpow2.f32 %v1901_v37 }
 0x5fa   : > { %1923 = vadd.xlane.f32.xlu0 %v4769_v26  ;;  %v1862_v42 = vpop.xlane.xlu0 %1861 }
 0x5fb   : > { %v4772_v46 = vpop.eup %3537  ;;  %v1879_v29 = vsub.f32 %v4726_v24, %v1862_v42 }
 0x5fc   : > { %v1864_v32 = vpop.xlane.xlu1 %1863  ;;  %1925 = vadd.xlane.f32.xlu1 %v4772_v46 }
 0x5fd   : > { %v1903_v30 = vmul.f32 1.442695, %v1879_v29  ;;  %v1880_v27 = vsub.f32 %v4730_v39, %v1864_v32 }
 0x5ff   : > { %3543 = vpow2.f32 %v1903_v30  ;;  %v1905_v10 = vmul.f32 1.442695, %v1880_v27 }
 0x601   : > { %v4777_v60 = vpop.eup %3539  ;;  %3545 = vpow2.f32 %v1905_v10 }
 0x602   : > { %1927 = vadd.xlane.f32.xlu0 %v4777_v60  ;;  %v1866_v22 = vpop.xlane.xlu0 %1865 }
 0x603   : > { %v4780_v7 = vpop.eup %3541  ;;  %v1881_v41 = vsub.f32 %v4734_v14, %v1866_v22 }
 0x604   : > { %1929 = vadd.xlane.f32.xlu1 %v4780_v7  ;;  %v1868_v24 = vpop.xlane.xlu1 %1867 }
 0x605   : > { %v1907_v38 = vmul.f32 1.442695, %v1881_v41  ;;  %v1882_v43 = vsub.f32 %v4738_v16, %v1868_v24 }
 0x607   : > { %3547 = vpow2.f32 %v1907_v38  ;;  %v1909_v39 = vmul.f32 1.442695, %v1882_v43 }
 0x609   : > { %v4785_v45 = vpop.eup %3543  ;;  %3549 = vpow2.f32 %v1909_v39 }
 0x60a   : > { %1931 = vadd.xlane.f32.xlu0 %v4785_v45 }
 0x60b   : > { %v4788_v28 = vpop.eup %3545 }
 0x60c   : > { %1933 = vadd.xlane.f32.xlu1 %v4788_v28 }
 0x611   : > { %v4791_v50 = vpop.eup %3547 }
 0x612   : > { %1935 = vadd.xlane.f32.xlu0 %v4791_v50 }
 0x613   : > { %v4794_v14 = vpop.eup %3549 }
 0x614   : > { %1937 = vadd.xlane.f32.xlu1 %v4794_v14 }
 0x66f   : > { %v1912_v16 = vpop.xlane.xlu0 %1911 }
 0x670   : > { %3551 = vrcp.f32 %v1912_v16 }
 0x671   : > { %v1914_v47 = vpop.xlane.xlu1 %1913 }
 0x672   : > { %3553 = vrcp.f32 %v1914_v47 }
 0x677   : > { %v1916_v11 = vpop.xlane.xlu0 %1915 }
 0x678   : > { %3555 = vrcp.f32 %v1916_v11 }
 0x679   : > { %v1918_v51 = vpop.xlane.xlu1 %1917 }
 0x67a   : > { %v3552_v54 = vpop.eup %3551  ;;  %3557 = vrcp.f32 %v1918_v51 }
 0x67b   : > { %v1953_v5 = vmul.f32 %v3552_v54, %v4745_v55 }
 0x67c   : > { %v3554_v56 = vpop.eup %3553 }
 0x67d   : > { %v1954_v40 = vmul.f32 %v3554_v56, %v4748_v49  ;;  %v1967_v59 = vadd.f32 1e-06, %v1953_v5 }
 0x67f   : > { %v1920_v57 = vpop.xlane.xlu0 %1919  ;;  %v1968_v8 = vadd.f32 1e-06, %v1954_v40 }
 0x680   : > { %3559 = vrcp.f32 %v1920_v57 }
 0x681   : > { %v1922_v62 = vpop.xlane.xlu1 %1921  ;;  %v2202_v63 = vpack.c.bf16 %v1968_v8, %v1967_v59  ;;  %v2024_v58 = vadd.f32 %v1968_v8, %v1967_v59 }
 0x682   : > { %v3556_v0 = vpop.eup %3555  ;;  %3561 = vrcp.f32 %v1922_v62 }
 0x683   : > { %2210 = vxpose.xlu0.c.b16.start [1/4] (short) %v2202_v63, 128  ;;  %v1955_v33 = vmul.f32 %v3556_v0, %v4753_v6 }
 0x684   : > { %v3558_v1 = vpop.eup %3557 }
 0x685   : > { %v1956_v2 = vmul.f32 %v3558_v1, %v4756_v61  ;;  %v1969_v4 = vadd.f32 1e-06, %v1955_v33  ;;  %v1988_v61 = vadd.s32 48, %v4370_v3 }
 0x687   : > { %v1924_v52 = vpop.xlane.xlu0 %1923  ;;  %v1970_v55 = vadd.f32 1e-06, %v1956_v2  ;;  %v2025_v48 = vadd.f32 %v2024_v58, %v1969_v4  ;;  %vm1995_vm2 = vcmp.lt.s32.totalorder %v1988_v61, 49  ;;  %v2179_v61 = vpack.c.bf16 %v4631_v31, %v4626_v15 }
 0x688   : > { %3563 = vrcp.f32 %v1924_v52 }
 0x689   : > { %v1926_v13 = vpop.xlane.xlu1 %1925  ;;  %v2203_v49 = vpack.c.bf16 %v1970_v55, %v1969_v4  ;;  %v2026_v17 = vadd.f32 %v2025_v48, %v1970_v55  ;;  %v2199_v15 = vunpack.c.h.b16 %v2179_v61 }
 0x68a   : > { %v3560_v20 = vpop.eup %3559  ;;  %3565 = vrcp.f32 %v1926_v13 }
 0x68b   : > { %2211 = vxpose.xlu0.c.b16.cont [2/4] (short) %v2203_v49, 128  ;;  %v1957_v44 = vmul.f32 %v3560_v20, %v4761_v19 }
 0x68c   : > { %v3562_v12 = vpop.eup %3561 }
 0x68d   : > { %v1958_v34 = vmul.f32 %v3562_v12, %v4764_v36  ;;  %v1971_v18 = vadd.f32 1e-06, %v1957_v44 }
 0x68f   : > { %v1928_v6 = vpop.xlane.xlu0 %1927  ;;  %v1972_v21 = vadd.f32 1e-06, %v1958_v34  ;;  %v2027_v29 = vadd.f32 %v2026_v17, %v1971_v18 }
 0x690   : > { %3567 = vrcp.f32 %v1928_v6 }
 0x691   : > { %v1930_v25 = vpop.xlane.xlu1 %1929  ;;  %v2204_v37 = vpack.c.bf16 %v1972_v21, %v1971_v18  ;;  %v2028_v10 = vadd.f32 %v2027_v29, %v1972_v21  ;;  %v2180_v29 = vpack.c.bf16 %v4642_v53, %v4639_v9 }
 0x692   : > { %v3564_v42 = vpop.eup %3563  ;;  %3569 = vrcp.f32 %v1930_v25 }
 0x693   : > { %2212 = vxpose.xlu0.c.b16.cont [3/4] (short) %v2204_v37, 128  ;;  %v1959_v32 = vmul.f32 %v3564_v42, %v4769_v26  ;;  %v2198_v42 = vunpack.c.l.b16 %v2179_v61 }
 0x694   : > { %v3566_v30 = vpop.eup %3565 }
 0x695   : > { %v1973_v19 = vadd.f32 1e-06, %v1959_v32  ;;  %v1960_v24 = vmul.f32 %v3566_v30, %v4772_v46  ;;  %v2197_v32 = vunpack.c.h.b16 %v4618_v23  ;;  %v2941_v23 = vpack.c.bf16 %v4642_v53, %v4642_v53 }
 0x697   : > { %v1932_v27 = vpop.xlane.xlu0 %1931  ;;  %v2016_v36 = vsel %vm1995_vm2, %v1973_v19, 0.0  ;;  %v1974_v39 = vadd.f32 1e-06, %v1960_v24  ;;  %v2376_v30 = vpack.c.b16 %v2198_v42, %v2197_v32 }
 0x698   : > { %3571 = vrcp.f32 %v1932_v27  ;;  %v2205_v22 = vpack.c.bf16 %v2016_v36, %v2016_v36  ;;  %v2029_v3 = vadd.f32 %v2028_v10, %v2016_v36  ;;  %v2200_v27 = vunpack.c.l.b16 %v2180_v29 }
 0x699   : > { %v1934_v41 = vpop.xlane.xlu1 %1933  ;;  %v2407_v10 = vsel %vm2258_vm0, %v2941_v23, 0 }
 0x69a   : > { %v3568_v38 = vpop.eup %3567  ;;  %3573 = vrcp.f32 %v1934_v41  ;;  %2213 = vxpose.xlu0.c.b16.end [4/4] (short) %v2205_v22, 128  ;;  %v2030_v26 = vrot.slane %v2029_v3, 4  ;;  %v2377_v36 = vpack.c.b16 %v2200_v27, %v2199_v15 }
 0x69b   : > { %v1961_v43 = vmul.f32 %v3568_v38, %v4777_v60 }
 0x69c   : > { %v3570_v47 = vpop.eup %3569  ;;  %v2031_v54 = vadd.f32 %v2030_v26, %v2029_v3 }
 0x69d   : > { %v1975_v16 = vadd.f32 1e-06, %v1961_v43  ;;  %v1962_v56 = vmul.f32 %v3570_v47, %v4780_v7 }
 0x69e   : > { %v2032_v59 = vrot.slane %v2031_v54, 2 }
 0x69f   : > { %v1936_v11 = vpop.xlane.xlu0 %1935  ;;  %v2206_v51 = vpack.c.bf16 %v1975_v16, %v1974_v39  ;;  %v2036_v8 = vadd.f32 %v1975_v16, %v1974_v39  ;;  %v1976_v60 = vadd.f32 1e-06, %v1962_v56 }
 0x6a0   : > { %3575 = vrcp.f32 %v1936_v11  ;;  %v2033_v33 = vadd.f32 %v2032_v59, %v2031_v54 }
 0x6a1   : > { %v1938_v5 = vpop.xlane.xlu1 %1937  ;;  %2359 = vxpose.xlu1.c.b16.start [1/4] (short) %v2206_v51, 128  ;;  %v2037_v1 = vadd.f32 %v2036_v8, %v1976_v60 }
 0x6a2   : > { %v3572_v40 = vpop.eup %3571  ;;  %3577 = vrcp.f32 %v1938_v5  ;;  %v2034_v13 = vrot.slane %v2033_v33, 1 }
 0x6a3   : > { %v1963_v46 = vmul.f32 %v3572_v40, %v4785_v45 }
 0x6a4   : > { %v3574_v57 = vpop.eup %3573  ;;  %v2035_v12 = vadd.f32 %v2034_v13, %v2033_v33 }
 0x6a5   : > { %v1977_v62 = vadd.f32 1e-06, %v1963_v46  ;;  %v1964_v0 = vmul.f32 %v3574_v57, %v4788_v28 }
 0x6a7   : > { %v2207_v63 = vpack.c.bf16 %v1977_v62, %v1976_v60  ;;  %v2038_v52 = vadd.f32 %v2037_v1, %v1977_v62  ;;  %v1978_v7 = vadd.f32 1e-06, %v1964_v0 }
 0x6a9   : > { %2360 = vxpose.xlu1.c.b16.cont [2/4] (short) %v2207_v63, 128  ;;  %v2039_v20 = vadd.f32 %v2038_v52, %v1978_v7 }
 0x6aa   : > { %v3576_v2 = vpop.eup %3575 }
 0x6ab   : > { %v1965_v4 = vmul.f32 %v3576_v2, %v4791_v50 }
 0x6ac   : > { %v3578_v55 = vpop.eup %3577 }
 0x6ad   : > { %v1979_v49 = vadd.f32 1e-06, %v1965_v4  ;;  %v1966_v45 = vmul.f32 %v3578_v55, %v4794_v14 }
 0x6af   : > { %v2208_v58 = vpack.c.bf16 %v1979_v49, %v1978_v7  ;;  %v1980_v44 = vadd.f32 1e-06, %v1966_v45  ;;  %v2040_v48 = vadd.f32 %v2039_v20, %v1979_v49 }
 0x6b1   : > { %2361 = vxpose.xlu1.c.b16.cont [3/4] (short) %v2208_v58, 128  ;;  %v2023_v28 = vsel %vm1995_vm2, %v1980_v44, 0.0 }
 0x6b2   : > { %v2209_v34 = vpack.c.bf16 %v2023_v28, %v2023_v28  ;;  %v2041_v6 = vadd.f32 %v2040_v48, %v2023_v28 }
 0x6b3   : > { %2049 = vbcast.lane.b32.xlu0 %v2035_v12, 256 }
 0x6b4   : > { %v2042_v50 = vrot.slane %v2041_v6, 4 }
 0x6b5   : > { %2362 = vxpose.xlu1.c.b16.end [4/4] (short) %v2209_v34, 128 }
 0x6b6   : > { %v2043_v18 = vadd.f32 %v2042_v50, %v2041_v6 }
 0x6b7   : > { %2065 = vbcast.lane.b32.xlu0 %v2035_v12, 288 }
 0x6b8   : > { %v2044_v21 = vrot.slane %v2043_v18, 2 }
 0x6ba   : > { %v2045_v14 = vadd.f32 %v2044_v21, %v2043_v18 }
 0x6bb   : > { %2073 = vbcast.lane.b32.xlu0 %v2035_v12, 304 }
 0x6bc   : > { %v2046_v17 = vrot.slane %v2045_v14, 1 }
 0x6be   : > { %v2047_v25 = vadd.f32 %v2046_v17, %v2045_v14 }
 0x6bf   : > { %2081 = vbcast.lane.b32.xlu0 %v2035_v12, 320 }
 0x6c3   : > { %2089 = vbcast.lane.b32.xlu0 %v2035_v12, 336 }
 0x6c7   : > { %2097 = vbcast.lane.b32.xlu0 %v2035_v12, 352 }
 0x6c9   : > { %2053 = vbcast.lane.b32.xlu1 %v2035_v12, 264 }
 0x6cb   : > { %2105 = vbcast.lane.b32.xlu0 %v2035_v12, 368 }
 0x6cd   : > { %2057 = vbcast.lane.b32.xlu1 %v2035_v12, 272 }
 0x6cf   : > { %2112 = vbcast.lane.b32.xlu0 %v2047_v25, 256 }
 0x6d1   : > { %2061 = vbcast.lane.b32.xlu1 %v2035_v12, 280 }
 0x6d3   : > { %2120 = vbcast.lane.b32.xlu0 %v2047_v25, 272 }
 0x6d5   : > { %2069 = vbcast.lane.b32.xlu1 %v2035_v12, 296 }
 0x6d7   : > { %2128 = vbcast.lane.b32.xlu0 %v2047_v25, 288 }
 0x6d9   : > { %2077 = vbcast.lane.b32.xlu1 %v2035_v12, 312 }
 0x6db   : > { %2136 = vbcast.lane.b32.xlu0 %v2047_v25, 304 }
 0x6dd   : > { %2085 = vbcast.lane.b32.xlu1 %v2035_v12, 328 }
 0x6df   : > { %2144 = vbcast.lane.b32.xlu0 %v2047_v25, 320 }
 0x6e1   : > { %2093 = vbcast.lane.b32.xlu1 %v2035_v12, 344 }
 0x6e3   : > { %2152 = vbcast.lane.b32.xlu0 %v2047_v25, 336 }
 0x6e5   : > { %2101 = vbcast.lane.b32.xlu1 %v2035_v12, 360 }
 0x6e7   : > { %2160 = vbcast.lane.b32.xlu0 %v2047_v25, 352 }
 0x6e9   : > { %2109 = vbcast.lane.b32.xlu1 %v2035_v12, 376 }
 0x6eb   : > { %2168 = vbcast.lane.b32.xlu0 %v2047_v25, 368 }
 0x6ed   : > { %2116 = vbcast.lane.b32.xlu1 %v2047_v25, 264 }
 0x6f1   : > { %2124 = vbcast.lane.b32.xlu1 %v2047_v25, 280 }
 0x6f4   : > { %v2218_v37 = vpop.trf.xlu0 }
 0x6f5   : > { %2132 = vbcast.lane.b32.xlu1 %v2047_v25, 296  ;;  %3093 = vmatprep.mubr.msk.bf16.mxu0 %vm2233_vm3, %v2218_v37 }
 0x6f8   : > { %v2219_v19 = vpop.trf.xlu0 }
 0x6f9   : > { %2140 = vbcast.lane.b32.xlu1 %v2047_v25, 312  ;;  %3094 = vmatmul.mubr.msk.bf16.vlgmr.msra.gmra.mrb[56].mxu0 %vm2233_vm3, %v2219_v19 }
 0x6fa   : > { %3110 = vmatpush3.bf16.msra.mxu0 %v4628_v35 }
 0x6fb   : > { %3111 = vmatprep.subr.bf16.mxu0 %v2376_v30 }
 0x6fc   : > { %v2220_v31 = vpop.trf.xlu0 }
 0x6fd   : > { %2148 = vbcast.lane.b32.xlu1 %v2047_v25, 328  ;;  %3097 = vmatprep.mubr.msk.bf16.mxu0 %vm2233_vm3, %v2220_v31 }
 0x6fe   : > { %3112 = vmatpush3.bf16.msra.mxu0 %v2376_v30 }
 0x6ff   : > { %3113 = vmatprep.subr.bf16.mxu0 %v2377_v36 }
 0x700   : > { %v2221_v9 = vpop.trf.xlu0 }
 0x701   : > { %2156 = vbcast.lane.b32.xlu1 %v2047_v25, 344  ;;  %3098 = vmatmul.mubr.msk.bf16.gmra.mrb[60].mxu0 %vm2233_vm3, %v2221_v9 }
 0x702   : > { %3114 = vmatpush3.bf16.msra.mxu0 %v2377_v36 }
 0x703   : > { %3143 = vmatprep.subr.msk.bf16.mxu0 %vm2258_vm0, %v2941_v23 }
 0x704   : > { %v2222_v35 = vpop.trf.xlu0 }
 0x705   : > { %2164 = vbcast.lane.b32.xlu1 %v2047_v25, 360  ;;  %3101 = vmatprep.mubr.msk.bf16.mxu1 %vm2233_vm3, %v2222_v35 }
 0x706   : > { %3116 = vmatpush3.bf16.msra.mxu0 %v2407_v10 }
 0x708   : > { %v2223_v22 = vpop.trf.xlu0 }
 0x709   : > { %2172 = vbcast.lane.b32.xlu1 %v2047_v25, 376  ;;  %3102 = vmatmul.mubr.msk.bf16.vlgmr.msra.gmra.mrb[56].mxu1 %vm2233_vm3, %v2223_v22 }
 0x70c   : > { %v2224_v41 = vpop.trf.xlu0 }
 0x70d   : > { %3105 = vmatprep.mubr.msk.bf16.mxu1 %vm2233_vm3, %v2224_v41 }
 0x70f   : > { %v2367_v3 = vpop.trf.xlu1 }
 0x710   : > { %3117 = vmatprep.mubr.msk.bf16.mxu0 %vm2233_vm3, %v2367_v3  ;;  %v2225_v53 = vpop.trf.xlu0 }
 0x711   : > { %3106 = vmatmul.mubr.msk.bf16.gmra.mrb[60].mxu1 %vm2233_vm3, %v2225_v53 }
 0x713   : > { %v2368_v24 = vpop.trf.xlu1 }
 0x714   : > { %3118 = vmatmul.mubr.msk.bf16.vlgmr.msra.gmra.mrb[64].mxu0 %vm2233_vm3, %v2368_v24 }
 0x717   : > { %v2369_v38 = vpop.trf.xlu1 }
 0x718   : > { %3121 = vmatprep.mubr.msk.bf16.mxu0 %vm2233_vm3, %v2369_v38 }
 0x71b   : > { %v2370_v43 = vpop.trf.xlu1 }
 0x71c   : > { %3122 = vmatmul.mubr.msk.bf16.gmra.mrb[68].mxu0 %vm2233_vm3, %v2370_v43 }
 0x71f   : > { %v2371_v26 = vpop.trf.xlu1 }
 0x720   : > { %3125 = vmatprep.mubr.msk.bf16.mxu0 %vm2233_vm3, %v2371_v26 }
 0x723   : > { %v2372_v39 = vpop.trf.xlu1 }
 0x724   : > { %3126 = vmatmul.mubr.msk.bf16.gmra.mrb[72].mxu0 %vm2233_vm3, %v2372_v39 }
 0x727   : > { %v2373_v16 = vpop.trf.xlu1 }
 0x728   : > { %3129 = vmatprep.mubr.msk.bf16.mxu0 %vm2233_vm3, %v2373_v16 }
 0x72b   : > { %v2374_v47 = vpop.trf.xlu1 }
 0x72c   : > { %3130 = vmatmul.mubr.msk.bf16.gmra.mrb[76].mxu0 %vm2233_vm3, %v2374_v47 }
 0x72d   : > { %3882 = shalt.err (!%p3879_p10)
}
 0x72e   : > { %s3883_s13 = scalar_lea.hbm %s4844_s23, 1792  ;;  %s3887_s8 = scalar_lea.hbm %s4980_s9, 3584 }
 0x72f   : > { %p3884_p11 = scmp.ne.s32.totalorder %s4844_s23, %s3883_s13  ;;  %p3888_p9 = scmp.lt.u32.totalorder %s4844_s23, %s4980_s9 }
 0x730   : > { %p3889_p7 = scmp.lt.u32.totalorder %s3887_s8, %s3883_s13  ;;  %p3891_p12 = scmp.lt.u32.totalorder %s3883_s13, %s4844_s23 }
 0x731   : > { %p3885_p0 = pnand %p3884_p11, %p5011_p13 }
 0x732   : > { %p3890_p4 = por %p3889_p7, %p3888_p9 }
 0x733   : > { %p3886_p5 = pneg %p3885_p0 }
 0x734   : > { %p3892_p1 = por %p3891_p12, %p3890_p4 }
 0x736   : > { %p3893_p3 = pnand %p3892_p1, %p3886_p5 }
 0x738   : > { %3896 = shalt.err (!%p3893_p3)
}
 0x739   : > { %s4001_s19 = smov 128   ;;  %s4002_s17 = smov 8   ;;  %v2050_v54 = vpop.permute.xlu0 %2049 }
 0x73a   : > { %3180 = dma.vmem_to_hbm [thread:$0]  (%p5011_p13), %s4847_s24, 1792, %s4844_s23, %s2608_s25, %s4001_s19, %s4001_s19, %s4002_s17  }
 0x73b   : > { %v2054_v11 = vpop.permute.xlu1 %2053  ;;  %s2832_s23 = sshll.u32 %s4330_s28, 8  ;;  %s2943_s25 = sshll.u32 %s4075_s15, 12 }
 0x73c   : > { %s4881_s24 = scalar_lea.vmem [#allocation16], %s2832_s23  ;;  %s5012_s13 = sld [smem:[#allocation28_spill]] }
 0x73d   : > { %v2066_v56 = vpop.permute.xlu0 %2065  ;;  %s2622_s20 = sshll.u32 %s4881_s24, 4  ;;  %s2603_s15 = scalar_lea.sflag [#allocation4], %s4330_s28  ;;  %s4922_s20 = int_to_ptr.vmem [resolvable:$true] %s2622_s20 }
 0x73e   : > { %s3897_s16 = scalar_lea.vmem %s4922_s20, 4096  ;;  %s4003_s8 = smov [#allocation16]  }
 0x73f   : > { %v2058_v51 = vpop.permute.xlu1 %2057  ;;  %p3898_p2 = scmp.ne.s32.totalorder %s4922_s20, %s3897_s16  ;;  %s3901_s26 = sshll.u32 %s4003_s8, 4  ;;  %s3902_s26 = int_to_ptr.vmem [resolvable:$false] %s3901_s26 }
 0x740   : > { %3579 = vrcp.f32 %v2058_v51  ;;  %s3903_s14 = scalar_lea.vmem %s3902_s26, 8192  ;;  %p3904_p10 = scmp.lt.s32.totalorder %s4922_s20, %s3902_s26 }
 0x741   : > { %v2074_v46 = vpop.permute.xlu0 %2073  ;;  %3581 = vrcp.f32 %v2050_v54  ;;  %p3899_p8 = pnand %p3898_p2, %p5011_p13  ;;  %p3905_p11 = scmp.lt.s32.totalorder %s3903_s14, %s3897_s16 }
 0x742   : > { %s4920_s3 = scalar_lea.hbm %s5012_s13, %s2943_s25 }
 0x743   : > { %v2062_v5 = vpop.permute.xlu1 %2061  ;;  %p3900_p6 = pneg %p3899_p8  ;;  %p3906_p0 = por %p3905_p11, %p3904_p10 }
 0x744   : > { %3583 = vrcp.f32 %v2062_v5 }
 0x745   : > { %v2082_v59 = vpop.permute.xlu0 %2081  ;;  %3585 = vrcp.f32 %v2054_v11  ;;  %p3907_p5 = pnand %p3906_p0, %p3900_p6 }
 0x746   : > { %3587 = vrcp.f32 %v2074_v46 }
 0x747   : > { %v2070_v40 = vpop.permute.xlu1 %2069  ;;  %3589 = vrcp.f32 %v2066_v56 }
 0x749   : > { %v2090_v60 = vpop.permute.xlu0 %2089 }
 0x74a   : > { %v3580_v4 = vpop.eup %3579 }
 0x74b   : > { %v2078_v57 = vpop.permute.xlu1 %2077  ;;  %v3582_v55 = vpop.eup %3581 }
 0x74c   : > { %3591 = vrcp.f32 %v2078_v57 }
 0x74d   : > { %v2098_v63 = vpop.permute.xlu0 %2097  ;;  %3593 = vrcp.f32 %v2070_v40 }
 0x74e   : > { %v3584_v45 = vpop.eup %3583  ;;  %3595 = vrcp.f32 %v2090_v60 }
 0x74f   : > { %v2086_v8 = vpop.permute.xlu1 %2085  ;;  %v3586_v12 = vpop.eup %3585  ;;  %3597 = vrcp.f32 %v2082_v59 }
 0x750   : > { %v3588_v50 = vpop.eup %3587 }
 0x751   : > { %v2106_v33 = vpop.permute.xlu0 %2105  ;;  %v3590_v14 = vpop.eup %3589 }
 0x753   : > { %v2094_v62 = vpop.permute.xlu1 %2093 }
 0x754   : > { %3599 = vrcp.f32 %v2094_v62 }
 0x755   : > { %v2113_v2 = vpop.permute.xlu0 %2112  ;;  %3601 = vrcp.f32 %v2086_v8 }
 0x756   : > { %v3592_v61 = vpop.eup %3591  ;;  %3603 = vrcp.f32 %v2098_v63 }
 0x757   : > { %v4876_v0 = vpop.permute.xlu1 %2101  ;;  %v3594_v32 = vpop.eup %3593  ;;  %3605 = vrcp.f32 %v2106_v33 }
 0x758   : > { %v3596_v31 = vpop.eup %3595 }
 0x759   : > { %v2121_v20 = vpop.permute.xlu0 %2120  ;;  %v3598_v23 = vpop.eup %3597 }
 0x75a   : > { %3607 = vrcp.f32 %v2121_v20 }
 0x75b   : > { %v2110_v1 = vpop.permute.xlu1 %2109 }
 0x75c   : > { %3609 = vrcp.f32 %v2110_v1 }
 0x75d   : > { %v2129_v18 = vpop.permute.xlu0 %2128  ;;  %3611 = vrcp.f32 %v4876_v0 }
 0x75e   : > { %v3600_v22 = vpop.eup %3599  ;;  %3613 = vrcp.f32 %v2113_v2 }
 0x75f   : > { %v4879_v52 = vpop.permute.xlu1 %2116  ;;  %v3602_v53 = vpop.eup %3601 }
 0x760   : > { %v3604_v16 = vpop.eup %3603 }
 0x761   : > { %v2137_v15 = vpop.permute.xlu0 %2136  ;;  %v3606_v47 = vpop.eup %3605 }
 0x763   : > { %v2125_v34 = vpop.permute.xlu1 %2124 }
 0x764   : > { %3615 = vrcp.f32 %v2125_v34  ;;  %v3608_v51 = vpop.eup %3607 }
 0x765   : > { %v2145_v43 = vpop.permute.xlu0 %2144  ;;  %3617 = vrcp.f32 %v4879_v52 }
 0x766   : > { %3619 = vrcp.f32 %v2137_v15  ;;  %v3610_v56 = vpop.eup %3609 }
 0x767   : > { %v2133_v37 = vpop.permute.xlu1 %2132  ;;  %3621 = vrcp.f32 %v2129_v18  ;;  %v3612_v59 = vpop.eup %3611 }
 0x768   : > { %v3614_v63 = vpop.eup %3613 }
 0x769   : > { %v2153_v40 = vpop.permute.xlu0 %2152 }
 0x76b   : > { %v2141_v36 = vpop.permute.xlu1 %2140 }
 0x76c   : > { %3623 = vrcp.f32 %v2141_v36 }
 0x76d   : > { %3625 = vrcp.f32 %v2133_v37  ;;  %v2161_v20 = vpop.permute.xlu0 %2160 }
 0x76e   : > { %v3616_v52 = vpop.eup %3615  ;;  %3627 = vrcp.f32 %v2153_v40 }
 0x76f   : > { %v2149_v39 = vpop.permute.xlu1 %2148  ;;  %3629 = vrcp.f32 %v2145_v43 }
 0x773   : > { %v2157_v0 = vpop.permute.xlu1 %2156 }
 0x774   : > { %3631 = vrcp.f32 %v2157_v0 }
 0x775   : > { %3633 = vrcp.f32 %v2149_v39 }
 0x7cc   : > { %v3095_v7 = vpop.f32.mrb[56].mxu0 }
 0x7cd   : > { %v2540_v13 = vmul.f32 %v3580_v4, %v3095_v7  ;;  %v2296_v49 = vpop.f32.mrb[57].mxu0 }
 0x7ce   : > { %v2538_v58 = vmul.f32 %v3582_v55, %v2296_v49  ;;  %v3096_v44 = vpop.f32.mrb[58].mxu0  ;;  %v3618_v55 = vpop.eup %3617 }
 0x7cf   : > { %2572 = vst [vmem:[%s4881_s24 + $0x10] sm:$0xff] %v2540_v13  ;;  %v2541_v28 = vmul.f32 %v3584_v45, %v3096_v44  ;;  %v2299_v48 = vpop.f32.mrb[59].mxu0  ;;  %v3620_v44 = vpop.eup %3619 }
 0x7d0   : > { %2570 = vst [vmem:[%s4881_s24] sm:$0xff] %v2538_v58  ;;  %v2539_v6 = vmul.f32 %v3586_v12, %v2299_v48  ;;  %v2165_v58 = vpop.permute.xlu1 %2164 }
 0x7d1   : > { %2573 = vst [vmem:[%s4881_s24 + $0x18] sm:$0xff] %v2541_v28  ;;  %v3622_v28 = vpop.eup %3621 }
 0x7d2   : > { %2571 = vst [vmem:[%s4881_s24 + $0x8] sm:$0xff] %v2539_v6  ;;  %v3624_v6 = vpop.eup %3623 }
 0x7d4   : > { %v3099_v21 = vpop.f32.mrb[60].mxu0  ;;  %v2173_v37 = vpop.permute.xlu1 %2172 }
 0x7d5   : > { %v2544_v17 = vmul.f32 %v3588_v50, %v3099_v21  ;;  %v2312_v25 = vpop.f32.mrb[61].mxu0  ;;  %v3626_v21 = vpop.eup %3625 }
 0x7d6   : > { %v2542_v42 = vmul.f32 %v3590_v14, %v2312_v25  ;;  %v3100_v29 = vpop.f32.mrb[62].mxu0  ;;  %v2169_v14 = vpop.permute.xlu0 %2168 }
 0x7d7   : > { %2576 = vst [vmem:[%s4881_s24 + $0x30] sm:$0xff] %v2544_v17  ;;  %v2545_v19 = vmul.f32 %v3592_v61, %v3100_v29  ;;  %v2315_v30 = vpop.f32.mrb[63].mxu0  ;;  %3635 = vrcp.f32 %v2169_v14 }
 0x7d8   : > { %2574 = vst [vmem:[%s4881_s24 + $0x20] sm:$0xff] %v2542_v42  ;;  %v2543_v27 = vmul.f32 %v3594_v32, %v2315_v30  ;;  %3637 = vrcp.f32 %v2161_v20  ;;  %v3628_v42 = vpop.eup %3627 }
 0x7d9   : > { %2577 = vst [vmem:[%s4881_s24 + $0x38] sm:$0xff] %v2545_v19  ;;  %3639 = vrcp.f32 %v2173_v37  ;;  %v3630_v32 = vpop.eup %3629 }
 0x7da   : > { %2575 = vst [vmem:[%s4881_s24 + $0x28] sm:$0xff] %v2543_v27  ;;  %3641 = vrcp.f32 %v2165_v58  ;;  %v3632_v27 = vpop.eup %3631 }
 0x7db   : > { %v3634_v36 = vpop.eup %3633 }
 0x7dc   : > { %v3103_v9 = vpop.f32.mrb[56].mxu1 }
 0x7dd   : > { %v2548_v35 = vmul.f32 %v3596_v31, %v3103_v9  ;;  %v2328_v10 = vpop.f32.mrb[57].mxu1 }
 0x7de   : > { %v2546_v41 = vmul.f32 %v3598_v23, %v2328_v10  ;;  %v3104_v3 = vpop.f32.mrb[58].mxu1 }
 0x7df   : > { %2580 = vst [vmem:[%s4881_s24 + $0x50] sm:$0xff] %v2548_v35  ;;  %v2549_v24 = vmul.f32 %v3600_v22, %v3104_v3  ;;  %v2331_v38 = vpop.f32.mrb[59].mxu1 }
 0x7e0   : > { %2578 = vst [vmem:[%s4881_s24 + $0x40] sm:$0xff] %v2546_v41  ;;  %v2547_v26 = vmul.f32 %v3602_v53, %v2331_v38 }
 0x7e1   : > { %2581 = vst [vmem:[%s4881_s24 + $0x58] sm:$0xff] %v2549_v24  ;;  %v3636_v10 = vpop.eup %3635 }
 0x7e2   : > { %2579 = vst [vmem:[%s4881_s24 + $0x48] sm:$0xff] %v2547_v26  ;;  %v3638_v41 = vpop.eup %3637 }
 0x7e3   : > { %v3640_v24 = vpop.eup %3639 }
 0x7e4   : > { %v3107_v11 = vpop.f32.mrb[60].mxu1  ;;  %v3642_v26 = vpop.eup %3641 }
 0x7e5   : > { %v2552_v54 = vmul.f32 %v3606_v47, %v3107_v11  ;;  %v2344_v5 = vpop.f32.mrb[61].mxu1 }
 0x7e6   : > { %v2550_v46 = vmul.f32 %v3604_v16, %v2344_v5  ;;  %v3108_v57 = vpop.f32.mrb[62].mxu1 }
 0x7e7   : > { %2584 = vst [vmem:[%s4881_s24 + $0x70] sm:$0xff] %v2552_v54  ;;  %v2553_v8 = vmul.f32 %v3610_v56, %v3108_v57  ;;  %v2347_v60 = vpop.f32.mrb[63].mxu1  ;;  %v3119_v62 = vpop.f32.mrb[64].mxu0 }
 0x7e8   : > { %2582 = vst [vmem:[%s4881_s24 + $0x60] sm:$0xff] %v2550_v46  ;;  %v2551_v33 = vmul.f32 %v3612_v59, %v2347_v60  ;;  %v2556_v1 = vmul.f32 %v3608_v51, %v3119_v62  ;;  %v2443_v2 = vpop.f32.mrb[65].mxu0 }
 0x7e9   : > { %2585 = vst [vmem:[%s4881_s24 + $0x78] sm:$0xff] %v2553_v8  ;;  %v2554_v4 = vmul.f32 %v3614_v63, %v2443_v2  ;;  %v3120_v7 = vpop.f32.mrb[66].mxu0 }
 0x7ea   : > { %2583 = vst [vmem:[%s4881_s24 + $0x68] sm:$0xff] %v2551_v33  ;;  %2588 = vst [vmem:[%s4881_s24 + $0x90] sm:$0xff] %v2556_v1  ;;  %v2557_v13 = vmul.f32 %v3616_v52, %v3120_v7  ;;  %v2446_v49 = vpop.f32.mrb[67].mxu0 }
 0x7eb   : > { %2586 = vst [vmem:[%s4881_s24 + $0x80] sm:$0xff] %v2554_v4  ;;  %v2555_v45 = vmul.f32 %v3618_v55, %v2446_v49 }
 0x7ec   : > { %2589 = vst [vmem:[%s4881_s24 + $0x98] sm:$0xff] %v2557_v13 }
 0x7ed   : > { %2587 = vst [vmem:[%s4881_s24 + $0x88] sm:$0xff] %v2555_v45 }
 0x7ef   : > { %v3123_v12 = vpop.f32.mrb[68].mxu0 }
 0x7f0   : > { %v2560_v48 = vmul.f32 %v3620_v44, %v3123_v12  ;;  %v2459_v34 = vpop.f32.mrb[69].mxu0 }
 0x7f1   : > { %v2558_v50 = vmul.f32 %v3622_v28, %v2459_v34  ;;  %v3124_v18 = vpop.f32.mrb[70].mxu0 }
 0x7f2   : > { %2592 = vst [vmem:[%s4881_s24 + $0xb0] sm:$0xff] %v2560_v48  ;;  %v2561_v17 = vmul.f32 %v3624_v6, %v3124_v18  ;;  %v2462_v25 = vpop.f32.mrb[71].mxu0 }
 0x7f3   : > { %2590 = vst [vmem:[%s4881_s24 + $0xa0] sm:$0xff] %v2558_v50  ;;  %v2559_v61 = vmul.f32 %v3626_v21, %v2462_v25 }
 0x7f4   : > { %2593 = vst [vmem:[%s4881_s24 + $0xb8] sm:$0xff] %v2561_v17 }
 0x7f5   : > { %2591 = vst [vmem:[%s4881_s24 + $0xa8] sm:$0xff] %v2559_v61 }
 0x7f7   : > { %v3127_v29 = vpop.f32.mrb[72].mxu0 }
 0x7f8   : > { %v2564_v19 = vmul.f32 %v3628_v42, %v3127_v29  ;;  %v2475_v30 = vpop.f32.mrb[73].mxu0 }
 0x7f9   : > { %v2562_v15 = vmul.f32 %v3630_v32, %v2475_v30  ;;  %v3128_v31 = vpop.f32.mrb[74].mxu0 }
 0x7fa   : > { %2596 = vst [vmem:[%s4881_s24 + $0xd0] sm:$0xff] %v2564_v19  ;;  %v2565_v9 = vmul.f32 %v3632_v27, %v3128_v31  ;;  %v2478_v23 = vpop.f32.mrb[75].mxu0 }
 0x7fb   : > { %2594 = vst [vmem:[%s4881_s24 + $0xc0] sm:$0xff] %v2562_v15  ;;  %v2563_v35 = vmul.f32 %v3634_v36, %v2478_v23 }
 0x7fc   : > { %2597 = vst [vmem:[%s4881_s24 + $0xd8] sm:$0xff] %v2565_v9 }
 0x7fd   : > { %2595 = vst [vmem:[%s4881_s24 + $0xc8] sm:$0xff] %v2563_v35 }
 0x7ff   : > { %v3131_v22 = vpop.f32.mrb[76].mxu0 }
 0x800   : > { %v2568_v3 = vmul.f32 %v3636_v10, %v3131_v22  ;;  %v2491_v53 = vpop.f32.mrb[77].mxu0 }
 0x801   : > { %v2566_v38 = vmul.f32 %v3638_v41, %v2491_v53  ;;  %v3132_v43 = vpop.f32.mrb[78].mxu0 }
 0x802   : > { %2600 = vst [vmem:[%s4881_s24 + $0xf0] sm:$0xff] %v2568_v3  ;;  %v2569_v39 = vmul.f32 %v3640_v24, %v3132_v43  ;;  %v2494_v16 = vpop.f32.mrb[79].mxu0 }
 0x803   : > { %2598 = vst [vmem:[%s4881_s24 + $0xe0] sm:$0xff] %v2566_v38  ;;  %v2567_v47 = vmul.f32 %v3642_v26, %v2494_v16 }
 0x804   : > { %2601 = vst [vmem:[%s4881_s24 + $0xf8] sm:$0xff] %v2569_v39 }
 0x805   : > { %2599 = vst [vmem:[%s4881_s24 + $0xe8] sm:$0xff] %v2567_v47 }
 0x806   : > { %3910 = shalt.err (!%p3907_p5)
}
 0x807   : > { %s3911_s23 = scalar_lea.hbm %s4920_s3, 4096  ;;  %s3915_s18 = scalar_lea.hbm %s5012_s13, 8192 }
 0x808   : > { %p3912_p9 = scmp.ne.s32.totalorder %s4920_s3, %s3911_s23  ;;  %p3916_p12 = scmp.lt.u32.totalorder %s4920_s3, %s5012_s13 }
 0x809   : > { %p3917_p1 = scmp.lt.u32.totalorder %s3915_s18, %s3911_s23  ;;  %p3919_p2 = scmp.lt.u32.totalorder %s3911_s23, %s4920_s3 }
 0x80a   : > { %p3913_p7 = pnand %p3912_p9, %p5011_p13 }
 0x80b   : > { %p3918_p3 = por %p3917_p1, %p3916_p12 }
 0x80c   : > { %p3914_p4 = pneg %p3913_p7 }
 0x80d   : > { %p3920_p8 = por %p3919_p2, %p3918_p3 }
 0x80f   : > { %p3921_p6 = pnand %p3920_p8, %p3914_p4 }
 0x811   : > { %3924 = shalt.err (!%p3921_p6)
}
 0x812   : > { %3179 = dma.vmem_to_hbm [thread:$0]  (%p5011_p13), %s4922_s20, 4096, %s4920_s3, %s2603_s15, %s4001_s19, %s4001_s19, %s4002_s17  }
 0x813 PF: > { %s2654_s16 = sand.u32 1, %s3971_s30   ;;  %p5013_p10 = scmp.ne.s32.totalorder %s4998_s22, 0 }
 0x814   : > { %p5014_p11 = scmp.ge.s32.totalorder %s3983_s12, 2  ;;  %s2655_s26 = scalar_lea.sflag [#allocation4], %s2654_s16 }
 0x816   : > { %p3210_p0 = pnand %p5014_p11, %p5013_p10 }
 0x818   : > { %3962 = dma.done.wait (!%p3210_p0), %s2655_s26, 4096  }
 0x819   : > { %3964 = vsyncadd (!%p3210_p0), %s2655_s26, 4294963200  ;;  %s2664_s1 = scalar_lea.sflag [#allocation18], %s2654_s16 }
 0x81a   : > { %3966 = dma.done.wait (!%p3210_p0), %s2664_s1, 1792  }
 0x81b   : > { %3968 = vsyncadd (!%p3210_p0), %s2664_s1, 4294965504  ;;  %p30_p13 = scmp.ge.s32.totalorder %s4254_s27, 4   ;;  %s5015_s30 = smov %s3975_s10 }
 0x81c   : > { %s5016_s10 = smov %s3979_s11  ;;  %s5017_s11 = smov %s4266_s21 }
 0x81d   : > { %s5018_s12 = smov %s4254_s27  ;;  %32 = sbr.rel (!%p30_p13) target bundleno = 15 (0xf), region = 142 }
 0x824   :  { %2669 = vsyncpa [#allocation3], 1 }
 0x825   :  { %2671 = vsyncpa [#allocation3 + $0x1], 1 }
 0x826   :  { %2672 = vsyncpa [#allocation6], 1 }
 0x827   :  { %2673 = vsyncpa [#allocation9], 1 }
 0x828   :  { %2674 = vsyncpa [#allocation12], 1 }
 0x829   :  { %2675 = vsyncpa [#allocation15], 1 }
 0x82a   :  { %2676 = vsyncpa [#allocation4], 1 }
 0x82b   :  { %2678 = vsyncpa [#allocation4 + $0x1], 1 }
 0x82c   :  { %2679 = vsyncpa [#allocation18], 1 }
 0x82d   :  { %2681 = vsyncpa [#allocation18 + $0x1], 1 }

</bundles_post_ra>
